<compile_context>
chip_gen: v5e
topology: v5e:2x2
jax: 0.10.0
libtpu: 0.0.40
codegen_flags: <defaults>
</compile_context>

<pallas_src>
import functools

import jax
import jax.numpy as jnp
from jax.experimental import pallas as pl
from jax.experimental.pallas import tpu as pltpu


def _add_conv1x1_bn_kernel(x1_ref, x2_ref, w_ref, gamma_ref, beta_ref, o_ref,
                           *, eps, true_l):
    # Elementwise add of the two feature maps (VPU).
    s = x1_ref[...] + x2_ref[...]                                   # (C_in, Lp)

    # 1x1 conv == matmul on the MXU: (TILE_CO, C_in) @ (C_in, Lp) -> (TILE_CO, Lp)
    y = jnp.dot(w_ref[...], s, preferred_element_type=jnp.float32)

    # BatchNorm2d training-mode batch statistics over the (true) lane axis,
    # fused into a single per-channel scale/shift.  Zero-padded columns of s
    # produce zero columns of y, so they do not perturb sum / sum-of-squares.
    inv_l = 1.0 / true_l
    sum_y = jnp.sum(y, axis=1, keepdims=True)                       # (TILE_CO, 1)
    sum_yy = jnp.sum(y * y, axis=1, keepdims=True)                  # (TILE_CO, 1)
    mean = sum_y * inv_l
    var = sum_yy * inv_l - mean * mean                              # biased variance
    inv_std = jax.lax.rsqrt(var + eps)                              # EUP slot

    scale = gamma_ref[...] * inv_std                                # (TILE_CO, 1)
    shift = beta_ref[...] - mean * scale                            # (TILE_CO, 1)

    # Single fused elementwise pass over the big tile, lane-dense store.
    o_ref[...] = y * scale + shift


def add_conv1x1_bn(x178, x163, weight, gamma, beta, eps=1e-3, tile_co=384):
    """x178, x163: (N, C_in, H, W); weight: (C_out, C_in, 1, 1); gamma/beta: (C_out,)."""
    N, C_in, H, W = x178.shape
    C_out = weight.shape[0]
    L = N * H * W
    L_pad = ((L + 127) // 128) * 128          # lane-dense (196 -> 256)

    assert C_out % tile_co == 0 and tile_co % 8 == 0
    n_tiles = C_out // tile_co

    # NCHW -> (C_in, N*H*W).  For N=1 these transposes are free reshapes.
    # TODO(synk): for N > 1 move this relayout into the kernel via index_map.
    x1 = jnp.transpose(x178, (1, 0, 2, 3)).reshape(C_in, L).astype(jnp.float32)
    x2 = jnp.transpose(x163, (1, 0, 2, 3)).reshape(C_in, L).astype(jnp.float32)
    if L_pad != L:
        x1 = jnp.pad(x1, ((0, 0), (0, L_pad - L)))
        x2 = jnp.pad(x2, ((0, 0), (0, L_pad - L)))

    w2 = weight.reshape(C_out, C_in).astype(jnp.float32)
    # (C_out, 1) layout pads lanes to 128 in VMEM; acceptable at this size and
    # keeps per-channel (sublane) broadcasting trivially cheap.
    g2 = gamma.reshape(C_out, 1).astype(jnp.float32)
    b2 = beta.reshape(C_out, 1).astype(jnp.float32)

    cost = pl.CostEstimate(
        flops=2 * C_out * C_in * L_pad + 6 * C_out * L_pad,
        transcendentals=C_out,
        bytes_accessed=4 * (2 * C_in * L_pad + C_out * C_in + 2 * C_out
                            + C_out * L_pad),
    )

    out = pl.pallas_call(
        functools.partial(_add_conv1x1_bn_kernel, eps=eps, true_l=float(L)),
        out_shape=jax.ShapeDtypeStruct((C_out, L_pad), jnp.float32),
        grid=(n_tiles,),
        in_specs=[
            # x1/x2: full arrays, constant block index -> DMA'd once, resident.
            pl.BlockSpec((C_in, L_pad), lambda i: (0, 0)),
            pl.BlockSpec((C_in, L_pad), lambda i: (0, 0)),
            # weight / gamma / beta: tiled along C_out.
            pl.BlockSpec((tile_co, C_in), lambda i: (i, 0)),
            pl.BlockSpec((tile_co, 1), lambda i: (i, 0)),
            pl.BlockSpec((tile_co, 1), lambda i: (i, 0)),
        ],
        out_specs=pl.BlockSpec((tile_co, L_pad), lambda i: (i, 0)),
        compiler_params=pltpu.CompilerParams(
            dimension_semantics=("parallel",)),   # v7x: shard C_out tiles over 2 TCs
        cost_estimate=cost,
    )(x1, x2, w2, g2, b2)

    # (C_out, L_pad) -> drop lane padding -> NCHW
    return jnp.transpose(out[:, :L].reshape(C_out, N, H, W), (1, 0, 2, 3))


def _reference(x178, x163, weight, gamma, beta, eps=1e-3):
    s = x178 + x163
    y = jax.lax.conv_general_dilated(
        s, weight, window_strides=(1, 1), padding="VALID",
        dimension_numbers=("NCHW", "OIHW", "NCHW"))
    mean = jnp.mean(y, axis=(0, 2, 3), keepdims=True)
    var = jnp.mean((y - mean) ** 2, axis=(0, 2, 3), keepdims=True)
    return (y - mean) / jnp.sqrt(var + eps) * gamma[None, :, None, None] \
        + beta[None, :, None, None]


if __name__ == "__main__":
    key = jax.random.PRNGKey(0)
    k1, k2, k3 = jax.random.split(key, 3)

    N, C_in, H, W = 1, 192, 14, 14
    C_out = 768

    x178 = jax.random.normal(k1, (N, C_in, H, W), dtype=jnp.float32)
    x163 = jax.random.normal(k2, (N, C_in, H, W), dtype=jnp.float32)

    # Deterministic parameter init (synthetic, not a checkpoint load).
    weight = jax.random.normal(k3, (C_out, C_in, 1, 1), dtype=jnp.float32) * 0.05
    gamma = jnp.ones((C_out,), dtype=jnp.float32)   # BatchNorm default weight
    beta = jnp.zeros((C_out,), dtype=jnp.float32)   # BatchNorm default bias

    out = add_conv1x1_bn(x178, x163, weight, gamma, beta)
    out = jax.block_until_ready(out)

    ref = _reference(x178, x163, weight, gamma, beta)
    assert out.shape == (N, C_out, H, W)
    assert jnp.allclose(out, ref, atol=1e-3, rtol=1e-3)

    print("KERNEL_OK")
</pallas_src>

<mosaic_0001>
module attributes {stable_mosaic.version = 11 : i64} {
  func.func @_add_conv1x1_bn_kernel(%arg0: i32, %arg1: memref<192x256xf32, #tpu.memory_space<vmem>>, %arg2: memref<192x256xf32, #tpu.memory_space<vmem>>, %arg3: memref<384x192xf32, #tpu.memory_space<vmem>>, %arg4: memref<384x1xf32, #tpu.memory_space<vmem>>, %arg5: memref<384x1xf32, #tpu.memory_space<vmem>>, %arg6: memref<384x256xf32, #tpu.memory_space<vmem>>) attributes {dimension_semantics = [#tpu.dimension_semantics<parallel>], iteration_bounds = array<i64: 2>, scalar_prefetch = 0 : i64, scratch_operands = 0 : i64, tpu.core_type = #tpu.core_type<tc>, window_params = [{pipeline_mode = #tpu.pipeline_mode<synchronous>, transform_indices = @transform_0, window_bounds = array<i64: 192, 256>}, {pipeline_mode = #tpu.pipeline_mode<synchronous>, transform_indices = @transform_1, window_bounds = array<i64: 192, 256>}, {transform_indices = @transform_2, window_bounds = array<i64: 384, 192>}, {transform_indices = @transform_3, window_bounds = array<i64: 384, 1>}, {transform_indices = @transform_4, window_bounds = array<i64: 384, 1>}, {transform_indices = @transform_5, window_bounds = array<i64: 384, 256>}]} {
    %c0 = arith.constant 0 : index
    %c0_0 = arith.constant 0 : index
    %0 = vector.load %arg1[%c0, %c0_0] : memref<192x256xf32, #tpu.memory_space<vmem>>, vector<192x256xf32>
    %c0_1 = arith.constant 0 : index
    %c0_2 = arith.constant 0 : index
    %1 = vector.load %arg2[%c0_1, %c0_2] : memref<192x256xf32, #tpu.memory_space<vmem>>, vector<192x256xf32>
    %2 = arith.addf %0, %1 : vector<192x256xf32>
    %c0_3 = arith.constant 0 : index
    %c0_4 = arith.constant 0 : index
    %3 = vector.load %arg3[%c0_3, %c0_4] : memref<384x192xf32, #tpu.memory_space<vmem>>, vector<384x192xf32>
    %cst = arith.constant dense<0.000000e+00> : vector<384x256xf32>
    %4 = tpu.matmul %3, %2, %cst {dimension_numbers = #tpu.dot_dimension_numbers<[1], [0], [0], [1], [0, 0, 1, 1], [], []>} : vector<384x192xf32>, vector<192x256xf32>, vector<384x256xf32> -> vector<384x256xf32>
    %cst_5 = arith.constant dense<0.000000e+00> : vector<384xf32>
    %5 = vector.multi_reduction <add>, %4, %cst_5 [1] : vector<384x256xf32> to vector<384xf32>
    %6 = vector.shape_cast %5 : vector<384xf32> to vector<384x1xf32>
    %7 = arith.mulf %4, %4 : vector<384x256xf32>
    %cst_6 = arith.constant dense<0.000000e+00> : vector<384xf32>
    %8 = vector.multi_reduction <add>, %7, %cst_6 [1] : vector<384x256xf32> to vector<384xf32>
    %9 = vector.shape_cast %8 : vector<384xf32> to vector<384x1xf32>
    %cst_7 = arith.constant 0.00510204071 : f32
    %10 = vector.broadcast %cst_7 : f32 to vector<384x1xf32>
    %11 = arith.mulf %6, %10 : vector<384x1xf32>
    %cst_8 = arith.constant 0.00510204071 : f32
    %12 = vector.broadcast %cst_8 : f32 to vector<384x1xf32>
    %13 = arith.mulf %9, %12 : vector<384x1xf32>
    %14 = arith.mulf %11, %11 : vector<384x1xf32>
    %15 = arith.subf %13, %14 : vector<384x1xf32>
    %cst_9 = arith.constant 1.000000e-03 : f32
    %16 = vector.broadcast %cst_9 : f32 to vector<384x1xf32>
    %17 = arith.addf %15, %16 : vector<384x1xf32>
    %18 = math.rsqrt %17 : vector<384x1xf32>
    %c0_10 = arith.constant 0 : index
    %c0_11 = arith.constant 0 : index
    %19 = vector.load %arg4[%c0_10, %c0_11] : memref<384x1xf32, #tpu.memory_space<vmem>>, vector<384x1xf32>
    %20 = arith.mulf %19, %18 : vector<384x1xf32>
    %c0_12 = arith.constant 0 : index
    %c0_13 = arith.constant 0 : index
    %21 = vector.load %arg5[%c0_12, %c0_13] : memref<384x1xf32, #tpu.memory_space<vmem>>, vector<384x1xf32>
    %22 = arith.mulf %11, %20 : vector<384x1xf32>
    %23 = arith.subf %21, %22 : vector<384x1xf32>
    %24 = vector.broadcast %20 : vector<384x1xf32> to vector<384x256xf32>
    %25 = arith.mulf %4, %24 : vector<384x256xf32>
    %26 = vector.broadcast %23 : vector<384x1xf32> to vector<384x256xf32>
    %27 = arith.addf %25, %26 : vector<384x256xf32>
    %c0_14 = arith.constant 0 : index
    %c0_15 = arith.constant 0 : index
    %28 = vector.load %arg6[%c0_14, %c0_15] : memref<384x256xf32, #tpu.memory_space<vmem>>, vector<384x256xf32>
    tpu.vector_store %arg6[%c0_14, %c0_15], %27 {strides = array<i32>} : memref<384x256xf32, #tpu.memory_space<vmem>>, vector<384x256xf32>,
    return
  }
  func.func @transform_0(%arg0: i32) -> (i32, i32) {
    %c0_i32 = arith.constant 0 : i32
    %c0_i32_0 = arith.constant 0 : i32
    %c0_i32_1 = arith.constant 0 : i32
    return %c0_i32, %c0_i32_0 : i32, i32
  }
  func.func @transform_1(%arg0: i32) -> (i32, i32) {
    %c0_i32 = arith.constant 0 : i32
    %c0_i32_0 = arith.constant 0 : i32
    %c0_i32_1 = arith.constant 0 : i32
    return %c0_i32, %c0_i32_0 : i32, i32
  }
  func.func @transform_2(%arg0: i32) -> (i32, i32) {
    %c0_i32 = arith.constant 0 : i32
    %c0_i32_0 = arith.constant 0 : i32
    return %arg0, %c0_i32 : i32, i32
  }
  func.func @transform_3(%arg0: i32) -> (i32, i32) {
    %c0_i32 = arith.constant 0 : i32
    %c0_i32_0 = arith.constant 0 : i32
    return %arg0, %c0_i32 : i32, i32
  }
  func.func @transform_4(%arg0: i32) -> (i32, i32) {
    %c0_i32 = arith.constant 0 : i32
    %c0_i32_0 = arith.constant 0 : i32
    return %arg0, %c0_i32 : i32, i32
  }
  func.func @transform_5(%arg0: i32) -> (i32, i32) {
    %c0_i32 = arith.constant 0 : i32
    %c0_i32_0 = arith.constant 0 : i32
    return %arg0, %c0_i32 : i32, i32
  }
}

</mosaic_0001>

<bundles_post_ra>
// kernel: tpu_custom_call.1
= control target key start
LH: loop header
LB: loop body
LE: loop exit
PB: predicated region body
PF: predicated region fallthrough
CT: control target
= control target key end

     0   :  { %10 = vsyncpa [#allocation3], 0  ;;  %s5876_s0 = inlined_call_operand.vmem [shape: f32[192,256], index: 0, kind: input, shape index: {}]   ;;  %s5877_s1 = inlined_call_operand.vmem [shape: f32[192,256], index: 1, kind: input, shape index: {}]   ;;  %s5878_s2 = inlined_call_operand.vmem [shape: f32[768,192], index: 2, kind: input, shape index: {}]   ;;  %s5879_s3 = inlined_call_operand.vmem [shape: f32[768,1], index: 3, kind: input, shape index: {}]   ;;  %s5880_s4 = inlined_call_operand.vmem [shape: f32[768,1], index: 4, kind: input, shape index: {}]   ;;  %s5881_s5 = inlined_call_operand.hbm [shape: f32[768,256], index: 5, kind: output, shape index: {}]  }
   0x1   :  { %12 = vsyncpa [#allocation3 + $0x1], 0  ;;  %s3868_s18 = smov 0   ;;  %s3870_s19 = smov 0  }
   0x2   :  { %s3872_s20 = smov 0   ;;  %s3874_s21 = smov 0  }
   0x3 LB: > { %s3889_s22 = sadd.s32 4294967295, %s3833_s21   ;;  %s3517_s23 = sadd.s32 4294967294, %s3833_s21   ;;  %s3833_s21 = sphi %s3874_s21, %s6091_s21   ;;  %s3829_s20 = sphi %s3872_s20, %s6090_s20   ;;  %s3825_s19 = sphi %s3870_s19, %s6089_s19   ;;  %s3821_s18 = sphi %s3868_s18, %s6088_s18  }
   0x4   : > { %s3893_s24 = sadd.s32 1, %s3833_s21   ;;  %s145_s25 = sadd.s32 1, %s3829_s20 }
   0x5   : > { %s142_s26 = ssub.s32 %s3833_s21, %s3893_s24  ;;  %p155_p0 = scmp.ne.s32.totalorder %s3829_s20, %s3825_s19 }
   0x6   : > { %p143_p1 = scmp.eq.s32.totalorder %s142_s26, 0  ;;  %p156_p2 = scmp.eq.s32.totalorder %s3889_s22, 1 }
   0x7   : > { %p161_p3 = scmp.ne.s32.totalorder %s3825_s19, %s3821_s18  ;;  %p162_p4 = scmp.eq.s32.totalorder %s3517_s23, 1 }
   0x8   : > { %s3904_s27 = scalar_select %p143_p1, %s3829_s20, %s145_s25  }
   0x9   : > { %p3906_p5 = por %p156_p2, %p155_p0  ;;  %p3910_p6 = por %p162_p4, %p161_p3 }
   0xa   : > { %p3520_p7 = scmp.ge.s32.totalorder %s3833_s21, 1  ;;  %p214_p8 = scmp.lt.s32.totalorder %s3833_s21, 3 }
   0xc   : > { %p215_p9 = pnand %p3520_p7, %p214_p8 }
   0xe   : > { %218 = sbr.rel (%p215_p9) target bundleno = 1841 (0x731), region = 40 }
  0x13   : > { %v304_v0 = vld [vmem:[%s5876_s0 + $0xf8] sm:$0xff]  ;;  %v302_v2 = vld [vmem:[%s5876_s0 + $0xe8] sm:$0xff]  ;;  %v303_v8 = vld [vmem:[%s5876_s0 + $0xf0] sm:$0xff]  ;;  %s253_s25 = smul.u32 48, %s3889_s22  ;;  %vm513_vm0 = vcmask 523264   ;;  %s250_s15 = sand.u32 1, %s3825_s19  }
  0x14   : > { %v352_v1 = vld [vmem:[%s5877_s1 + $0xf8] sm:$0xff]  ;;  %v350_v4 = vld [vmem:[%s5877_s1 + $0xe8] sm:$0xff]  ;;  %v351_v9 = vld [vmem:[%s5877_s1 + $0xf0] sm:$0xff]  ;;  %s3629_s16 = smul.u32 768, %s250_s15 }
  0x15   : > { %v400_v3 = vadd.f32 %v352_v1, %v304_v0  ;;  %v300_v5 = vld [vmem:[%s5876_s0 + $0xd8] sm:$0xff]  ;;  %v398_v7 = vadd.f32 %v350_v4, %v302_v2  ;;  %v298_v10 = vld [vmem:[%s5876_s0 + $0xc8] sm:$0xff]  ;;  %v399_v12 = vadd.f32 %v351_v9, %v303_v8  ;;  %v301_v14 = vld [vmem:[%s5876_s0 + $0xe0] sm:$0xff]  ;;  %p4054_p10 = scmp.lt.s32.totalorder %s253_s25, 95 }
  0x16   : > { %v348_v6 = vld [vmem:[%s5877_s1 + $0xd8] sm:$0xff]  ;;  %v346_v13 = vld [vmem:[%s5877_s1 + $0xc8] sm:$0xff]  ;;  %v349_v15 = vld [vmem:[%s5877_s1 + $0xe0] sm:$0xff]  ;;  %s4666_s23 = scalar_lea.vmem [#allocation2], %s3629_s16 }
  0x17   : > { %980 = vmatpush.msra.mxu2 %v400_v3  ;;  %v396_v11 = vadd.f32 %v348_v6, %v300_v5  ;;  %v397_v16 = vadd.f32 %v349_v15, %v301_v14  ;;  %v296_v17 = vld [vmem:[%s5876_s0 + $0xb8] sm:$0xff]  ;;  %v299_v19 = vld [vmem:[%s5876_s0 + $0xd0] sm:$0xff]  ;;  %658 = vmatpush.msra.mxu0 %v399_v12  ;;  %v394_v20 = vadd.f32 %v346_v13, %v298_v10  ;;  %v294_v22 = vld [vmem:[%s5876_s0 + $0xa8] sm:$0xff]  ;;  %s6093_s25 = smov (!%p4054_p10, %s253_s25), 95 }
  0x18   : > { %v344_v18 = vld [vmem:[%s5877_s1 + $0xb8] sm:$0xff]  ;;  %v347_v21 = vld [vmem:[%s5877_s1 + $0xd0] sm:$0xff]  ;;  %v342_v24 = vld [vmem:[%s5877_s1 + $0xa8] sm:$0xff]  ;;  %s3625_s7 = sshll.u32 %s6093_s25, 4  ;;  %s3523_s8 = sshll.u32 %s6093_s25, 3 }
  0x19   : > { %981 = vmatpush.msra.mxu2 %v398_v7  ;;  %v395_v23 = vadd.f32 %v347_v21, %v299_v19  ;;  %v297_v25 = vld [vmem:[%s5876_s0 + $0xc0] sm:$0xff]  ;;  %659 = vmatpush.msra.mxu0 %v397_v16  ;;  %v392_v27 = vadd.f32 %v344_v18, %v296_v17  ;;  %v295_v29 = vld [vmem:[%s5876_s0 + $0xb0] sm:$0xff]  ;;  %v292_v31 = vld [vmem:[%s5876_s0 + $0x98] sm:$0xff]  ;;  %v390_v34 = vadd.f32 %v342_v24, %v294_v22  ;;  %s4167_s14 = scalar_lea.vmem %s5878_s2, %s3625_s7  ;;  %s4519_s11 = scalar_lea.vmem %s5879_s3, %s3523_s8 }
  0x1a   : > { %v345_v26 = vld [vmem:[%s5877_s1 + $0xc0] sm:$0xff]  ;;  %v343_v30 = vld [vmem:[%s5877_s1 + $0xb0] sm:$0xff]  ;;  %v340_v32 = vld [vmem:[%s5877_s1 + $0x98] sm:$0xff]  ;;  %s4525_s13 = scalar_lea.vmem %s5880_s4, %s3523_s8  ;;  %s3428_s7 = sshll.u32 %s4666_s23, 4  ;;  %s3429_s7 = int_to_ptr.vmem [resolvable:$true] %s3428_s7 }
  0x1b   : > { %982 = vmatpush.msra.mxu2 %v396_v11  ;;  %v393_v28 = vadd.f32 %v345_v26, %v297_v25  ;;  %v293_v33 = vld [vmem:[%s5876_s0 + $0xa0] sm:$0xff]  ;;  %660 = vmatpush.msra.mxu0 %v395_v23  ;;  %v391_v35 = vadd.f32 %v343_v30, %v295_v29  ;;  %v290_v36 = vld [vmem:[%s5876_s0 + $0x88] sm:$0xff]  ;;  %v320_v39 = vld [vmem:[%s5876_s0 + $0x178] sm:$0xff]  ;;  %v388_v42 = vadd.f32 %v340_v32, %v292_v31  ;;  %s3791_s25 = scalar_lea.hbm %s5881_s5, 1536 }
  0x1c   : > { %v338_v37 = vld [vmem:[%s5877_s1 + $0x88] sm:$0xff]  ;;  %v341_v38 = vld [vmem:[%s5877_s1 + $0xa0] sm:$0xff]  ;;  %v368_v40 = vld [vmem:[%s5877_s1 + $0x178] sm:$0xff] }
  0x1d   : > { %983 = vmatpush.msra.mxu2 %v394_v20  ;;  %v291_v41 = vld [vmem:[%s5876_s0 + $0x90] sm:$0xff]  ;;  %661 = vmatpush.msra.mxu0 %v393_v28  ;;  %v389_v43 = vadd.f32 %v341_v38, %v293_v33  ;;  %v288_v44 = vld [vmem:[%s5876_s0 + $0x78] sm:$0xff]  ;;  %v416_v46 = vadd.f32 %v368_v40, %v320_v39  ;;  %v318_v48 = vld [vmem:[%s5876_s0 + $0x168] sm:$0xff]  ;;  %v386_v51 = vadd.f32 %v338_v37, %v290_v36 }
  0x1e   : > { %v336_v45 = vld [vmem:[%s5877_s1 + $0x78] sm:$0xff]  ;;  %v339_v47 = vld [vmem:[%s5877_s1 + $0x90] sm:$0xff]  ;;  %v366_v49 = vld [vmem:[%s5877_s1 + $0x168] sm:$0xff] }
  0x1f   : > { %984 = vmatpush.msra.mxu2 %v392_v27  ;;  %v289_v50 = vld [vmem:[%s5876_s0 + $0x80] sm:$0xff]  ;;  %662 = vmatpush.msra.mxu0 %v391_v35  ;;  %v387_v52 = vadd.f32 %v339_v47, %v291_v41  ;;  %v286_v53 = vld [vmem:[%s5876_s0 + $0x68] sm:$0xff]  ;;  %v414_v55 = vadd.f32 %v366_v49, %v318_v48  ;;  %v284_v57 = vld [vmem:[%s5876_s0 + $0x58] sm:$0xff]  ;;  %v384_v62 = vadd.f32 %v336_v45, %v288_v44 }
  0x20   : > { %v334_v54 = vld [vmem:[%s5877_s1 + $0x68] sm:$0xff]  ;;  %v337_v56 = vld [vmem:[%s5877_s1 + $0x80] sm:$0xff]  ;;  %1149 = vmatpush.msra.mxu3 %v416_v46  ;;  %v332_v58 = vld [vmem:[%s5877_s1 + $0x58] sm:$0xff] }
  0x21   : > { %985 = vmatpush.msra.mxu2 %v390_v34  ;;  %v316_v59 = vld [vmem:[%s5876_s0 + $0x158] sm:$0xff]  ;;  %v287_v61 = vld [vmem:[%s5876_s0 + $0x70] sm:$0xff]  ;;  %663 = vmatpush.msra.mxu0 %v389_v43  ;;  %v385_v63 = vadd.f32 %v337_v56, %v289_v50  ;;  %v282_v5 = vld [vmem:[%s5876_s0 + $0x48] sm:$0xff]  ;;  %v382_v8 = vadd.f32 %v334_v54, %v286_v53  ;;  %v380_v17 = vadd.f32 %v332_v58, %v284_v57 }
  0x22   : > { %v364_v60 = vld [vmem:[%s5877_s1 + $0x158] sm:$0xff]  ;;  %v335_v1 = vld [vmem:[%s5877_s1 + $0x70] sm:$0xff]  ;;  %1150 = vmatpush.msra.mxu3 %v414_v55  ;;  %v330_v6 = vld [vmem:[%s5877_s1 + $0x48] sm:$0xff] }
  0x23   : > { %986 = vmatpush.msra.mxu2 %v388_v42  ;;  %v412_v0 = vadd.f32 %v364_v60, %v316_v59  ;;  %v319_v2 = vld [vmem:[%s5876_s0 + $0x170] sm:$0xff]  ;;  %v314_v7 = vld [vmem:[%s5876_s0 + $0x148] sm:$0xff]  ;;  %664 = vmatpush.msra.mxu0 %v387_v52  ;;  %v383_v9 = vadd.f32 %v335_v1, %v287_v61  ;;  %v285_v11 = vld [vmem:[%s5876_s0 + $0x60] sm:$0xff]  ;;  %v378_v27 = vadd.f32 %v330_v6, %v282_v5 }
  0x24   : > { %v367_v3 = vld [vmem:[%s5877_s1 + $0x170] sm:$0xff]  ;;  %v362_v10 = vld [vmem:[%s5877_s1 + $0x148] sm:$0xff]  ;;  %v333_v12 = vld [vmem:[%s5877_s1 + $0x60] sm:$0xff] }
  0x25   : > { %v415_v4 = vadd.f32 %v367_v3, %v319_v2  ;;  %987 = vmatpush.msra.mxu2 %v386_v51  ;;  %1151 = vmatpush.msra.mxu3 %v412_v0  ;;  %v410_v13 = vadd.f32 %v362_v10, %v314_v7  ;;  %v317_v14 = vld [vmem:[%s5876_s0 + $0x160] sm:$0xff]  ;;  %v280_v16 = vld [vmem:[%s5876_s0 + $0x38] sm:$0xff]  ;;  %v381_v18 = vadd.f32 %v333_v12, %v285_v11  ;;  %v283_v24 = vld [vmem:[%s5876_s0 + $0x50] sm:$0xff] }
  0x26   : > { %v365_v15 = vld [vmem:[%s5877_s1 + $0x160] sm:$0xff]  ;;  %665 = vmatpush.msra.mxu0 %v385_v63  ;;  %v328_v20 = vld [vmem:[%s5877_s1 + $0x38] sm:$0xff]  ;;  %v331_v25 = vld [vmem:[%s5877_s1 + $0x50] sm:$0xff] }
  0x27   : > { %827 = vmatpush.msra.mxu1 %v415_v4  ;;  %988 = vmatpush.msra.mxu2 %v384_v62  ;;  %v413_v19 = vadd.f32 %v365_v15, %v317_v14  ;;  %v312_v21 = vld [vmem:[%s5876_s0 + $0x138] sm:$0xff]  ;;  %v315_v26 = vld [vmem:[%s5876_s0 + $0x150] sm:$0xff]  ;;  %v379_v28 = vadd.f32 %v331_v25, %v283_v24  ;;  %v278_v30 = vld [vmem:[%s5876_s0 + $0x28] sm:$0xff]  ;;  %v376_v36 = vadd.f32 %v328_v20, %v280_v16 }
  0x28   : > { %v360_v22 = vld [vmem:[%s5877_s1 + $0x138] sm:$0xff]  ;;  %1152 = vmatpush.msra.mxu3 %v410_v13  ;;  %666 = vmatpush.msra.mxu0 %v383_v9  ;;  %v363_v29 = vld [vmem:[%s5877_s1 + $0x150] sm:$0xff]  ;;  %v326_v31 = vld [vmem:[%s5877_s1 + $0x28] sm:$0xff] }
  0x29   : > { %v408_v23 = vadd.f32 %v360_v22, %v312_v21  ;;  %989 = vmatpush.msra.mxu2 %v382_v8  ;;  %828 = vmatpush.msra.mxu1 %v413_v19  ;;  %v411_v32 = vadd.f32 %v363_v29, %v315_v26  ;;  %v310_v33 = vld [vmem:[%s5876_s0 + $0x128] sm:$0xff]  ;;  %v281_v35 = vld [vmem:[%s5876_s0 + $0x40] sm:$0xff]  ;;  %v276_v43 = vld [vmem:[%s5876_s0 + $0x18] sm:$0xff]  ;;  %v374_v46 = vadd.f32 %v326_v31, %v278_v30 }
  0x2a   : > { %v358_v34 = vld [vmem:[%s5877_s1 + $0x128] sm:$0xff]  ;;  %667 = vmatpush.msra.mxu0 %v381_v18  ;;  %v329_v38 = vld [vmem:[%s5877_s1 + $0x40] sm:$0xff]  ;;  %v324_v44 = vld [vmem:[%s5877_s1 + $0x18] sm:$0xff] }
  0x2b   : > { %1153 = vmatpush.msra.mxu3 %v408_v23  ;;  %990 = vmatpush.msra.mxu2 %v380_v17  ;;  %v406_v37 = vadd.f32 %v358_v34, %v310_v33  ;;  %v313_v39 = vld [vmem:[%s5876_s0 + $0x140] sm:$0xff]  ;;  %v377_v41 = vadd.f32 %v329_v38, %v281_v35  ;;  %v308_v45 = vld [vmem:[%s5876_s0 + $0x118] sm:$0xff]  ;;  %v279_v48 = vld [vmem:[%s5876_s0 + $0x30] sm:$0xff]  ;;  %v372_v55 = vadd.f32 %v324_v44, %v276_v43 }
  0x2c   : > { %v361_v40 = vld [vmem:[%s5877_s1 + $0x140] sm:$0xff]  ;;  %829 = vmatpush.msra.mxu1 %v411_v32  ;;  %668 = vmatpush.msra.mxu0 %v379_v28  ;;  %v356_v47 = vld [vmem:[%s5877_s1 + $0x118] sm:$0xff]  ;;  %v327_v49 = vld [vmem:[%s5877_s1 + $0x30] sm:$0xff] }
  0x2d   : > { %v409_v42 = vadd.f32 %v361_v40, %v313_v39  ;;  %991 = vmatpush.msra.mxu2 %v378_v27  ;;  %1154 = vmatpush.msra.mxu3 %v406_v37  ;;  %v404_v50 = vadd.f32 %v356_v47, %v308_v45  ;;  %v375_v51 = vadd.f32 %v327_v49, %v279_v48  ;;  %v311_v52 = vld [vmem:[%s5876_s0 + $0x130] sm:$0xff]  ;;  %v274_v54 = vld [vmem:[%s5876_s0 + $0x8] sm:$0xff]  ;;  %v277_v62 = vld [vmem:[%s5876_s0 + $0x20] sm:$0xff] }
  0x2e   : > { %v359_v53 = vld [vmem:[%s5877_s1 + $0x130] sm:$0xff]  ;;  %669 = vmatpush.msra.mxu0 %v377_v41  ;;  %v322_v57 = vld [vmem:[%s5877_s1 + $0x8] sm:$0xff]  ;;  %v417_v0 = vld [vmem:[%s4167_s14] sm:$0xff] }
  0x2f   : > { %830 = vmatpush.msra.mxu1 %v409_v42  ;;  %992 = vmatpush.msra.mxu2 %v376_v36  ;;  %v407_v56 = vadd.f32 %v359_v53, %v311_v52  ;;  %v306_v58 = vld [vmem:[%s5876_s0 + $0x108] sm:$0xff]  ;;  %v370_v63 = vadd.f32 %v322_v57, %v274_v54  ;;  %v325_v1 = vld [vmem:[%s5877_s1 + $0x20] sm:$0xff]  ;;  %v275_v6 = vld [vmem:[%s5876_s0 + $0x10] sm:$0xff] }
  0x30   : > { %v354_v59 = vld [vmem:[%s5877_s1 + $0x108] sm:$0xff]  ;;  %1155 = vmatpush.msra.mxu3 %v404_v50  ;;  %670 = vmatpush.msra.mxu0 %v375_v51  ;;  %v309_v2 = vld [vmem:[%s5876_s0 + $0x120] sm:$0xff]  ;;  %v373_v4 = vadd.f32 %v325_v1, %v277_v62  ;;  %v323_v7 = vld [vmem:[%s5877_s1 + $0x10] sm:$0xff] }
  0x31   : > { %v402_v60 = vadd.f32 %v354_v59, %v306_v58  ;;  %v418_v61 = vld [vmem:[%s4167_s14 + $0x8] sm:$0xff]  ;;  %993 = vmatpush.msra.mxu2 %v374_v46  ;;  %v357_v3 = vld [vmem:[%s5877_s1 + $0x120] sm:$0xff]  ;;  %831 = vmatpush.msra.mxu1 %v407_v56  ;;  %v307_v8 = vld [vmem:[%s5876_s0 + $0x110] sm:$0xff]  ;;  %v371_v9 = vadd.f32 %v323_v7, %v275_v6 }
  0x32   : > { %v405_v5 = vadd.f32 %v357_v3, %v309_v2  ;;  %v355_v10 = vld [vmem:[%s5877_s1 + $0x110] sm:$0xff]  ;;  %v273_v11 = vld [vmem:[%s5876_s0] sm:$0xff]  ;;  %671 = vmatpush.msra.mxu0 %v373_v4  ;;  %v420_v18 = vld [vmem:[%s4167_s14 + $0x18] sm:$0xff] }
  0x33   : > { %1156 = vmatpush.msra.mxu3 %v402_v60  ;;  %994 = vmatpush.msra.mxu2 %v372_v55  ;;  %v321_v12 = vld [vmem:[%s5877_s1] sm:$0xff]  ;;  %v403_v13 = vadd.f32 %v355_v10, %v307_v8  ;;  %v419_v19 = vld [vmem:[%s4167_s14 + $0x10] sm:$0xff]  ;;  %v422_v20 = vld [vmem:[%s4167_s14 + $0x28] sm:$0xff] }
  0x34   : > { %3573 = vmatmul.msk.f32.vlgmr.msra.gmra.mxu3 %vm513_vm0, %v418_v61  ;;  %832 = vmatpush.msra.mxu1 %v405_v5  ;;  %v369_v14 = vadd.f32 %v321_v12, %v273_v11  ;;  %v305_v15 = vld [vmem:[%s5876_s0 + $0x100] sm:$0xff]  ;;  %v424_v22 = vld [vmem:[%s4167_s14 + $0x38] sm:$0xff]  ;;  %v423_v23 = vld [vmem:[%s4167_s14 + $0x30] sm:$0xff] }
  0x35   : > { %v353_v16 = vld [vmem:[%s5877_s1 + $0x100] sm:$0xff]  ;;  %995 = vmatpush.msra.mxu2 %v370_v63  ;;  %672 = vmatpush.msra.mxu0 %v371_v9  ;;  %v426_v24 = vld [vmem:[%s4167_s14 + $0x48] sm:$0xff]  ;;  %v428_v26 = vld [vmem:[%s4167_s14 + $0x58] sm:$0xff] }
  0x36   : > { %v401_v17 = vadd.f32 %v353_v16, %v305_v15  ;;  %996 = vmatmul.f32.vlgmr.msra.gmra.mxu2 %v417_v0  ;;  %833 = vmatpush.msra.mxu1 %v403_v13  ;;  %v421_v21 = vld [vmem:[%s4167_s14 + $0x20] sm:$0xff]  ;;  %v427_v27 = vld [vmem:[%s4167_s14 + $0x50] sm:$0xff]  ;;  %v430_v28 = vld [vmem:[%s4167_s14 + $0x68] sm:$0xff] }
  0x37   : > { %673 = vmatpush.msra.mxu0 %v369_v14  ;;  %v425_v25 = vld [vmem:[%s4167_s14 + $0x40] sm:$0xff]  ;;  %v432_v30 = vld [vmem:[%s4167_s14 + $0x78] sm:$0xff]  ;;  %v431_v31 = vld [vmem:[%s4167_s14 + $0x70] sm:$0xff] }
  0x38   : > { %834 = vmatpush.msra.mxu1 %v401_v17  ;;  %674 = vmatmul.f32.vlgmr.msra.gmra.mxu0 %v417_v0  ;;  %v429_v29 = vld [vmem:[%s4167_s14 + $0x60] sm:$0xff]  ;;  %v434_v32 = vld [vmem:[%s4167_s14 + $0x88] sm:$0xff]  ;;  %v436_v34 = vld [vmem:[%s4167_s14 + $0x98] sm:$0xff] }
  0x39   : > { %3525 = vmatmul.msk.f32.vlgmr.msra.gmra.mxu1 %vm513_vm0, %v418_v61  ;;  %v433_v33 = vld [vmem:[%s4167_s14 + $0x80] sm:$0xff]  ;;  %v435_v35 = vld [vmem:[%s4167_s14 + $0x90] sm:$0xff]  ;;  %v438_v36 = vld [vmem:[%s4167_s14 + $0xa8] sm:$0xff] }
  0x3a   : > { %v437_v37 = vld [vmem:[%s4167_s14 + $0xa0] sm:$0xff]  ;;  %v440_v38 = vld [vmem:[%s4167_s14 + $0xb8] sm:$0xff]  ;;  %v439_v39 = vld [vmem:[%s4167_s14 + $0xb0] sm:$0xff] }
  0x3b   : > { %v442_v40 = vld [vmem:[%s4167_s14 + $0xc8] sm:$0xff]  ;;  %v441_v41 = vld [vmem:[%s4167_s14 + $0xc0] sm:$0xff]  ;;  %v444_v42 = vld [vmem:[%s4167_s14 + $0xd8] sm:$0xff] }
  0x3c   : > { %3574 = vmatmul.msk.f32.gmra.mxu3 %vm513_vm0, %v420_v18  ;;  %v443_v43 = vld [vmem:[%s4167_s14 + $0xd0] sm:$0xff]  ;;  %v446_v44 = vld [vmem:[%s4167_s14 + $0xe8] sm:$0xff]  ;;  %v445_v45 = vld [vmem:[%s4167_s14 + $0xe0] sm:$0xff] }
  0x3d   : > { %v448_v46 = vld [vmem:[%s4167_s14 + $0xf8] sm:$0xff]  ;;  %v447_v47 = vld [vmem:[%s4167_s14 + $0xf0] sm:$0xff]  ;;  %v450_v48 = vld [vmem:[%s4167_s14 + $0x108] sm:$0xff] }
  0x3e   : > { %999 = vmatmul.f32.gmra.mxu2 %v419_v19  ;;  %v449_v49 = vld [vmem:[%s4167_s14 + $0x100] sm:$0xff]  ;;  %v452_v54 = vld [vmem:[%s4167_s14 + $0x118] sm:$0xff]  ;;  %v451_v57 = vld [vmem:[%s4167_s14 + $0x110] sm:$0xff] }
  0x3f   : > { %v454_v63 = vld [vmem:[%s4167_s14 + $0x128] sm:$0xff]  ;;  %v453_v5 = vld [vmem:[%s4167_s14 + $0x120] sm:$0xff]  ;;  %v456_v13 = vld [vmem:[%s4167_s14 + $0x138] sm:$0xff] }
  0x40   : > { %677 = vmatmul.f32.gmra.mxu0 %v419_v19  ;;  %v455_v17 = vld [vmem:[%s4167_s14 + $0x130] sm:$0xff] }
  0x41   : > { %3526 = vmatmul.msk.f32.gmra.mxu1 %vm513_vm0, %v420_v18 }
  0x44   : > { %3575 = vmatmul.msk.f32.gmra.mxu3 %vm513_vm0, %v422_v20 }
  0x46   : > { %1002 = vmatmul.f32.gmra.mxu2 %v421_v21 }
  0x48   : > { %680 = vmatmul.f32.gmra.mxu0 %v421_v21 }
  0x49   : > { %3527 = vmatmul.msk.f32.gmra.mxu1 %vm513_vm0, %v422_v20 }
  0x4c   : > { %3576 = vmatmul.msk.f32.gmra.mxu3 %vm513_vm0, %v424_v22 }
  0x4e   : > { %1005 = vmatmul.f32.gmra.mxu2 %v423_v23 }
  0x50   : > { %683 = vmatmul.f32.gmra.mxu0 %v423_v23 }
  0x51   : > { %3528 = vmatmul.msk.f32.gmra.mxu1 %vm513_vm0, %v424_v22 }
  0x54   : > { %3577 = vmatmul.msk.f32.gmra.mxu3 %vm513_vm0, %v426_v24 }
  0x56   : > { %1008 = vmatmul.f32.gmra.mxu2 %v425_v25 }
  0x58   : > { %686 = vmatmul.f32.gmra.mxu0 %v425_v25 }
  0x59   : > { %3529 = vmatmul.msk.f32.gmra.mxu1 %vm513_vm0, %v426_v24 }
  0x5c   : > { %3578 = vmatmul.msk.f32.gmra.mxu3 %vm513_vm0, %v428_v26 }
  0x5e   : > { %1011 = vmatmul.f32.gmra.mxu2 %v427_v27 }
  0x60   : > { %689 = vmatmul.f32.gmra.mxu0 %v427_v27 }
  0x61   : > { %3530 = vmatmul.msk.f32.gmra.mxu1 %vm513_vm0, %v428_v26  ;;  %v458_v26 = vld [vmem:[%s4167_s14 + $0x148] sm:$0xff] }
  0x64   : > { %3579 = vmatmul.msk.f32.gmra.mxu3 %vm513_vm0, %v430_v28 }
  0x66   : > { %1014 = vmatmul.f32.gmra.mxu2 %v429_v29 }
  0x68   : > { %692 = vmatmul.f32.gmra.mxu0 %v429_v29 }
  0x69   : > { %3531 = vmatmul.msk.f32.gmra.mxu1 %vm513_vm0, %v430_v28 }
  0x6c   : > { %3580 = vmatmul.msk.f32.gmra.mxu3 %vm513_vm0, %v432_v30 }
  0x6e   : > { %1017 = vmatmul.f32.gmra.mxu2 %v431_v31 }
  0x70   : > { %695 = vmatmul.f32.gmra.mxu0 %v431_v31 }
  0x71   : > { %3532 = vmatmul.msk.f32.gmra.mxu1 %vm513_vm0, %v432_v30  ;;  %v457_v30 = vld [vmem:[%s4167_s14 + $0x140] sm:$0xff] }
  0x74   : > { %3581 = vmatmul.msk.f32.gmra.mxu3 %vm513_vm0, %v434_v32 }
  0x76   : > { %1020 = vmatmul.f32.gmra.mxu2 %v433_v33 }
  0x78   : > { %698 = vmatmul.f32.gmra.mxu0 %v433_v33 }
  0x79   : > { %3533 = vmatmul.msk.f32.gmra.mxu1 %vm513_vm0, %v434_v32 }
  0x7c   : > { %3582 = vmatmul.msk.f32.gmra.mxu3 %vm513_vm0, %v436_v34 }
  0x7e   : > { %1023 = vmatmul.f32.gmra.mxu2 %v435_v35 }
  0x80   : > { %701 = vmatmul.f32.gmra.mxu0 %v435_v35 }
  0x81   : > { %3534 = vmatmul.msk.f32.gmra.mxu1 %vm513_vm0, %v436_v34 }
  0x84   : > { %3583 = vmatmul.msk.f32.gmra.mxu3 %vm513_vm0, %v438_v36 }
  0x86   : > { %1026 = vmatmul.f32.gmra.mxu2 %v437_v37 }
  0x88   : > { %704 = vmatmul.f32.gmra.mxu0 %v437_v37 }
  0x89   : > { %3535 = vmatmul.msk.f32.gmra.mxu1 %vm513_vm0, %v438_v36 }
  0x8c   : > { %3584 = vmatmul.msk.f32.gmra.mxu3 %vm513_vm0, %v440_v38 }
  0x8e   : > { %1029 = vmatmul.f32.gmra.mxu2 %v439_v39 }
  0x90   : > { %707 = vmatmul.f32.gmra.mxu0 %v439_v39 }
  0x91   : > { %3536 = vmatmul.msk.f32.gmra.mxu1 %vm513_vm0, %v440_v38 }
  0x94   : > { %3585 = vmatmul.msk.f32.gmra.mxu3 %vm513_vm0, %v442_v40 }
  0x96   : > { %1032 = vmatmul.f32.gmra.mxu2 %v441_v41 }
  0x98   : > { %710 = vmatmul.f32.gmra.mxu0 %v441_v41 }
  0x99   : > { %3537 = vmatmul.msk.f32.gmra.mxu1 %vm513_vm0, %v442_v40 }
  0x9c   : > { %3586 = vmatmul.msk.f32.gmra.mxu3 %vm513_vm0, %v444_v42 }
  0x9e   : > { %1035 = vmatmul.f32.gmra.mxu2 %v443_v43 }
  0xa0   : > { %713 = vmatmul.f32.gmra.mxu0 %v443_v43 }
  0xa1   : > { %3538 = vmatmul.msk.f32.gmra.mxu1 %vm513_vm0, %v444_v42 }
  0xa4   : > { %3587 = vmatmul.msk.f32.gmra.mxu3 %vm513_vm0, %v446_v44 }
  0xa6   : > { %1038 = vmatmul.f32.gmra.mxu2 %v445_v45 }
  0xa8   : > { %716 = vmatmul.f32.gmra.mxu0 %v445_v45 }
  0xa9   : > { %3539 = vmatmul.msk.f32.gmra.mxu1 %vm513_vm0, %v446_v44 }
  0xac   : > { %3588 = vmatmul.msk.f32.gmra.mxu3 %vm513_vm0, %v448_v46 }
  0xae   : > { %1041 = vmatmul.f32.gmra.mxu2 %v447_v47 }
  0xb0   : > { %719 = vmatmul.f32.gmra.mxu0 %v447_v47 }
  0xb1   : > { %3540 = vmatmul.msk.f32.gmra.mxu1 %vm513_vm0, %v448_v46 }
  0xb4   : > { %3589 = vmatmul.msk.f32.gmra.mxu3 %vm513_vm0, %v450_v48 }
  0xb5   : > { %v675_v50 = vpop.f32.mrf.mxu0 }
  0xb6   : > { %1044 = vmatmul.f32.gmra.mxu2 %v449_v49  ;;  %v836_v52 = vpop.f32.mrf.mxu1 }
  0xb7   : > { %v1158_v51 = vpop.f32.mrf.mxu3  ;;  %v4290_v53 = vadd.f32 %v836_v52, %v675_v50 }
  0xb8   : > { %722 = vmatmul.f32.gmra.mxu0 %v449_v49 }
  0xb9   : > { %v997_v55 = vpop.f32.mrf.mxu2  ;;  %3541 = vmatmul.msk.f32.gmra.mxu1 %vm513_vm0, %v450_v48  ;;  %v1446_v0 = vmul.f32 %v4290_v53, %v4290_v53 }
  0xba   : > { %v4293_v56 = vadd.f32 %v1158_v51, %v997_v55 }
  0xbc   : > { %3590 = vmatmul.msk.f32.gmra.mxu3 %vm513_vm0, %v452_v54  ;;  %v1302_v58 = vadd.f32 %v4293_v56, %v4290_v53  ;;  %v1447_v1 = vmul.f32 %v4293_v56, %v4293_v56 }
  0xbd   : > { %v678_v59 = vpop.f32.mrf.mxu0 }
  0xbe   : > { %1047 = vmatmul.f32.gmra.mxu2 %v451_v57  ;;  %1303 = vadd.xlane.f32.xlu0 %v1302_v58  ;;  %v839_v61 = vpop.f32.mrf.mxu1  ;;  %v1542_v6 = vadd.f32 %v1447_v1, %v1446_v0 }
  0xbf   : > { %v1161_v60 = vpop.f32.mrf.mxu3  ;;  %v4300_v62 = vadd.f32 %v839_v61, %v678_v59 }
  0xc0   : > { %725 = vmatmul.f32.gmra.mxu0 %v451_v57 }
  0xc1   : > { %v1000_v2 = vpop.f32.mrf.mxu2  ;;  %3542 = vmatmul.msk.f32.gmra.mxu1 %vm513_vm0, %v452_v54  ;;  %v1448_v4 = vmul.f32 %v4300_v62, %v4300_v62 }
  0xc2   : > { %v4307_v3 = vadd.f32 %v1161_v60, %v1000_v2 }
  0xc4   : > { %3591 = vmatmul.msk.f32.gmra.mxu3 %vm513_vm0, %v454_v63  ;;  %v1449_v7 = vmul.f32 %v4307_v3, %v4307_v3  ;;  %v1305_v18 = vadd.f32 %v4307_v3, %v4300_v62 }
  0xc5   : > { %v681_v9 = vpop.f32.mrf.mxu0 }
  0xc6   : > { %1050 = vmatmul.f32.gmra.mxu2 %v453_v5  ;;  %1543 = vadd.xlane.f32.xlu0 %v1542_v6  ;;  %v1545_v8 = vadd.f32 %v1449_v7, %v1448_v4  ;;  %v842_v11 = vpop.f32.mrf.mxu1 }
  0xc7   : > { %v1164_v10 = vpop.f32.mrf.mxu3  ;;  %v4316_v12 = vadd.f32 %v842_v11, %v681_v9 }
  0xc8   : > { %1546 = vadd.xlane.f32.xlu1 %v1545_v8  ;;  %728 = vmatmul.f32.gmra.mxu0 %v453_v5 }
  0xc9   : > { %v1003_v14 = vpop.f32.mrf.mxu2  ;;  %3543 = vmatmul.msk.f32.gmra.mxu1 %vm513_vm0, %v454_v63  ;;  %v1450_v16 = vmul.f32 %v4316_v12, %v4316_v12 }
  0xca   : > { %v4319_v15 = vadd.f32 %v1164_v10, %v1003_v14 }
  0xcc   : > { %3592 = vmatmul.msk.f32.gmra.mxu3 %vm513_vm0, %v456_v13  ;;  %v1451_v19 = vmul.f32 %v4319_v15, %v4319_v15  ;;  %v1308_v21 = vadd.f32 %v4319_v15, %v4316_v12 }
  0xcd   : > { %v684_v22 = vpop.f32.mrf.mxu0 }
  0xce   : > { %1053 = vmatmul.f32.gmra.mxu2 %v455_v17  ;;  %1306 = vadd.xlane.f32.xlu0 %v1305_v18  ;;  %v1548_v20 = vadd.f32 %v1451_v19, %v1450_v16  ;;  %v845_v24 = vpop.f32.mrf.mxu1 }
  0xcf   : > { %v1167_v23 = vpop.f32.mrf.mxu3  ;;  %v4332_v25 = vadd.f32 %v845_v24, %v684_v22 }
  0xd0   : > { %1549 = vadd.xlane.f32.xlu2 %v1548_v20  ;;  %1309 = vadd.xlane.f32.xlu1 %v1308_v21 }
  0xd1   : > { %v1006_v27 = vpop.f32.mrf.mxu2  ;;  %731 = vmatmul.f32.gmra.mxu0 %v455_v17  ;;  %3544 = vmatmul.msk.f32.gmra.mxu1 %vm513_vm0, %v456_v13  ;;  %v1452_v29 = vmul.f32 %v4332_v25, %v4332_v25 }
  0xd2   : > { %v4335_v28 = vadd.f32 %v1167_v23, %v1006_v27 }
  0xd4   : > { %3593 = vmatmul.msk.f32.gmra.mxu3 %vm513_vm0, %v458_v26  ;;  %v1453_v31 = vmul.f32 %v4335_v28, %v4335_v28  ;;  %v1311_v33 = vadd.f32 %v4335_v28, %v4332_v25 }
  0xd5   : > { %v687_v34 = vpop.f32.mrf.mxu0 }
  0xd6   : > { %1056 = vmatmul.f32.gmra.mxu2 %v457_v30  ;;  %v1551_v32 = vadd.f32 %v1453_v31, %v1452_v29  ;;  %v848_v36 = vpop.f32.mrf.mxu1 }
  0xd7   : > { %v1170_v35 = vpop.f32.mrf.mxu3  ;;  %v4346_v37 = vadd.f32 %v848_v36, %v687_v34 }
  0xd8   : > { %1552 = vadd.xlane.f32.xlu0 %v1551_v32  ;;  %1312 = vadd.xlane.f32.xlu1 %v1311_v33 }
  0xd9   : > { %v1009_v38 = vpop.f32.mrf.mxu2  ;;  %734 = vmatmul.f32.gmra.mxu0 %v457_v30  ;;  %3545 = vmatmul.msk.f32.gmra.mxu1 %vm513_vm0, %v458_v26  ;;  %v1454_v40 = vmul.f32 %v4346_v37, %v4346_v37 }
  0xda   : > { %v4348_v39 = vadd.f32 %v1170_v35, %v1009_v38 }
  0xdc   : > { %v1314_v41 = vadd.f32 %v4348_v39, %v4346_v37  ;;  %v1455_v42 = vmul.f32 %v4348_v39, %v4348_v39 }
  0xdd   : > { %v690_v44 = vpop.f32.mrf.mxu0 }
  0xde   : > { %1315 = vadd.xlane.f32.xlu2 %v1314_v41  ;;  %v1554_v43 = vadd.f32 %v1455_v42, %v1454_v40  ;;  %v851_v46 = vpop.f32.mrf.mxu1 }
  0xdf   : > { %v1173_v45 = vpop.f32.mrf.mxu3  ;;  %v4357_v47 = vadd.f32 %v851_v46, %v690_v44 }
  0xe0   : > { %1555 = vadd.xlane.f32.xlu1 %v1554_v43 }
  0xe1   : > { %v1012_v48 = vpop.f32.mrf.mxu2  ;;  %v1456_v57 = vmul.f32 %v4357_v47, %v4357_v47 }
  0xe2   : > { %v4359_v49 = vadd.f32 %v1173_v45, %v1012_v48 }
  0xe4   : > { %v1317_v50 = vadd.f32 %v4359_v49, %v4357_v47  ;;  %v1457_v58 = vmul.f32 %v4359_v49, %v4359_v49 }
  0xe5   : > { %v693_v51 = vpop.f32.mrf.mxu0 }
  0xe6   : > { %1318 = vadd.xlane.f32.xlu2 %v1317_v50  ;;  %v854_v54 = vpop.f32.mrf.mxu1  ;;  %v1557_v61 = vadd.f32 %v1457_v58, %v1456_v57 }
  0xe7   : > { %v1176_v52 = vpop.f32.mrf.mxu3  ;;  %v4363_v55 = vadd.f32 %v854_v54, %v693_v51 }
  0xe9   : > { %v1015_v59 = vpop.f32.mrf.mxu2  ;;  %v1458_v5 = vmul.f32 %v4363_v55, %v4363_v55 }
  0xea   : > { %v4369_v60 = vadd.f32 %v1176_v52, %v1015_v59 }
  0xec   : > { %v1320_v63 = vadd.f32 %v4369_v60, %v4363_v55  ;;  %v1459_v6 = vmul.f32 %v4369_v60, %v4369_v60 }
  0xed   : > { %v696_v0 = vpop.f32.mrf.mxu0 }
  0xee   : > { %1558 = vadd.xlane.f32.xlu2 %v1557_v61  ;;  %1321 = vadd.xlane.f32.xlu0 %v1320_v63  ;;  %v857_v2 = vpop.f32.mrf.mxu1  ;;  %v1560_v9 = vadd.f32 %v1459_v6, %v1458_v5 }
  0xef   : > { %v1179_v1 = vpop.f32.mrf.mxu3  ;;  %v4373_v4 = vadd.f32 %v857_v2, %v696_v0 }
  0xf1   : > { %v1018_v7 = vpop.f32.mrf.mxu2  ;;  %v1460_v17 = vmul.f32 %v4373_v4, %v4373_v4 }
  0xf2   : > { %v4379_v8 = vadd.f32 %v1179_v1, %v1018_v7 }
  0xf4   : > { %v1323_v10 = vadd.f32 %v4379_v8, %v4373_v4  ;;  %v1461_v18 = vmul.f32 %v4379_v8, %v4379_v8 }
  0xf5   : > { %v699_v11 = vpop.f32.mrf.mxu0 }
  0xf6   : > { %1561 = vadd.xlane.f32.xlu0 %v1560_v9  ;;  %1324 = vadd.xlane.f32.xlu1 %v1323_v10  ;;  %v860_v14 = vpop.f32.mrf.mxu1  ;;  %v1563_v21 = vadd.f32 %v1461_v18, %v1460_v17 }
  0xf7   : > { %v1182_v13 = vpop.f32.mrf.mxu3  ;;  %v4383_v16 = vadd.f32 %v860_v14, %v699_v11 }
  0xf9   : > { %v1021_v19 = vpop.f32.mrf.mxu2  ;;  %v1462_v29 = vmul.f32 %v4383_v16, %v4383_v16 }
  0xfa   : > { %v4389_v20 = vadd.f32 %v1182_v13, %v1021_v19 }
  0xfc   : > { %v1326_v22 = vadd.f32 %v4389_v20, %v4383_v16  ;;  %v1463_v30 = vmul.f32 %v4389_v20, %v4389_v20 }
  0xfd   : > { %v702_v23 = vpop.f32.mrf.mxu0 }
  0xfe   : > { %1564 = vadd.xlane.f32.xlu1 %v1563_v21  ;;  %1327 = vadd.xlane.f32.xlu2 %v1326_v22  ;;  %v863_v26 = vpop.f32.mrf.mxu1  ;;  %v1566_v33 = vadd.f32 %v1463_v30, %v1462_v29 }
  0xff   : > { %v1185_v24 = vpop.f32.mrf.mxu3  ;;  %v4393_v27 = vadd.f32 %v863_v26, %v702_v23  ;;  %v460_v26 = vld [vmem:[%s4167_s14 + $0x158] sm:$0xff] }
 0x100   : > { %3594 = vmatmul.msk.f32.gmra.mxu3 %vm513_vm0, %v460_v26  ;;  %3546 = vmatmul.msk.f32.gmra.mxu1 %vm513_vm0, %v460_v26 }
 0x101   : > { %5942 = vst [vmem:[#allocation5_spill] sm:$0xff] %v4393_v27  ;;  %v1024_v31 = vpop.f32.mrf.mxu2  ;;  %v1464_v41 = vmul.f32 %v4393_v27, %v4393_v27 }
 0x102   : > { %v4399_v32 = vadd.f32 %v1185_v24, %v1024_v31  ;;  %v459_v24 = vld [vmem:[%s4167_s14 + $0x150] sm:$0xff] }
 0x103   : > { %1059 = vmatmul.f32.gmra.mxu2 %v459_v24  ;;  %737 = vmatmul.f32.gmra.mxu0 %v459_v24 }
 0x104   : > { %5943 = vst [vmem:[#allocation6_spill] sm:$0xff] %v4399_v32  ;;  %v1329_v34 = vadd.f32 %v4399_v32, %v4393_v27  ;;  %v1465_v42 = vmul.f32 %v4399_v32, %v4399_v32 }
 0x105   : > { %v705_v35 = vpop.f32.mrf.mxu0 }
 0x106   : > { %1567 = vadd.xlane.f32.xlu2 %v1566_v33  ;;  %1330 = vadd.xlane.f32.xlu0 %v1329_v34  ;;  %v866_v38 = vpop.f32.mrf.mxu1  ;;  %v1569_v45 = vadd.f32 %v1465_v42, %v1464_v41 }
 0x107   : > { %v1188_v36 = vpop.f32.mrf.mxu3  ;;  %v4403_v40 = vadd.f32 %v866_v38, %v705_v35 }
 0x109   : > { %v1027_v43 = vpop.f32.mrf.mxu2  ;;  %v1466_v54 = vmul.f32 %v4403_v40, %v4403_v40 }
 0x10a   : > { %v4409_v44 = vadd.f32 %v1188_v36, %v1027_v43 }
 0x10c   : > { %v1332_v46 = vadd.f32 %v4409_v44, %v4403_v40  ;;  %v1467_v57 = vmul.f32 %v4409_v44, %v4409_v44 }
 0x10d   : > { %v708_v48 = vpop.f32.mrf.mxu0 }
 0x10e   : > { %1570 = vadd.xlane.f32.xlu0 %v1569_v45  ;;  %1333 = vadd.xlane.f32.xlu1 %v1332_v46  ;;  %v869_v51 = vpop.f32.mrf.mxu1  ;;  %v1572_v61 = vadd.f32 %v1467_v57, %v1466_v54 }
 0x10f   : > { %v1191_v50 = vpop.f32.mrf.mxu3  ;;  %v4413_v52 = vadd.f32 %v869_v51, %v708_v48 }
 0x111   : > { %5944 = vst [vmem:[#allocation7_spill] sm:$0xff] %v4413_v52  ;;  %v1030_v58 = vpop.f32.mrf.mxu2  ;;  %v1468_v6 = vmul.f32 %v4413_v52, %v4413_v52 }
 0x112   : > { %v4419_v59 = vadd.f32 %v1191_v50, %v1030_v58 }
 0x114   : > { %5945 = vst [vmem:[#allocation8_spill] sm:$0xff] %v4419_v59  ;;  %v1335_v63 = vadd.f32 %v4419_v59, %v4413_v52  ;;  %v1469_v7 = vmul.f32 %v4419_v59, %v4419_v59 }
 0x115   : > { %v711_v0 = vpop.f32.mrf.mxu0 }
 0x116   : > { %1573 = vadd.xlane.f32.xlu1 %v1572_v61  ;;  %1336 = vadd.xlane.f32.xlu2 %v1335_v63  ;;  %v872_v2 = vpop.f32.mrf.mxu1  ;;  %v1575_v11 = vadd.f32 %v1469_v7, %v1468_v6 }
 0x117   : > { %v1194_v1 = vpop.f32.mrf.mxu3  ;;  %v4423_v5 = vadd.f32 %v872_v2, %v711_v0 }
 0x119   : > { %5946 = vst [vmem:[#allocation9_spill] sm:$0xff] %v4423_v5  ;;  %v1033_v9 = vpop.f32.mrf.mxu2  ;;  %v1470_v21 = vmul.f32 %v4423_v5, %v4423_v5 }
 0x11a   : > { %v4429_v10 = vadd.f32 %v1194_v1, %v1033_v9 }
 0x11c   : > { %5947 = vst [vmem:[#allocation10_spill] sm:$0xff] %v4429_v10  ;;  %v1338_v13 = vadd.f32 %v4429_v10, %v4423_v5  ;;  %v1471_v22 = vmul.f32 %v4429_v10, %v4429_v10 }
 0x11d   : > { %v714_v14 = vpop.f32.mrf.mxu0 }
 0x11e   : > { %1576 = vadd.xlane.f32.xlu2 %v1575_v11  ;;  %1339 = vadd.xlane.f32.xlu0 %v1338_v13  ;;  %v875_v18 = vpop.f32.mrf.mxu1  ;;  %v1578_v30 = vadd.f32 %v1471_v22, %v1470_v21  ;;  %v462_v21 = vld [vmem:[%s4167_s14 + $0x168] sm:$0xff] }
 0x11f   : > { %v1197_v17 = vpop.f32.mrf.mxu3  ;;  %v4433_v19 = vadd.f32 %v875_v18, %v714_v14  ;;  %v461_v18 = vld [vmem:[%s4167_s14 + $0x160] sm:$0xff]  ;;  %3595 = vmatmul.msk.f32.gmra.mxu3 %vm513_vm0, %v462_v21  ;;  %3547 = vmatmul.msk.f32.gmra.mxu1 %vm513_vm0, %v462_v21 }
 0x120   : > { %1062 = vmatmul.f32.gmra.mxu2 %v461_v18  ;;  %740 = vmatmul.f32.gmra.mxu0 %v461_v18 }
 0x121   : > { %5948 = vst [vmem:[#allocation11_spill] sm:$0xff] %v4433_v19  ;;  %v1036_v23 = vpop.f32.mrf.mxu2  ;;  %v1472_v38 = vmul.f32 %v4433_v19, %v4433_v19 }
 0x122   : > { %v4441_v29 = vadd.f32 %v1197_v17, %v1036_v23 }
 0x124   : > { %5949 = vst [vmem:[#allocation12_spill] sm:$0xff] %v4441_v29  ;;  %v1341_v31 = vadd.f32 %v4441_v29, %v4433_v19  ;;  %v1473_v41 = vmul.f32 %v4441_v29, %v4441_v29 }
 0x125   : > { %v717_v33 = vpop.f32.mrf.mxu0 }
 0x126   : > { %1579 = vadd.xlane.f32.xlu0 %v1578_v30  ;;  %1342 = vadd.xlane.f32.xlu1 %v1341_v31  ;;  %v878_v35 = vpop.f32.mrf.mxu1  ;;  %v1581_v45 = vadd.f32 %v1473_v41, %v1472_v38 }
 0x127   : > { %v1200_v34 = vpop.f32.mrf.mxu3  ;;  %v4447_v36 = vadd.f32 %v878_v35, %v717_v33 }
 0x129   : > { %5950 = vst [vmem:[#allocation13_spill] sm:$0xff] %v4447_v36  ;;  %v1039_v42 = vpop.f32.mrf.mxu2  ;;  %v1474_v57 = vmul.f32 %v4447_v36, %v4447_v36 }
 0x12a   : > { %v4453_v43 = vadd.f32 %v1200_v34, %v1039_v42 }
 0x12c   : > { %5951 = vst [vmem:[#allocation14_spill] sm:$0xff] %v4453_v43  ;;  %v1344_v46 = vadd.f32 %v4453_v43, %v4447_v36  ;;  %v1475_v58 = vmul.f32 %v4453_v43, %v4453_v43 }
 0x12d   : > { %v720_v50 = vpop.f32.mrf.mxu0 }
 0x12e   : > { %1582 = vadd.xlane.f32.xlu1 %v1581_v45  ;;  %1345 = vadd.xlane.f32.xlu2 %v1344_v46  ;;  %v881_v51 = vpop.f32.mrf.mxu1  ;;  %v1584_v1 = vadd.f32 %v1475_v58, %v1474_v57  ;;  %v3835_v46 = vmov 0   ;;  %v463_v57 = vld [vmem:[%s4167_s14 + $0x170] sm:$0xff]  ;;  %v464_v58 = vld [vmem:[%s4167_s14 + $0x178] sm:$0xff] }
 0x12f   : > { %v1203_v48 = vpop.f32.mrf.mxu3  ;;  %v4457_v54 = vadd.f32 %v881_v51, %v720_v50  ;;  %3673 = vset.pattern.permute.xlu1 %v3835_v46  ;;  %3672 = vset.pattern.permute.xlu0 %v3835_v46 }
 0x130   : > { %3674 = vset.pattern.permute.xlu2 %v3835_v46  ;;  %1065 = vmatmul.f32.gmra.mxu2 %v463_v57 }
 0x131   : > { %5952 = vst [vmem:[#allocation15_spill] sm:$0xff] %v4457_v54  ;;  %v1042_v61 = vpop.f32.mrf.mxu2  ;;  %v1304_v63 = vpop.xlane.xlu0 %1303  ;;  %v1476_v14 = vmul.f32 %v4457_v54, %v4457_v54  ;;  %3596 = vmatmul.msk.f32.gmra.mxu3 %vm513_vm0, %v464_v58  ;;  %743 = vmatmul.f32.gmra.mxu0 %v463_v57 }
 0x132   : > { %v4463_v0 = vadd.f32 %v1203_v48, %v1042_v61  ;;  %v4467_v6 = vmul.f32 0.0051020407, %v1304_v63  ;;  %3548 = vmatmul.msk.f32.gmra.mxu1 %vm513_vm0, %v464_v58 }
 0x134   : > { %5953 = vst [vmem:[#allocation16_spill] sm:$0xff] %v4463_v0  ;;  %v1347_v2 = vadd.f32 %v4463_v0, %v4457_v54  ;;  %v1477_v17 = vmul.f32 %v4463_v0, %v4463_v0  ;;  %v1782_v24 = vmul.f32 %v4467_v6, %v4467_v6  ;;  %v472_v54 = vld [vmem:[%s4167_s14 + $0x1b8] sm:$0xff] }
 0x135   : > { %v723_v9 = vpop.f32.mrf.mxu0 }
 0x136   : > { %1585 = vadd.xlane.f32.xlu2 %v1584_v1  ;;  %1348 = vadd.xlane.f32.xlu0 %v1347_v2  ;;  %v884_v11 = vpop.f32.mrf.mxu1  ;;  %v1587_v34 = vadd.f32 %v1477_v17, %v1476_v14 }
 0x137   : > { %v1206_v7 = vpop.f32.mrf.mxu3  ;;  %v4469_v13 = vadd.f32 %v884_v11, %v723_v9 }
 0x139   : > { %5954 = vst [vmem:[#allocation17_spill] sm:$0xff] %v4469_v13  ;;  %v1045_v22 = vpop.f32.mrf.mxu2  ;;  %v1544_v23 = vpop.xlane.xlu0 %1543  ;;  %v1478_v50 = vmul.f32 %v4469_v13, %v4469_v13 }
 0x13a   : > { %v4480_v26 = vadd.f32 %v1206_v7, %v1045_v22  ;;  %v1734_v30 = vmul.f32 0.0051020407, %v1544_v23 }
 0x13b   : > { %v4483_v31 = vpop.xlane.xlu1 %1546 }
 0x13c   : > { %5955 = vst [vmem:[#allocation18_spill] sm:$0xff] %v4480_v26  ;;  %v1830_v33 = vsub.f32 %v1734_v30, %v1782_v24  ;;  %v1350_v35 = vadd.f32 %v4480_v26, %v4469_v13  ;;  %v1479_v51 = vmul.f32 %v4480_v26, %v4480_v26 }
 0x13d   : > { %v726_v42 = vpop.f32.mrf.mxu0 }
 0x13e   : > { %v1878_v38 = vadd.f32 0.001, %v1830_v33  ;;  %1588 = vadd.xlane.f32.xlu0 %v1587_v34  ;;  %1351 = vadd.xlane.f32.xlu1 %v1350_v35  ;;  %v887_v45 = vpop.f32.mrf.mxu1  ;;  %v1590_v7 = vadd.f32 %v1479_v51, %v1478_v50 }
 0x13f   : > { %v1209_v41 = vpop.f32.mrf.mxu3  ;;  %v4487_v48 = vadd.f32 %v887_v45, %v726_v42 }
 0x140   : > { %3675 = vrsqrt.f32 %v1878_v38  ;;  %vm1932_vm2 = vweird.f32 %v1878_v38 }
 0x141   : > { %5956 = vst [vmem:[#allocation19_spill] sm:$0xff] %v4487_v48  ;;  %v1048_v61 = vpop.f32.mrf.mxu2  ;;  %v1480_v24 = vmul.f32 %v4487_v48, %v4487_v48 }
 0x142   : > { %v4496_v63 = vadd.f32 %v1209_v41, %v1048_v61 }
 0x143   : > { %v1310_v1 = vpop.xlane.xlu1 %1309  ;;  %v1550_v21 = vpop.xlane.xlu2 %1549 }
 0x144   : > { %5957 = vst [vmem:[#allocation20_spill] sm:$0xff] %v4496_v63  ;;  %v4499_v2 = vmul.f32 0.0051020407, %v1310_v1  ;;  %v1353_v9 = vadd.f32 %v4496_v63, %v4487_v48  ;;  %v1481_v30 = vmul.f32 %v4496_v63, %v4496_v63  ;;  %v1736_v41 = vmul.f32 0.0051020407, %v1550_v21 }
 0x145   : > { %v729_v14 = vpop.f32.mrf.mxu0 }
 0x146   : > { %v3676_v11 = vpop.eup %3675  ;;  %1591 = vadd.xlane.f32.xlu1 %v1590_v7  ;;  %1354 = vadd.xlane.f32.xlu2 %v1353_v9  ;;  %v890_v22 = vpop.f32.mrf.mxu1  ;;  %v1784_v23 = vmul.f32 %v4499_v2, %v4499_v2  ;;  %v1593_v50 = vadd.f32 %v1481_v30, %v1480_v24 }
 0x147   : > { %v1212_v17 = vpop.f32.mrf.mxu3  ;;  %v1927_v18 = vmul.f32 %v3676_v11, %v1878_v38  ;;  %v4509_v34 = vadd.f32 %v890_v22, %v729_v14  ;;  %vm1933_vm1 = vweird.f32 %v3676_v11 }
 0x148   : > { %v1832_v46 = vsub.f32 %v1736_v41, %v1784_v23  ;;  %vm1934_vm3 = vmor %vm1932_vm2, %vm1933_vm1  ;;  %v2502_v41 = vld [vmem:[%s4525_s13] sm:$0xff] }
 0x149   : > { %v1928_v33 = vmul.f32 %v3676_v11, %v1927_v18  ;;  %5958 = vst [vmem:[#allocation21_spill] sm:$0xff] %v4509_v34  ;;  %v1051_v35 = vpop.f32.mrf.mxu2  ;;  %v2406_v18 = vld [vmem:[%s4519_s11] sm:$0xff] }
 0x14a   : > { %v4511_v42 = vadd.f32 %v1212_v17, %v1051_v35  ;;  %v1880_v9 = vadd.f32 0.001, %v1832_v46 }
 0x14b   : > { %v1929_v45 = vmul.f32 0.5, %v1928_v33 }
 0x14c   : > { %5959 = vst [vmem:[#allocation22_spill] sm:$0xff] %v4511_v42  ;;  %v1356_v57 = vadd.f32 %v4511_v42, %v4509_v34  ;;  %3677 = vrsqrt.f32 %v1880_v9  ;;  %vm1952_vm5 = vweird.f32 %v1880_v9 }
 0x14d   : > { %v1930_v51 = vsub.f32 1.5, %v1929_v45 }
 0x14e   : > { %1594 = vadd.xlane.f32.xlu2 %v1593_v50  ;;  %v732_v61 = vpop.f32.mrf.mxu0  ;;  %1357 = vadd.xlane.f32.xlu0 %v1356_v57  ;;  %v893_v1 = vpop.f32.mrf.mxu1 }
 0x14f   : > { %v1215_v58 = vpop.f32.mrf.mxu3  ;;  %v1931_v7 = vmul.f32 %v3676_v11, %v1930_v51  ;;  %v1307_v57 = vpop.xlane.xlu0 %1306 }
 0x151   : > { %v1054_v14 = vpop.f32.mrf.mxu2  ;;  %v1935_v17 = vsel %vm1934_vm3, %v3676_v11, %v1931_v7 }
 0x152   : > { %v2454_v21 = vmul.f32 %v2406_v18, %v1935_v17  ;;  %v3678_v11 = vpop.eup %3677  ;;  %v1687_v17 = vmul.f32 0.0051020407, %v1307_v57  ;;  %v465_v18 = vld [vmem:[%s4167_s14 + $0x180] sm:$0xff]  ;;  %v1313_v57 = vpop.xlane.xlu1 %1312 }
 0x153   : > { %v1947_v46 = vmul.f32 %v3678_v11, %v1880_v9  ;;  %1068 = vmatmul.f32.gmra.mxu2 %v465_v18  ;;  %746 = vmatmul.f32.gmra.mxu0 %v465_v18  ;;  %vm1953_vm4 = vweird.f32 %v3678_v11  ;;  %v4544_v18 = vadd.f32 %v1215_v58, %v1054_v14 }
 0x154   : > { %v2550_v33 = vmul.f32 %v2454_v21, %v4467_v6  ;;  %vm1954_vm6 = vmor %vm1952_vm5, %vm1953_vm4 }
 0x155   : > { %v1948_v51 = vmul.f32 %v3678_v11, %v1947_v46  ;;  %5962 = vst [vmem:[#allocation25_spill] sm:$0xff] %v4544_v18  ;;  %v1485_v59 = vmul.f32 %v4544_v18, %v4544_v18 }
 0x156   : > { %v735_v22 = vpop.f32.mrf.mxu0  ;;  %v896_v23 = vpop.f32.mrf.mxu1  ;;  %v2598_v50 = vsub.f32 %v2502_v41, %v2550_v33 }
 0x157   : > { %v1218_v24 = vpop.f32.mrf.mxu3  ;;  %v4527_v30 = vadd.f32 %v896_v23, %v735_v22  ;;  %v1949_v7 = vmul.f32 0.5, %v1948_v51  ;;  %v466_v22 = vld [vmem:[%s4167_s14 + $0x188] sm:$0xff]  ;;  %v1783_v23 = vmul.f32 %v1687_v17, %v1687_v17  ;;  %v1553_v51 = vpop.xlane.xlu0 %1552 }
 0x158   : > { %3597 = vmatmul.msk.f32.gmra.mxu3 %vm513_vm0, %v466_v22  ;;  %3549 = vmatmul.msk.f32.gmra.mxu1 %vm513_vm0, %v466_v22 }
 0x159   : > { %5960 = vst [vmem:[#allocation23_spill] sm:$0xff] %v4527_v30  ;;  %v1057_v38 = vpop.f32.mrf.mxu2  ;;  %v1950_v6 = vsub.f32 1.5, %v1949_v7 }
 0x15a   : > { %v4530_v35 = vadd.f32 %v1218_v24, %v1057_v38  ;;  %v1735_v24 = vmul.f32 0.0051020407, %v4483_v31  ;;  %v4546_v31 = vadd.f32 %v893_v1, %v732_v61  ;;  %v1556_v9 = vpop.xlane.xlu1 %1555  ;;  %v4556_v61 = vmul.f32 0.0051020407, %v1313_v57 }
 0x15b   : > { %v1951_v38 = vmul.f32 %v3678_v11, %v1950_v6 }
 0x15c   : > { %5961 = vst [vmem:[#allocation24_spill] sm:$0xff] %v4530_v35  ;;  %v1362_v45 = vadd.f32 %v4530_v35, %v4527_v30  ;;  %v1831_v33 = vsub.f32 %v1735_v24, %v1783_v23  ;;  %v1482_v23 = vmul.f32 %v4509_v34, %v4509_v34  ;;  %v1483_v24 = vmul.f32 %v4511_v42, %v4511_v42  ;;  %v2504_v42 = vld [vmem:[%s4525_s13 + $0x10] sm:$0xff] }
 0x15d   : > { %v1955_v41 = vsel %vm1954_vm6, %v3678_v11, %v1951_v38  ;;  %5963 = vst [vmem:[#allocation26_spill] sm:$0xff] %v4546_v31  ;;  %v1359_v11 = vadd.f32 %v4544_v18, %v4546_v31 }
 0x15e   : > { %1363 = vadd.xlane.f32.xlu2 %v1362_v45  ;;  %v1879_v45 = vadd.f32 0.001, %v1831_v33  ;;  %v1596_v58 = vadd.f32 %v1483_v24, %v1482_v23 }
 0x15f   : > { %2984 = vperm.xlu1 %3673, %v2598_v50  }
 0x160   : > { %3679 = vrsqrt.f32 %v1879_v45  ;;  %vm1942_vm8 = vweird.f32 %v1879_v45 }
 0x161   : > { %v4548_v6 = vpop.xlane.xlu0 %1321 }
 0x162   : > { %2648 = vperm.xlu0 %3672, %v2454_v21   ;;  %v2408_v21 = vld [vmem:[%s4519_s11 + $0x10] sm:$0xff] }
 0x163   : > { %v4541_v46 = vmul.f32 %v2408_v21, %v1955_v41  ;;  %v1785_v41 = vmul.f32 %v4556_v61, %v4556_v61 }
 0x166   : > { %v3680_v50 = vpop.eup %3679 }
 0x167   : > { %v1937_v7 = vmul.f32 %v3680_v50, %v1879_v45  ;;  %vm1943_vm7 = vweird.f32 %v3680_v50  ;;  %v1487_v45 = vmul.f32 %v4530_v35, %v4530_v35  ;;  %v468_v35 = vld [vmem:[%s4167_s14 + $0x198] sm:$0xff] }
 0x168   : > { %vm1944_vm9 = vmor %vm1942_vm8, %vm1943_vm7  ;;  %3598 = vmatmul.msk.f32.gmra.mxu3 %vm513_vm0, %v468_v35  ;;  %3550 = vmatmul.msk.f32.gmra.mxu1 %vm513_vm0, %v468_v35 }
 0x169   : > { %v1938_v22 = vmul.f32 %v3680_v50, %v1937_v7  ;;  %v4558_v1 = vpop.xlane.xlu0 %1561  ;;  %v4560_v33 = vpop.xlane.xlu1 %1324  ;;  %v1737_v7 = vmul.f32 0.0051020407, %v1553_v51  ;;  %v2503_v51 = vld [vmem:[%s4525_s13 + $0x8] sm:$0xff] }
 0x16b   : > { %v1939_v38 = vmul.f32 0.5, %v1938_v22  ;;  %v2407_v22 = vld [vmem:[%s4519_s11 + $0x8] sm:$0xff]  ;;  %v1833_v23 = vsub.f32 %v1737_v7, %v1785_v41 }
 0x16d   : > { %v1940_v14 = vsub.f32 1.5, %v1939_v38  ;;  %v1316_v38 = vpop.xlane.xlu2 %1315 }
 0x16f   : > { %v1941_v21 = vmul.f32 %v3680_v50, %v1940_v14  ;;  %v1486_v14 = vmul.f32 %v4527_v30, %v4527_v30  ;;  %v467_v30 = vld [vmem:[%s4167_s14 + $0x190] sm:$0xff] }
 0x170   : > { %1071 = vmatmul.f32.gmra.mxu2 %v467_v30  ;;  %749 = vmatmul.f32.gmra.mxu0 %v467_v30  ;;  %v2552_v30 = vmul.f32 %v4541_v46, %v4499_v2 }
 0x171   : > { %v4567_v63 = vpop.xlane.xlu1 %1564 }
 0x172   : > { %v2600_v0 = vsub.f32 %v2504_v42, %v2552_v30 }
 0x176   : > { %2658 = vperm.xlu2 %3674, %v4541_v46   ;;  %v471_v46 = vld [vmem:[%s4167_s14 + $0x1b0] sm:$0xff] }
 0x179   : > { %v4565_v57 = vpop.xlane.xlu0 %1330 }
 0x17d   : > { %v899_v30 = vpop.f32.mrf.mxu1 }
 0x181   : > { %v4574_v41 = vpop.xlane.xlu0 %1570  ;;  %v4576_v7 = vpop.xlane.xlu1 %1333 }
 0x189   : > { %1360 = vadd.xlane.f32.xlu1 %v1359_v11  ;;  %v1945_v11 = vsel %vm1944_vm9, %v3680_v50, %v1941_v21  ;;  %v1602_v50 = vadd.f32 %v1487_v45, %v1486_v14  ;;  %v4586_v14 = vpop.xlane.xlu1 %1573 }
 0x18a   : > { %v2455_v24 = vmul.f32 %v2407_v22, %v1945_v11  ;;  %v4578_v22 = vpop.xlane.xlu2 %1318 }
 0x18b   : > { %v4646_v5 = vmul.f32 0.0051020407, %v4578_v22 }
 0x18c   : > { %1597 = vadd.xlane.f32.xlu0 %v1596_v58  ;;  %v1881_v58 = vadd.f32 0.001, %v1833_v23  ;;  %v2551_v48 = vmul.f32 %v2455_v24, %v1687_v17 }
 0x18e   : > { %3681 = vrsqrt.f32 %v1881_v58  ;;  %v2599_v21 = vsub.f32 %v2503_v51, %v2551_v48  ;;  %vm1962_vm11 = vweird.f32 %v1881_v58 }
 0x191   : > { %v4584_v48 = vpop.xlane.xlu0 %1339 }
 0x192   : > { %v4588_v45 = vpop.xlane.xlu2 %1558 }
 0x194   : > { %v3682_v11 = vpop.eup %3681 }
 0x195   : > { %v1957_v23 = vmul.f32 %v3682_v11, %v1881_v58  ;;  %vm1963_vm10 = vweird.f32 %v3682_v11  ;;  %v738_v58 = vpop.f32.mrf.mxu0 }
 0x196   : > { %vm1964_vm12 = vmor %vm1962_vm11, %vm1963_vm10 }
 0x197   : > { %v1958_v17 = vmul.f32 %v3682_v11, %v1957_v23  ;;  %v1738_v23 = vmul.f32 0.0051020407, %v1556_v9 }
 0x199   : > { %v1959_v51 = vmul.f32 0.5, %v1958_v17  ;;  %v4601_v17 = vpop.xlane.xlu0 %1579  ;;  %v4603_v34 = vpop.xlane.xlu1 %1342 }
 0x19a   : > { %v4605_v43 = vpop.xlane.xlu2 %1327 }
 0x19f   : > { %1603 = vadd.xlane.f32.xlu2 %v1602_v50  ;;  %v469_v50 = vld [vmem:[%s4167_s14 + $0x1a0] sm:$0xff] }
 0x1a0   : > { %2989 = vperm.xlu0 %3672, %v2599_v21   ;;  %v470_v21 = vld [vmem:[%s4167_s14 + $0x1a8] sm:$0xff]  ;;  %1074 = vmatmul.f32.gmra.mxu2 %v469_v50 }
 0x1a1   : > { %3599 = vmatmul.msk.f32.gmra.mxu3 %vm513_vm0, %v470_v21  ;;  %752 = vmatmul.f32.gmra.mxu0 %v469_v50  ;;  %v4616_v42 = vpop.xlane.xlu1 %1582 }
 0x1a2   : > { %2653 = vperm.xlu1 %3673, %v2455_v24   ;;  %v4590_v24 = vmul.f32 0.0051020407, %v1316_v38  ;;  %3551 = vmatmul.msk.f32.gmra.mxu1 %vm513_vm0, %v470_v21  ;;  %v1960_v38 = vsub.f32 1.5, %v1959_v51  ;;  %v2409_v51 = vld [vmem:[%s4519_s11 + $0x18] sm:$0xff] }
 0x1a4   : > { %v1786_v35 = vmul.f32 %v4590_v24, %v4590_v24  ;;  %v1961_v2 = vmul.f32 %v3682_v11, %v1960_v38 }
 0x1a6   : > { %v1834_v36 = vsub.f32 %v1738_v23, %v1786_v35  ;;  %v1965_v50 = vsel %vm1964_vm12, %v3682_v11, %v1961_v2  ;;  %v1060_v23 = vpop.f32.mrf.mxu2 }
 0x1a7   : > { %v4614_v35 = vmul.f32 %v2409_v51, %v1965_v50  ;;  %v1484_v50 = vmul.f32 %v4546_v31, %v4546_v31 }
 0x1a8   : > { %1077 = vmatmul.f32.gmra.mxu2 %v471_v46  ;;  %v1882_v9 = vadd.f32 0.001, %v1834_v36  ;;  %v1221_v36 = vpop.f32.mrf.mxu3 }
 0x1a9   : > { %3600 = vmatmul.msk.f32.gmra.mxu3 %vm513_vm0, %v472_v54  ;;  %755 = vmatmul.f32.gmra.mxu0 %v471_v46  ;;  %v4612_v21 = vpop.xlane.xlu0 %1348  ;;  %v4621_v46 = vadd.f32 %v899_v30, %v738_v58 }
 0x1aa   : > { %3552 = vmatmul.msk.f32.gmra.mxu1 %vm513_vm0, %v472_v54  ;;  %3683 = vrsqrt.f32 %v1882_v9  ;;  %v4623_v54 = vadd.f32 %v1221_v36, %v1060_v23  ;;  %v1599_v23 = vadd.f32 %v1485_v59, %v1484_v50  ;;  %v1739_v50 = vmul.f32 0.0051020407, %v4588_v45 }
 0x1ab   : > { %5964 = vst [vmem:[#allocation27_spill] sm:$0xff] %v4621_v46  ;;  %v1488_v36 = vmul.f32 %v4621_v46, %v4621_v46  ;;  %vm1972_vm14 = vweird.f32 %v1882_v9 }
 0x1ac   : > { %5965 = vst [vmem:[#allocation28_spill] sm:$0xff] %v4623_v54  ;;  %v1365_v58 = vadd.f32 %v4623_v54, %v4621_v46  ;;  %v1489_v26 = vmul.f32 %v4623_v54, %v4623_v54  ;;  %v4654_v46 = vpop.f32.mrf.mxu1 }
 0x1ae   : > { %v1605_v10 = vadd.f32 %v1489_v26, %v1488_v36  ;;  %v1787_v26 = vmul.f32 %v4646_v5, %v4646_v5 }
 0x1b0   : > { %v3684_v38 = vpop.eup %3683 }
 0x1b1   : > { %v4625_v11 = vpop.xlane.xlu0 %1588  ;;  %v4627_v2 = vpop.xlane.xlu1 %1351  ;;  %v1967_v51 = vmul.f32 %v3684_v38, %v1882_v9  ;;  %vm1973_vm13 = vweird.f32 %v3684_v38 }
 0x1b2   : > { %vm1974_vm15 = vmor %vm1972_vm14, %vm1973_vm13 }
 0x1b3   : > { %v1968_v30 = vmul.f32 %v3684_v38, %v1967_v51 }
 0x1b5   : > { %v1969_v13 = vmul.f32 0.5, %v1968_v30  ;;  %v4658_v30 = vpop.f32.mrf.mxu2 }
 0x1b7   : > { %2994 = vperm.xlu2 %3674, %v2600_v0   ;;  %v4618_v0 = vpop.xlane.xlu2 %1567  ;;  %v1970_v51 = vsub.f32 1.5, %v1969_v13  ;;  %v1835_v13 = vsub.f32 %v1739_v50, %v1787_v26  ;;  %v2410_v50 = vld [vmem:[%s4519_s11 + $0x20] sm:$0xff] }
 0x1b9   : > { %v4643_v18 = vpop.xlane.xlu1 %1591  ;;  %v1971_v54 = vmul.f32 %v3684_v38, %v1970_v51  ;;  %v1883_v19 = vadd.f32 0.001, %v1835_v13 }
 0x1bb   : > { %v1975_v32 = vsel %vm1974_vm15, %v3684_v38, %v1971_v54  ;;  %3685 = vrsqrt.f32 %v1883_v19  ;;  %vm1982_vm2 = vweird.f32 %v1883_v19 }
 0x1bd   : > { %v1066_v51 = vpop.f32.mrf.mxu2 }
 0x1bf   : > { %2663 = vperm.xlu2 %3674, %v4614_v35   ;;  %v4633_v52 = vpop.xlane.xlu2 %1336 }
 0x1c1   : > { %v4641_v31 = vpop.xlane.xlu0 %1357 }
 0x1c2   : > { %5966 = vst [vmem:[#allocation29_spill] sm:$0xff] %v4641_v31 }
 0x1c7   : > { %v4649_v59 = vpop.xlane.xlu2 %1576 }
 0x1ca   : > { %1366 = vadd.xlane.f32.xlu0 %v1365_v58  ;;  %v4652_v58 = vpop.f32.mrf.mxu0 }
 0x1cc   : > { %1600 = vadd.xlane.f32.xlu1 %v1599_v23  ;;  %v4660_v23 = vpop.f32.mrf.mxu3 }
 0x1cf   : > { %v4670_v26 = vpop.xlane.xlu2 %1345 }
 0x1d0   : > { %5967 = vst [vmem:[#allocation30_spill] sm:$0xff] %v4670_v26 }
 0x1d1   : > { %v2985_v31 = vpop.permute.xlu1 %2984 }
 0x1d2   : > { %1606 = vadd.xlane.f32.xlu0 %v1605_v10 }
 0x1d4   : > { %v2649_v22 = vpop.permute.xlu0 %2648  ;;  %v1227_v9 = vpop.f32.mrf.mxu3 }
 0x1d5   : > { %v2886_v45 = vmul.f32 %v2649_v22, %v4290_v53  ;;  %v2887_v36 = vmul.f32 %v2649_v22, %v4293_v56  ;;  %v744_v53 = vpop.f32.mrf.mxu0  ;;  %v905_v56 = vpop.f32.mrf.mxu1  ;;  %v4673_v22 = vmul.f32 %v2410_v50, %v1975_v32 }
 0x1d6   : > { %v4677_v13 = vadd.f32 %v905_v56, %v744_v53 }
 0x1d7   : > { %v3222_v10 = vadd.f32 %v2985_v31, %v2886_v45  ;;  %v3223_v29 = vadd.f32 %v2985_v31, %v2887_v36  ;;  %v2553_v31 = vmul.f32 %v4614_v35, %v4556_v61  ;;  %v4679_v45 = vadd.f32 %v1227_v9, %v1066_v51  ;;  %v2505_v36 = vld [vmem:[%s4525_s13 + $0x18] sm:$0xff]  ;;  %v4687_v26 = vpop.xlane.xlu2 %1585  ;;  %v473_v51 = vld [vmem:[%s4167_s14 + $0x1c0] sm:$0xff]  ;;  %v474_v9 = vld [vmem:[%s4167_s14 + $0x1c8] sm:$0xff] }
 0x1d8   : > { %5968 = vst [vmem:[#allocation31_spill] sm:$0xff] %v4677_v13  ;;  %v2554_v38 = vmul.f32 %v4673_v22, %v4590_v24  ;;  %1080 = vmatmul.f32.gmra.mxu2 %v473_v51  ;;  %3601 = vmatmul.msk.f32.gmra.mxu3 %vm513_vm0, %v474_v9 }
 0x1d9   : > { %3318 = vst [vmem:[%s4666_s23] sm:$0xff] %v3222_v10  ;;  %v2601_v54 = vsub.f32 %v2505_v36, %v2553_v31  ;;  %v3686_v10 = vpop.eup %3685  ;;  %v1371_v32 = vadd.f32 %v4679_v45, %v4677_v13  ;;  %758 = vmatmul.f32.gmra.mxu0 %v473_v51  ;;  %3553 = vmatmul.msk.f32.gmra.mxu1 %vm513_vm0, %v474_v9 }
 0x1da   : > { %3319 = vst [vmem:[%s4666_s23 + $0x8] sm:$0xff] %v3223_v29  ;;  %v2506_v29 = vld [vmem:[%s4525_s13 + $0x20] sm:$0xff]  ;;  %v1977_v61 = vmul.f32 %v3686_v10, %v1883_v19  ;;  %vm1983_vm1 = vweird.f32 %v3686_v10 }
 0x1db   : > { %5969 = vst [vmem:[#allocation32_spill] sm:$0xff] %v4679_v45  ;;  %v2602_v50 = vsub.f32 %v2506_v29, %v2554_v38  ;;  %vm1984_vm3 = vmor %vm1982_vm2, %vm1983_vm1  ;;  %v2411_v29 = vld [vmem:[%s4519_s11 + $0x28] sm:$0xff] }
 0x1dc   : > { %5970 = vst [vmem:[#allocation33_spill] sm:$0xff] %v4687_v26  ;;  %v1978_v35 = vmul.f32 %v3686_v10, %v1977_v61 }
 0x1dd   : > { %v747_v51 = vpop.f32.mrf.mxu0  ;;  %v908_v9 = vpop.f32.mrf.mxu1 }
 0x1de   : > { %v1979_v56 = vmul.f32 0.5, %v1978_v35  ;;  %v1741_v35 = vmul.f32 0.0051020407, %v4567_v63 }
 0x1df   : > { %v4689_v53 = vpop.xlane.xlu2 %1354 }
 0x1e0   : > { %5971 = vst [vmem:[#allocation34_spill] sm:$0xff] %v4689_v53  ;;  %v1980_v24 = vsub.f32 1.5, %v1979_v56  ;;  %v477_v56 = vld [vmem:[%s4167_s14 + $0x1e0] sm:$0xff] }
 0x1e2   : > { %v1981_v31 = vmul.f32 %v3686_v10, %v1980_v24  ;;  %v478_v24 = vld [vmem:[%s4167_s14 + $0x1e8] sm:$0xff] }
 0x1e4   : > { %v1985_v38 = vsel %vm1984_vm3, %v3686_v10, %v1981_v31  ;;  %v1069_v31 = vpop.f32.mrf.mxu2 }
 0x1e5   : > { %2999 = vperm.xlu1 %3673, %v2601_v54   ;;  %v4699_v54 = vmul.f32 0.0051020407, %v4560_v33  ;;  %v4703_v61 = vmul.f32 %v2411_v29, %v1985_v38  ;;  %v1230_v38 = vpop.f32.mrf.mxu3  ;;  %v4719_v29 = vadd.f32 %v4654_v46, %v4652_v58 }
 0x1e6   : > { %3004 = vperm.xlu0 %3672, %v2602_v50   ;;  %v476_v50 = vld [vmem:[%s4167_s14 + $0x1d8] sm:$0xff] }
 0x1e7   : > { %v4695_v36 = vpop.xlane.xlu2 %1594  ;;  %3602 = vmatmul.msk.f32.gmra.mxu3 %vm513_vm0, %v476_v50  ;;  %3554 = vmatmul.msk.f32.gmra.mxu1 %vm513_vm0, %v476_v50  ;;  %v1789_v33 = vmul.f32 %v4699_v54, %v4699_v54  ;;  %5974 = vst [vmem:[#allocation37_spill] sm:$0xff] %v4719_v29  ;;  %v4725_v50 = vadd.f32 %v908_v9, %v747_v51 }
 0x1e8   : > { %1372 = vadd.xlane.f32.xlu2 %v1371_v32  ;;  %5972 = vst [vmem:[#allocation35_spill] sm:$0xff] %v4695_v36  ;;  %v475_v32 = vld [vmem:[%s4167_s14 + $0x1d0] sm:$0xff] }
 0x1e9   : > { %1083 = vmatmul.f32.gmra.mxu2 %v475_v32  ;;  %761 = vmatmul.f32.gmra.mxu0 %v475_v32  ;;  %v1837_v10 = vsub.f32 %v1741_v35, %v1789_v33  ;;  %v4723_v32 = vadd.f32 %v4660_v23, %v4658_v30  ;;  %5976 = vst [vmem:[#allocation39_spill] sm:$0xff] %v4725_v50 }
 0x1ea   : > { %v4727_v35 = vadd.f32 %v1230_v38, %v1069_v31  ;;  %v1494_v30 = vmul.f32 %v4725_v50, %v4725_v50 }
 0x1eb   : > { %v1885_v63 = vadd.f32 0.001, %v1837_v10  ;;  %5975 = vst [vmem:[#allocation38_spill] sm:$0xff] %v4723_v32  ;;  %v1368_v10 = vadd.f32 %v4723_v32, %v4719_v29 }
 0x1ec   : > { %5977 = vst [vmem:[#allocation40_spill] sm:$0xff] %v4727_v35  ;;  %v1495_v23 = vmul.f32 %v4727_v35, %v4727_v35 }
 0x1ed   : > { %3687 = vrsqrt.f32 %v1885_v63  ;;  %vm2002_vm5 = vweird.f32 %v1885_v63 }
 0x1ef   : > { %v4708_v19 = vpop.xlane.xlu2 %1363  ;;  %3603 = vmatmul.msk.f32.gmra.mxu3 %vm513_vm0, %v478_v24  ;;  %3555 = vmatmul.msk.f32.gmra.mxu1 %vm513_vm0, %v478_v24 }
 0x1f0   : > { %5973 = vst [vmem:[#allocation36_spill] sm:$0xff] %v4708_v19 }
 0x1f1   : > { %1086 = vmatmul.f32.gmra.mxu2 %v477_v56  ;;  %764 = vmatmul.f32.gmra.mxu0 %v477_v56  ;;  %v1374_v56 = vadd.f32 %v4727_v35, %v4725_v50 }
 0x1f3   : > { %v3688_v58 = vpop.eup %3687 }
 0x1f4   : > { %v1997_v51 = vmul.f32 %v3688_v58, %v1885_v63  ;;  %vm2003_vm4 = vweird.f32 %v3688_v58  ;;  %v1072_v63 = vpop.f32.mrf.mxu2 }
 0x1f5   : > { %vm2004_vm6 = vmor %vm2002_vm5, %vm2003_vm4 }
 0x1f7   : > { %v2659_v33 = vpop.permute.xlu2 %2658 }
 0x1f8   : > { %v2890_v50 = vmul.f32 %v2659_v33, %v4316_v12  ;;  %v2891_v26 = vmul.f32 %v2659_v33, %v4319_v15  ;;  %v1493_v12 = vmul.f32 %v4679_v45, %v4679_v45 }
 0x1fc   : > { %v4729_v19 = vpop.xlane.xlu1 %1360 }
 0x1ff   : > { %v4735_v46 = vpop.xlane.xlu0 %1597 }
 0x200   : > { %2673 = vperm.xlu2 %3674, %v4703_v61   ;;  %5978 = vst [vmem:[#allocation41_spill] sm:$0xff] %v4735_v46  ;;  %v1998_v46 = vmul.f32 %v3688_v58, %v1997_v51 }
 0x202   : > { %v1999_v27 = vmul.f32 0.5, %v1998_v46  ;;  %v750_v46 = vpop.f32.mrf.mxu0 }
 0x20f   : > { %1369 = vadd.xlane.f32.xlu1 %v1368_v10  ;;  %v1614_v10 = vadd.f32 %v1495_v23, %v1494_v30  ;;  %v911_v23 = vpop.f32.mrf.mxu1 }
 0x210   : > { %1375 = vadd.xlane.f32.xlu0 %v1374_v56  ;;  %v4759_v51 = vadd.f32 %v911_v23, %v750_v46  ;;  %v1490_v23 = vmul.f32 %v4719_v29, %v4719_v29 }
 0x212   : > { %v4741_v24 = vpop.xlane.xlu2 %1603  ;;  %v2990_v36 = vpop.permute.xlu0 %2989 }
 0x213   : > { %5979 = vst [vmem:[#allocation42_spill] sm:$0xff] %v4741_v24 }
 0x214   : > { %v2654_v9 = vpop.permute.xlu1 %2653 }
 0x215   : > { %v2888_v31 = vmul.f32 %v2654_v9, %v4300_v62  ;;  %v2889_v38 = vmul.f32 %v2654_v9, %v4307_v3  ;;  %v2000_v3 = vsub.f32 1.5, %v1999_v27  ;;  %v2555_v9 = vmul.f32 %v4703_v61, %v4646_v5 }
 0x217   : > { %v3224_v56 = vadd.f32 %v2990_v36, %v2888_v31  ;;  %v3225_v53 = vadd.f32 %v2990_v36, %v2889_v38  ;;  %v1492_v36 = vmul.f32 %v4677_v13, %v4677_v13  ;;  %v2001_v30 = vmul.f32 %v3688_v58, %v2000_v3  ;;  %v480_v3 = vld [vmem:[%s4167_s14 + $0x1f8] sm:$0xff] }
 0x218   : > { %1615 = vadd.xlane.f32.xlu0 %v1614_v10  ;;  %v1740_v31 = vmul.f32 0.0051020407, %v4558_v1  ;;  %3604 = vmatmul.msk.f32.gmra.mxu3 %vm513_vm0, %v480_v3 }
 0x219   : > { %3320 = vst [vmem:[%s4666_s23 + $0x10] sm:$0xff] %v3224_v56  ;;  %v1611_v15 = vadd.f32 %v1493_v12, %v1492_v36  ;;  %3556 = vmatmul.msk.f32.gmra.mxu1 %vm513_vm0, %v480_v3 }
 0x21a   : > { %3321 = vst [vmem:[%s4666_s23 + $0x18] sm:$0xff] %v3225_v53  ;;  %v2995_v35 = vpop.permute.xlu2 %2994  ;;  %v2005_v53 = vsel %vm2004_vm6, %v3688_v58, %v2001_v30  ;;  %v4764_v58 = vmul.f32 0.0051020407, %v4548_v6  ;;  %v481_v30 = vld [vmem:[%s4167_s14 + $0x200] sm:$0xff] }
 0x21b   : > { %v3226_v24 = vadd.f32 %v2995_v35, %v2890_v50  ;;  %v3227_v62 = vadd.f32 %v2995_v35, %v2891_v26  ;;  %v2413_v26 = vld [vmem:[%s4519_s11 + $0x38] sm:$0xff] }
 0x21c   : > { %v2461_v50 = vmul.f32 %v2413_v26, %v2005_v53  ;;  %v2509_v35 = vld [vmem:[%s4525_s13 + $0x38] sm:$0xff]  ;;  %v1788_v10 = vmul.f32 %v4764_v58, %v4764_v58 }
 0x21d   : > { %3322 = vst [vmem:[%s4666_s23 + $0x20] sm:$0xff] %v3226_v24  ;;  %v1233_v24 = vpop.f32.mrf.mxu3 }
 0x21e   : > { %3323 = vst [vmem:[%s4666_s23 + $0x28] sm:$0xff] %v3227_v62  ;;  %v2557_v27 = vmul.f32 %v2461_v50, %v4699_v54  ;;  %v2507_v54 = vld [vmem:[%s4525_s13 + $0x28] sm:$0xff]  ;;  %v479_v62 = vld [vmem:[%s4167_s14 + $0x1f0] sm:$0xff]  ;;  %v1836_v6 = vsub.f32 %v1740_v31, %v1788_v10  ;;  %v4786_v26 = vpop.f32.mrf.mxu0 }
 0x21f   : > { %v2603_v56 = vsub.f32 %v2507_v54, %v2555_v9  ;;  %1089 = vmatmul.f32.gmra.mxu2 %v479_v62  ;;  %767 = vmatmul.f32.gmra.mxu0 %v479_v62  ;;  %v483_v9 = vld [vmem:[%s4167_s14 + $0x210] sm:$0xff]  ;;  %v484_v54 = vld [vmem:[%s4167_s14 + $0x218] sm:$0xff] }
 0x220   : > { %v2605_v33 = vsub.f32 %v2509_v35, %v2557_v27  ;;  %v4778_v5 = vadd.f32 0.001, %v1836_v6 }
 0x222   : > { %3689 = vrsqrt.f32 %v4778_v5  ;;  %v2664_v3 = vpop.permute.xlu2 %2663  ;;  %vm1992_vm11 = vweird.f32 %v4778_v5 }
 0x223   : > { %v4790_v27 = vpop.f32.mrf.mxu2 }
 0x225   : > { %v4792_v35 = vpop.f32.mrf.mxu3 }
 0x227   : > { %1092 = vmatmul.f32.gmra.mxu2 %v481_v30  ;;  %770 = vmatmul.f32.gmra.mxu0 %v481_v30 }
 0x228   : > { %2668 = vperm.xlu1 %3673, %v4673_v22   ;;  %v4761_v22 = vadd.f32 %v1233_v24, %v1072_v63  ;;  %v1491_v63 = vmul.f32 %v4723_v32, %v4723_v32  ;;  %v1744_v24 = vmul.f32 0.0051020407, %v4586_v14  ;;  %v4805_v31 = vpop.eup %3689 }
 0x229   : > { %1612 = vadd.xlane.f32.xlu2 %v1611_v15  ;;  %v482_v15 = vld [vmem:[%s4167_s14 + $0x208] sm:$0xff]  ;;  %v1987_v14 = vmul.f32 %v4805_v31, %v4778_v5  ;;  %vm1993_vm10 = vweird.f32 %v4805_v31  ;;  %v2508_v5 = vld [vmem:[%s4525_s13 + $0x30] sm:$0xff] }
 0x22a   : > { %3605 = vmatmul.msk.f32.gmra.mxu3 %vm513_vm0, %v482_v15  ;;  %3557 = vmatmul.msk.f32.gmra.mxu1 %vm513_vm0, %v482_v15  ;;  %vm1994_vm12 = vmor %vm1992_vm11, %vm1993_vm10 }
 0x22b   : > { %v1078_v15 = vpop.f32.mrf.mxu2 }
 0x22c   : > { %2683 = vperm.xlu0 %3672, %v2461_v50   ;;  %v4788_v50 = vpop.f32.mrf.mxu1 }
 0x22f   : > { %1095 = vmatmul.f32.gmra.mxu2 %v483_v9  ;;  %773 = vmatmul.f32.gmra.mxu0 %v483_v9  ;;  %v2893_v9 = vmul.f32 %v2664_v3, %v4335_v28 }
 0x232   : > { %3606 = vmatmul.msk.f32.gmra.mxu3 %vm513_vm0, %v484_v54  ;;  %3558 = vmatmul.msk.f32.gmra.mxu1 %vm513_vm0, %v484_v54 }
 0x234   : > { %3019 = vperm.xlu0 %3672, %v2605_v33   ;;  %v4796_v33 = vmul.f32 0.0051020407, %v4576_v7  ;;  %v1608_v7 = vadd.f32 %v1491_v63, %v1490_v23  ;;  %v1988_v63 = vmul.f32 %v4805_v31, %v1987_v14 }
 0x23d   : > { %v1367_v38 = vpop.xlane.xlu0 %1366 }
 0x23e   : > { %v4775_v36 = vmul.f32 0.0051020407, %v1367_v38  ;;  %v1792_v38 = vmul.f32 %v4796_v33, %v4796_v33 }
 0x23f   : > { %v4809_v10 = vpop.xlane.xlu1 %1600 }
 0x240   : > { %v1803_v1 = vmul.f32 %v4775_v36, %v4775_v36  ;;  %5980 = vst [vmem:[#allocation43_spill] sm:$0xff] %v4809_v10  ;;  %v1840_v62 = vsub.f32 %v1744_v24, %v1792_v38  ;;  %v2892_v24 = vmul.f32 %v2664_v3, %v4332_v25  ;;  %v2427_v3 = vld [vmem:[%s4519_s11 + $0xa8] sm:$0xff] }
 0x241   : > { %3009 = vperm.xlu2 %3674, %v2603_v56   ;;  %v4813_v56 = vmul.f32 0.0051020407, %v4605_v43 }
 0x242   : > { %v1888_v23 = vadd.f32 0.001, %v1840_v62  ;;  %v1989_v62 = vmul.f32 0.5, %v1988_v63 }
 0x243   : > { %v1790_v43 = vmul.f32 %v4813_v56, %v4813_v56 }
 0x244   : > { %vm2032_vm14 = vweird.f32 %v1888_v23 }
 0x245   : > { %v1607_v61 = vpop.xlane.xlu0 %1606 }
 0x246   : > { %v1755_v12 = vmul.f32 0.0051020407, %v1607_v61  ;;  %v917_v61 = vpop.f32.mrf.mxu1 }
 0x248   : > { %v1851_v53 = vsub.f32 %v1755_v12, %v1803_v1  ;;  %v756_v1 = vpop.f32.mrf.mxu0  ;;  %v1742_v12 = vmul.f32 0.0051020407, %v4618_v0 }
 0x24a   : > { %v1899_v46 = vadd.f32 0.001, %v1851_v53  ;;  %v1239_v53 = vpop.f32.mrf.mxu3  ;;  %v1838_v45 = vsub.f32 %v1742_v12, %v1790_v43 }
 0x24b   : > { %v4826_v0 = vadd.f32 %v1239_v53, %v1078_v15 }
 0x24c   : > { %3691 = vrsqrt.f32 %v1899_v46  ;;  %vm2142_vm7 = vweird.f32 %v1899_v46  ;;  %v1886_v28 = vadd.f32 0.001, %v1838_v45 }
 0x24d   : > { %5982 = vst [vmem:[#allocation45_spill] sm:$0xff] %v4826_v0  ;;  %3693 = vrsqrt.f32 %v1888_v23 }
 0x24e   : > { %3695 = vrsqrt.f32 %v1886_v28  ;;  %vm2012_vm2 = vweird.f32 %v1886_v28 }
 0x252   : > { %1609 = vadd.xlane.f32.xlu1 %v1608_v7  ;;  %v3692_v6 = vpop.eup %3691  ;;  %v4824_v7 = vadd.f32 %v917_v61, %v756_v1  ;;  %v1990_v1 = vsub.f32 1.5, %v1989_v62 }
 0x253   : > { %v2137_v30 = vmul.f32 %v3692_v6, %v1899_v46  ;;  %vm2143_vm8 = vweird.f32 %v3692_v6  ;;  %v3694_v12 = vpop.eup %3693  ;;  %v4846_v46 = vadd.f32 %v4788_v50, %v4786_v26  ;;  %v2412_v26 = vld [vmem:[%s4519_s11 + $0x30] sm:$0xff] }
 0x254   : > { %5981 = vst [vmem:[#allocation44_spill] sm:$0xff] %v4824_v7  ;;  %v1383_v25 = vadd.f32 %v4826_v0, %v4824_v7  ;;  %vm2144_vm9 = vmor %vm2142_vm7, %vm2143_vm8  ;;  %v3696_v53 = vpop.eup %3695  ;;  %vm2033_vm13 = vweird.f32 %v3694_v12 }
 0x255   : > { %v2138_v54 = vmul.f32 %v3692_v6, %v2137_v30  ;;  %v1500_v30 = vmul.f32 %v4824_v7, %v4824_v7  ;;  %5983 = vst [vmem:[#allocation46_spill] sm:$0xff] %v4846_v46  ;;  %v2007_v50 = vmul.f32 %v3696_v53, %v1886_v28  ;;  %vm2034_vm15 = vmor %vm2032_vm14, %vm2033_vm13  ;;  %vm2013_vm1 = vweird.f32 %v3696_v53 }
 0x256   : > { %vm2014_vm3 = vmor %vm2012_vm2, %vm2013_vm1 }
 0x257   : > { %v3000_v38 = vpop.permute.xlu1 %2999  ;;  %v2139_v13 = vmul.f32 0.5, %v2138_v54 }
 0x258   : > { %v3228_v32 = vadd.f32 %v3000_v38, %v2892_v24  ;;  %v3229_v29 = vadd.f32 %v3000_v38, %v2893_v9 }
 0x259   : > { %v2140_v10 = vsub.f32 1.5, %v2139_v13  ;;  %v1501_v13 = vmul.f32 %v4826_v0, %v4826_v0 }
 0x25a   : > { %3324 = vst [vmem:[%s4666_s23 + $0x30] sm:$0xff] %v3228_v32 }
 0x25b   : > { %3325 = vst [vmem:[%s4666_s23 + $0x38] sm:$0xff] %v3229_v29  ;;  %v2141_v14 = vmul.f32 %v3692_v6, %v2140_v10  ;;  %v2027_v29 = vmul.f32 %v3694_v12, %v1888_v23  ;;  %v4850_v10 = vadd.f32 %v4792_v35, %v4790_v27  ;;  %v1623_v15 = vadd.f32 %v1501_v13, %v1500_v30  ;;  %v2414_v13 = vld [vmem:[%s4519_s11 + $0x40] sm:$0xff]  ;;  %v1242_v23 = vpop.f32.mrf.mxu3 }
 0x25c   : > { %v2008_v35 = vmul.f32 %v3696_v53, %v2007_v50 }
 0x25d   : > { %v2145_v61 = vsel %vm2144_vm9, %v3692_v6, %v2141_v14  ;;  %5984 = vst [vmem:[#allocation47_spill] sm:$0xff] %v4850_v10  ;;  %v1991_v6 = vmul.f32 %v4805_v31, %v1990_v1  ;;  %v2028_v43 = vmul.f32 %v3694_v12, %v2027_v29 }
 0x25e   : > { %1384 = vadd.xlane.f32.xlu0 %v1383_v25  ;;  %v4837_v32 = vmul.f32 %v2427_v3, %v2145_v61  ;;  %v2009_v38 = vmul.f32 0.5, %v2008_v35  ;;  %v2416_v3 = vld [vmem:[%s4519_s11 + $0x50] sm:$0xff] }
 0x25f   : > { %v1995_v63 = vsel %vm1994_vm12, %v4805_v31, %v1991_v6  ;;  %v2029_v27 = vmul.f32 0.5, %v2028_v43  ;;  %v2512_v6 = vld [vmem:[%s4525_s13 + $0x50] sm:$0xff]  ;;  %v920_v43 = vpop.f32.mrf.mxu1 }
 0x260   : > { %v4842_v45 = vmul.f32 %v4837_v32, %v4775_v36  ;;  %v1380_v36 = vadd.f32 %v4850_v10, %v4846_v46  ;;  %v2460_v24 = vmul.f32 %v2412_v26, %v1995_v63  ;;  %v2010_v31 = vsub.f32 1.5, %v2009_v38 }
 0x261   : > { %v2030_v54 = vsub.f32 1.5, %v2029_v27  ;;  %v4878_v27 = vmul.f32 0.0051020407, %v4565_v57  ;;  %v485_v57 = vld [vmem:[%s4167_s14 + $0x220] sm:$0xff] }
 0x262   : > { %v2556_v9 = vmul.f32 %v2460_v24, %v4764_v58  ;;  %v2011_v61 = vmul.f32 %v3696_v53, %v2010_v31  ;;  %v3005_v58 = vpop.permute.xlu0 %3004  ;;  %1098 = vmatmul.f32.gmra.mxu2 %v485_v57  ;;  %776 = vmatmul.f32.gmra.mxu0 %v485_v57 }
 0x263   : > { %v2031_v25 = vmul.f32 %v3694_v12, %v2030_v54 }
 0x264   : > { %v2604_v62 = vsub.f32 %v2508_v5, %v2556_v9  ;;  %v2015_v30 = vsel %vm2014_vm3, %v3696_v53, %v2011_v61  ;;  %v1743_v5 = vmul.f32 0.0051020407, %v4574_v41  ;;  %v486_v61 = vld [vmem:[%s4167_s14 + $0x228] sm:$0xff] }
 0x265   : > { %v2035_v14 = vsel %vm2034_vm15, %v3694_v12, %v2031_v25  ;;  %v4864_v63 = vmul.f32 %v2414_v13, %v2015_v30  ;;  %3607 = vmatmul.msk.f32.gmra.mxu3 %vm513_vm0, %v486_v61  ;;  %3559 = vmatmul.msk.f32.gmra.mxu1 %vm513_vm0, %v486_v61 }
 0x266   : > { %1624 = vadd.xlane.f32.xlu0 %v1623_v15  ;;  %v2464_v1 = vmul.f32 %v2416_v3, %v2035_v14  ;;  %v759_v15 = vpop.f32.mrf.mxu0  ;;  %v1791_v14 = vmul.f32 %v4878_v27, %v4878_v27 }
 0x267   : > { %v4866_v12 = vadd.f32 %v920_v43, %v759_v15  ;;  %v923_v38 = vpop.f32.mrf.mxu1  ;;  %v487_v15 = vld [vmem:[%s4167_s14 + $0x230] sm:$0xff]  ;;  %v488_v43 = vld [vmem:[%s4167_s14 + $0x238] sm:$0xff] }
 0x268   : > { %v2560_v29 = vmul.f32 %v2464_v1, %v4796_v33  ;;  %v4873_v33 = vpop.xlane.xlu2 %1372  ;;  %v1839_v41 = vsub.f32 %v1743_v5, %v1791_v14  ;;  %v1497_v14 = vmul.f32 %v4761_v22, %v4761_v22 }
 0x26a   : > { %1381 = vadd.xlane.f32.xlu2 %v1380_v36  ;;  %v1081_v36 = vpop.f32.mrf.mxu2  ;;  %v2608_v50 = vsub.f32 %v2512_v6, %v2560_v29  ;;  %v1245_v31 = vpop.f32.mrf.mxu3  ;;  %v4896_v6 = vadd.f32 0.001, %v1839_v41  ;;  %1101 = vmatmul.f32.gmra.mxu2 %v487_v15 }
 0x26b   : > { %2678 = vperm.xlu1 %3673, %v2460_v24   ;;  %v4868_v26 = vadd.f32 %v1242_v23, %v1081_v36  ;;  %v4901_v36 = vmul.f32 0.0051020407, %v4603_v34  ;;  %779 = vmatmul.f32.gmra.mxu0 %v487_v15 }
 0x26c   : > { %vm2022_vm8 = vweird.f32 %v4896_v6 }
 0x26d   : > { %3608 = vmatmul.msk.f32.gmra.mxu3 %vm513_vm0, %v488_v43  ;;  %3560 = vmatmul.msk.f32.gmra.mxu1 %vm513_vm0, %v488_v43  ;;  %v1795_v5 = vmul.f32 %v4901_v36, %v4901_v36 }
 0x26e   : > { %v762_v54 = vpop.f32.mrf.mxu0 }
 0x26f   : > { %v4883_v3 = vadd.f32 %v923_v38, %v762_v54 }
 0x270   : > { %v2674_v29 = vpop.permute.xlu2 %2673 }
 0x271   : > { %5985 = vst [vmem:[#allocation48_spill] sm:$0xff] %v4883_v3 }
 0x272   : > { %v1084_v25 = vpop.f32.mrf.mxu2  ;;  %v1248_v43 = vpop.f32.mrf.mxu3 }
 0x273   : > { %3014 = vperm.xlu1 %3673, %v2604_v62  }
 0x276   : > { %v765_v61 = vpop.f32.mrf.mxu0 }
 0x27a   : > { %2698 = vperm.xlu0 %3672, %v2464_v1   ;;  %v4885_v1 = vadd.f32 %v1245_v31, %v1084_v25  ;;  %v490_v25 = vld [vmem:[%s4167_s14 + $0x248] sm:$0xff]  ;;  %v1496_v31 = vmul.f32 %v4759_v51, %v4759_v51  ;;  %v1087_v15 = vpop.f32.mrf.mxu2 }
 0x27b   : > { %3609 = vmatmul.msk.f32.gmra.mxu3 %vm513_vm0, %v490_v25  ;;  %3561 = vmatmul.msk.f32.gmra.mxu1 %vm513_vm0, %v490_v25 }
 0x27c   : > { %5986 = vst [vmem:[#allocation49_spill] sm:$0xff] %v4885_v1 }
 0x282   : > { %2688 = vperm.xlu2 %3674, %v4864_v63   ;;  %3034 = vperm.xlu0 %3672, %v2608_v50   ;;  %v4892_v13 = vpop.xlane.xlu1 %1369 }
 0x283   : > { %v1376_v28 = vpop.xlane.xlu0 %1375 }
 0x284   : > { %v4871_v53 = vmul.f32 0.0051020407, %v1376_v28  ;;  %v1747_v28 = vmul.f32 0.0051020407, %v4616_v42  ;;  %v489_v42 = vld [vmem:[%s4167_s14 + $0x240] sm:$0xff] }
 0x285   : > { %1104 = vmatmul.f32.gmra.mxu2 %v489_v42  ;;  %782 = vmatmul.f32.gmra.mxu0 %v489_v42 }
 0x286   : > { %v1806_v24 = vmul.f32 %v4871_v53, %v4871_v53 }
 0x28b   : > { %v1616_v35 = vpop.xlane.xlu0 %1615 }
 0x28c   : > { %v1758_v9 = vmul.f32 0.0051020407, %v1616_v35  ;;  %v1377_v35 = vadd.f32 %v4761_v22, %v4759_v51 }
 0x28e   : > { %v1854_v62 = vsub.f32 %v1758_v9, %v1806_v24 }
 0x290   : > { %v4889_v30 = vadd.f32 0.001, %v1854_v62 }
 0x292   : > { %3697 = vrsqrt.f32 %v4889_v30  ;;  %vm2172_vm4 = vweird.f32 %v4889_v30 }
 0x293   : > { %3699 = vrsqrt.f32 %v4896_v6 }
 0x298   : > { %v4906_v50 = vpop.eup %3697 }
 0x299   : > { %v2167_v62 = vmul.f32 %v4906_v50, %v4889_v30  ;;  %v4926_v57 = vpop.eup %3699  ;;  %vm2173_vm5 = vweird.f32 %v4906_v50  ;;  %v2430_v30 = vld [vmem:[%s4519_s11 + $0xc0] sm:$0xff] }
 0x29a   : > { %v2669_v23 = vpop.permute.xlu1 %2668  ;;  %vm2174_vm6 = vmor %vm2172_vm4, %vm2173_vm5  ;;  %vm2023_vm7 = vweird.f32 %v4926_v57 }
 0x29b   : > { %v2894_v24 = vmul.f32 %v2669_v23, %v4346_v37  ;;  %v2895_v34 = vmul.f32 %v2669_v23, %v4348_v39  ;;  %v1843_v37 = vsub.f32 %v1747_v28, %v1795_v5  ;;  %v2168_v41 = vmul.f32 %v4906_v50, %v2167_v62  ;;  %vm2024_vm9 = vmor %vm2022_vm8, %vm2023_vm7 }
 0x29c   : > { %v4913_v9 = vpop.xlane.xlu2 %1612  ;;  %v2896_v28 = vmul.f32 %v2674_v29, %v4357_v47 }
 0x29d   : > { %v3230_v54 = vadd.f32 %v3005_v58, %v2894_v24  ;;  %v3231_v38 = vadd.f32 %v3005_v58, %v2895_v34  ;;  %1378 = vadd.xlane.f32.xlu1 %v1377_v35  ;;  %v926_v58 = vpop.f32.mrf.mxu1  ;;  %v4932_v23 = vadd.f32 0.001, %v1843_v37  ;;  %v2897_v24 = vmul.f32 %v2674_v29, %v4359_v49 }
 0x29e   : > { %v2684_v39 = vpop.permute.xlu0 %2683  ;;  %v1617_v34 = vadd.f32 %v1497_v14, %v1496_v31  ;;  %v2017_v35 = vmul.f32 %v4926_v57, %v4896_v6  ;;  %v4942_v47 = vadd.f32 %v926_v58, %v765_v61  ;;  %v4944_v49 = vadd.f32 %v1248_v43, %v1087_v15 }
 0x29f   : > { %3326 = vst [vmem:[%s4666_s23 + $0x40] sm:$0xff] %v3230_v54  ;;  %v1498_v54 = vmul.f32 %v4846_v46, %v4846_v46  ;;  %v2169_v29 = vmul.f32 0.5, %v2168_v41  ;;  %v2900_v25 = vmul.f32 %v2684_v39, %v4373_v4  ;;  %v2901_v37 = vmul.f32 %v2684_v39, %v4379_v8 }
 0x2a0   : > { %3327 = vst [vmem:[%s4666_s23 + $0x48] sm:$0xff] %v3231_v38  ;;  %v1499_v38 = vmul.f32 %v4850_v10, %v4850_v10  ;;  %3701 = vrsqrt.f32 %v4932_v23  ;;  %v1392_v61 = vadd.f32 %v4944_v49, %v4942_v47  ;;  %v1506_v39 = vmul.f32 %v4942_v47, %v4942_v47  ;;  %v505_v10 = vld [vmem:[%s4167_s14 + $0x2c0] sm:$0xff] }
 0x2a1   : > { %5987 = vst [vmem:[#allocation50_spill] sm:$0xff] %v4942_v47  ;;  %v2170_v58 = vsub.f32 1.5, %v2169_v29  ;;  %v1507_v41 = vmul.f32 %v4944_v49, %v4944_v49  ;;  %v4983_v6 = vmul.f32 0.0051020407, %v4892_v13  ;;  %vm2062_vm11 = vweird.f32 %v4932_v23  ;;  %v1251_v13 = vpop.f32.mrf.mxu3 }
 0x2a2   : > { %5988 = vst [vmem:[#allocation51_spill] sm:$0xff] %v4944_v49 }
 0x2a3   : > { %v2171_v15 = vmul.f32 %v4906_v50, %v2170_v58  ;;  %v2511_v58 = vld [vmem:[%s4525_s13 + $0x48] sm:$0xff] }
 0x2a4   : > { %v3010_v5 = vpop.permute.xlu2 %3009 }
 0x2a5   : > { %v3232_v62 = vadd.f32 %v3010_v5, %v2896_v28  ;;  %v3233_v42 = vadd.f32 %v3010_v5, %v2897_v24  ;;  %1618 = vadd.xlane.f32.xlu1 %v1617_v34  ;;  %v2018_v24 = vmul.f32 %v4926_v57, %v2017_v35  ;;  %v1620_v34 = vadd.f32 %v1499_v38, %v1498_v54 }
 0x2a6   : > { %v3020_v31 = vpop.permute.xlu0 %3019  ;;  %v3702_v4 = vpop.eup %3701  ;;  %v2175_v35 = vsel %vm2174_vm6, %v4906_v50, %v2171_v15  ;;  %v1632_v5 = vadd.f32 %v1507_v41, %v1506_v39  ;;  %v2419_v39 = vld [vmem:[%s4519_s11 + $0x68] sm:$0xff] }
 0x2a7   : > { %3328 = vst [vmem:[%s4666_s23 + $0x50] sm:$0xff] %v3232_v62  ;;  %v3236_v14 = vadd.f32 %v3020_v31, %v2900_v25  ;;  %v3237_v28 = vadd.f32 %v3020_v31, %v2901_v37  ;;  %v2019_v8 = vmul.f32 0.5, %v2018_v24  ;;  %v2057_v43 = vmul.f32 %v3702_v4, %v4932_v23  ;;  %v2415_v37 = vld [vmem:[%s4519_s11 + $0x48] sm:$0xff]  ;;  %v929_v15 = vpop.f32.mrf.mxu1 }
 0x2a8   : > { %3329 = vst [vmem:[%s4666_s23 + $0x58] sm:$0xff] %v3233_v42  ;;  %v4966_v38 = vmul.f32 %v2430_v30, %v2175_v35  ;;  %vm2063_vm10 = vweird.f32 %v3702_v4  ;;  %v768_v30 = vpop.f32.mrf.mxu0 }
 0x2a9   : > { %3332 = vst [vmem:[%s4666_s23 + $0x70] sm:$0xff] %v3236_v14  ;;  %v2020_v54 = vsub.f32 1.5, %v2019_v8  ;;  %v2058_v42 = vmul.f32 %v3702_v4, %v2057_v43  ;;  %vm2064_vm12 = vmor %vm2062_vm11, %vm2063_vm10  ;;  %v1090_v43 = vpop.f32.mrf.mxu2 }
 0x2aa   : > { %3333 = vst [vmem:[%s4666_s23 + $0x78] sm:$0xff] %v3237_v28  ;;  %v4970_v62 = vmul.f32 %v4966_v38, %v4871_v53  ;;  %v2558_v53 = vmul.f32 %v4864_v63, %v4813_v56  ;;  %v2510_v28 = vld [vmem:[%s4525_s13 + $0x40] sm:$0xff]  ;;  %v1804_v63 = vmul.f32 %v4983_v6, %v4983_v6 }
 0x2ab   : > { %1621 = vadd.xlane.f32.xlu2 %v1620_v34  ;;  %v2021_v29 = vmul.f32 %v4926_v57, %v2020_v54  ;;  %v2059_v50 = vmul.f32 0.5, %v2058_v42  ;;  %v4991_v54 = vadd.f32 %v1251_v13, %v1090_v43  ;;  %v4993_v42 = vadd.f32 %v929_v15, %v768_v30  ;;  %v491_v15 = vld [vmem:[%s4167_s14 + $0x250] sm:$0xff]  ;;  %v492_v43 = vld [vmem:[%s4167_s14 + $0x258] sm:$0xff] }
 0x2ac   : > { %1393 = vadd.xlane.f32.xlu0 %v1392_v61  ;;  %v2606_v61 = vsub.f32 %v2510_v28, %v2558_v53  ;;  %1107 = vmatmul.f32.gmra.mxu2 %v491_v15 }
 0x2ad   : > { %v2025_v25 = vsel %vm2024_vm9, %v4926_v57, %v2021_v29  ;;  %v2060_v14 = vsub.f32 1.5, %v2059_v50  ;;  %3610 = vmatmul.msk.f32.gmra.mxu3 %vm513_vm0, %v492_v43  ;;  %785 = vmatmul.f32.gmra.mxu0 %v491_v15 }
 0x2ae   : > { %v2463_v31 = vmul.f32 %v2415_v37, %v2025_v25  ;;  %3562 = vmatmul.msk.f32.gmra.mxu1 %vm513_vm0, %v492_v43 }
 0x2af   : > { %v2061_v34 = vmul.f32 %v3702_v4, %v2060_v14  ;;  %v932_v50 = vpop.f32.mrf.mxu1 }
 0x2b0   : > { %v2559_v24 = vmul.f32 %v2463_v31, %v4878_v27  ;;  %v771_v37 = vpop.f32.mrf.mxu0 }
 0x2b1   : > { %v2065_v8 = vsel %vm2064_vm12, %v3702_v4, %v2061_v34  ;;  %v2515_v4 = vld [vmem:[%s4525_s13 + $0x68] sm:$0xff]  ;;  %v1093_v25 = vpop.f32.mrf.mxu2  ;;  %v4995_v14 = vadd.f32 %v932_v50, %v771_v37  ;;  %v5000_v34 = vmul.f32 0.0051020407, %v4633_v52 }
 0x2b2   : > { %v2607_v57 = vsub.f32 %v2511_v58, %v2559_v24  ;;  %v2467_v41 = vmul.f32 %v2419_v39, %v2065_v8 }
 0x2b3   : > { %5989 = vst [vmem:[#allocation52_spill] sm:$0xff] %v4995_v14  ;;  %v1793_v39 = vmul.f32 %v5000_v34, %v5000_v34 }
 0x2b4   : > { %1633 = vadd.xlane.f32.xlu0 %v1632_v5  ;;  %v2563_v5 = vmul.f32 %v2467_v41, %v4901_v36 }
 0x2b6   : > { %v2611_v29 = vsub.f32 %v2515_v4, %v2563_v5 }
 0x2be   : > { %2693 = vperm.xlu1 %3673, %v2463_v31   ;;  %v1254_v31 = vpop.f32.mrf.mxu3 }
 0x2bf   : > { %v4997_v53 = vadd.f32 %v1254_v31, %v1093_v25  ;;  %v1746_v25 = vmul.f32 0.0051020407, %v4601_v17 }
 0x2c1   : > { %5990 = vst [vmem:[#allocation53_spill] sm:$0xff] %v4997_v53 }
 0x2c3   : > { %3024 = vperm.xlu2 %3674, %v2606_v61  }
 0x2c5   : > { %v1610_v56 = vpop.xlane.xlu1 %1609 }
 0x2c6   : > { %v1756_v27 = vmul.f32 0.0051020407, %v1610_v56  ;;  %3029 = vperm.xlu1 %3673, %v2607_v57   ;;  %v1745_v57 = vmul.f32 0.0051020407, %v4649_v59 }
 0x2c8   : > { %v1852_v35 = vsub.f32 %v1756_v27, %v1804_v63  ;;  %2713 = vperm.xlu0 %3672, %v2467_v41   ;;  %v1841_v27 = vsub.f32 %v1745_v57, %v1793_v39  ;;  %v1389_v57 = vadd.f32 %v4885_v1, %v4883_v3  ;;  %v495_v39 = vld [vmem:[%s4167_s14 + $0x270] sm:$0xff] }
 0x2ca   : > { %v1900_v23 = vadd.f32 0.001, %v1852_v35  ;;  %v2428_v35 = vld [vmem:[%s4519_s11 + $0xb0] sm:$0xff]  ;;  %v5020_v5 = vadd.f32 0.001, %v1841_v27 }
 0x2cc   : > { %3703 = vrsqrt.f32 %v1900_v23  ;;  %vm2152_vm14 = vweird.f32 %v1900_v23  ;;  %vm2042_vm2 = vweird.f32 %v5020_v5 }
 0x2cd   : > { %3705 = vrsqrt.f32 %v5020_v5 }
 0x2d0   : > { %3049 = vperm.xlu0 %3672, %v2611_v29  }
 0x2d1   : > { %v1385_v36 = vpop.xlane.xlu0 %1384 }
 0x2d2   : > { %v3704_v28 = vpop.eup %3703  ;;  %v5002_v58 = vmul.f32 0.0051020407, %v1385_v36  ;;  %v493_v36 = vld [vmem:[%s4167_s14 + $0x260] sm:$0xff] }
 0x2d3   : > { %v2147_v24 = vmul.f32 %v3704_v28, %v1900_v23  ;;  %vm2153_vm13 = vweird.f32 %v3704_v28  ;;  %v5025_v23 = vmul.f32 0.0051020407, %v4584_v48  ;;  %1110 = vmatmul.f32.gmra.mxu2 %v493_v36  ;;  %788 = vmatmul.f32.gmra.mxu0 %v493_v36  ;;  %v1503_v36 = vmul.f32 %v4868_v26, %v4868_v26 }
 0x2d4   : > { %v5009_v63 = vmul.f32 %v5002_v58, %v5002_v58  ;;  %vm2154_vm15 = vmor %vm2152_vm14, %vm2153_vm13 }
 0x2d5   : > { %v2148_v61 = vmul.f32 %v3704_v28, %v2147_v24  ;;  %v1794_v48 = vmul.f32 %v5025_v23, %v5025_v23 }
 0x2d7   : > { %v2149_v8 = vmul.f32 0.5, %v2148_v61  ;;  %v1842_v17 = vsub.f32 %v1746_v25, %v1794_v48  ;;  %v1257_v25 = vpop.f32.mrf.mxu3 }
 0x2d9   : > { %v2150_v56 = vsub.f32 1.5, %v2149_v8  ;;  %v1625_v41 = vpop.xlane.xlu0 %1624  ;;  %v1750_v8 = vmul.f32 0.0051020407, %v4643_v18 }
 0x2da   : > { %v5011_v52 = vmul.f32 0.0051020407, %v1625_v41  ;;  %v1890_v41 = vadd.f32 0.001, %v1842_v17 }
 0x2db   : > { %v2151_v59 = vmul.f32 %v3704_v28, %v2150_v56  ;;  %v496_v56 = vld [vmem:[%s4167_s14 + $0x278] sm:$0xff]  ;;  %1113 = vmatmul.f32.gmra.mxu2 %v495_v39  ;;  %791 = vmatmul.f32.gmra.mxu0 %v495_v39 }
 0x2dc   : > { %v1857_v30 = vsub.f32 %v5011_v52, %v5009_v63  ;;  %3707 = vrsqrt.f32 %v1890_v41  ;;  %vm2052_vm5 = vweird.f32 %v1890_v41 }
 0x2dd   : > { %v2679_v13 = vpop.permute.xlu1 %2678  ;;  %v2155_v4 = vsel %vm2154_vm15, %v3704_v28, %v2151_v59  ;;  %v494_v28 = vld [vmem:[%s4167_s14 + $0x268] sm:$0xff]  ;;  %v1386_v59 = vadd.f32 %v4868_v26, %v4866_v12 }
 0x2de   : > { %v5022_v29 = vmul.f32 %v2428_v35, %v2155_v4  ;;  %v2898_v37 = vmul.f32 %v2679_v13, %v4363_v55  ;;  %v2899_v31 = vmul.f32 %v2679_v13, %v4369_v60  ;;  %3611 = vmatmul.msk.f32.gmra.mxu3 %vm513_vm0, %v494_v28  ;;  %v5041_v55 = vmul.f32 0.0051020407, %v4627_v2  ;;  %3563 = vmatmul.msk.f32.gmra.mxu1 %vm513_vm0, %v494_v28  ;;  %v3706_v60 = vpop.eup %3705  ;;  %v935_v35 = vpop.f32.mrf.mxu1 }
 0x2df   : > { %v2037_v27 = vmul.f32 %v3706_v60, %v5020_v5  ;;  %v1096_v13 = vpop.f32.mrf.mxu2  ;;  %v774_v4 = vpop.f32.mrf.mxu0  ;;  %vm2043_vm1 = vweird.f32 %v3706_v60 }
 0x2e0   : > { %v5029_v50 = vmul.f32 %v5022_v29, %v4983_v6  ;;  %v1798_v15 = vmul.f32 %v5041_v55, %v5041_v55  ;;  %v5062_v48 = vadd.f32 %v935_v35, %v774_v4  ;;  %vm2044_vm3 = vmor %vm2042_vm2, %vm2043_vm1 }
 0x2e1   : > { %v2038_v18 = vmul.f32 %v3706_v60, %v2037_v27 }
 0x2e2   : > { %v1846_v2 = vsub.f32 %v1750_v8, %v1798_v15  ;;  %5991 = vst [vmem:[#allocation54_spill] sm:$0xff] %v5062_v48  ;;  %v3708_v17 = vpop.eup %3707 }
 0x2e3   : > { %v2039_v28 = vmul.f32 0.5, %v2038_v18  ;;  %vm2053_vm4 = vweird.f32 %v3708_v17 }
 0x2e4   : > { %vm2054_vm6 = vmor %vm2052_vm5, %vm2053_vm4 }
 0x2e5   : > { %v3015_v24 = vpop.permute.xlu1 %3014  ;;  %v2040_v15 = vsub.f32 1.5, %v2039_v28 }
 0x2e6   : > { %v3234_v6 = vadd.f32 %v3015_v24, %v2898_v37  ;;  %v3235_v61 = vadd.f32 %v3015_v24, %v2899_v31  ;;  %3612 = vmatmul.msk.f32.gmra.mxu3 %vm513_vm0, %v496_v56  ;;  %3564 = vmatmul.msk.f32.gmra.mxu1 %vm513_vm0, %v496_v56  ;;  %v1894_v37 = vadd.f32 0.001, %v1846_v2  ;;  %v1502_v31 = vmul.f32 %v4866_v12, %v4866_v12 }
 0x2e7   : > { %v5064_v24 = vadd.f32 %v1257_v25, %v1096_v13  ;;  %v2047_v2 = vmul.f32 %v3708_v17, %v1890_v41  ;;  %v2417_v25 = vld [vmem:[%s4519_s11 + $0x58] sm:$0xff] }
 0x2e8   : > { %3330 = vst [vmem:[%s4666_s23 + $0x60] sm:$0xff] %v3234_v6  ;;  %3709 = vrsqrt.f32 %v1894_v37  ;;  %v1626_v56 = vadd.f32 %v1503_v36, %v1502_v31  ;;  %vm2092_vm8 = vweird.f32 %v1894_v37 }
 0x2e9   : > { %3331 = vst [vmem:[%s4666_s23 + $0x68] sm:$0xff] %v3235_v61  ;;  %v1401_v27 = vadd.f32 %v5064_v24, %v5062_v48  ;;  %v2048_v18 = vmul.f32 %v3708_v17, %v2047_v2 }
 0x2ea   : > { %5992 = vst [vmem:[#allocation55_spill] sm:$0xff] %v5064_v24 }
 0x2eb   : > { %v2049_v31 = vmul.f32 0.5, %v2048_v18 }
 0x2ec   : > { %1390 = vadd.xlane.f32.xlu2 %v1389_v57  ;;  %v2699_v43 = vpop.permute.xlu0 %2698 }
 0x2ed   : > { %v2906_v6 = vmul.f32 %v2699_v43, %v4403_v40  ;;  %v2907_v61 = vmul.f32 %v2699_v43, %v4409_v44  ;;  %v1512_v40 = vmul.f32 %v5062_v48, %v5062_v48  ;;  %v1513_v44 = vmul.f32 %v5064_v24, %v5064_v24 }
 0x2ee   : > { %v2041_v43 = vmul.f32 %v3706_v60, %v2040_v15 }
 0x2ef   : > { %v1641_v13 = vadd.f32 %v1513_v44, %v1512_v40  ;;  %v2422_v40 = vld [vmem:[%s4519_s11 + $0x80] sm:$0xff]  ;;  %v5088_v44 = vadd.f32 0.001, %v1857_v30 }
 0x2f0   : > { %1387 = vadd.xlane.f32.xlu1 %v1386_v59  ;;  %v3710_v59 = vpop.eup %3709  ;;  %v2045_v4 = vsel %vm2044_vm3, %v3706_v60, %v2041_v43 }
 0x2f1   : > { %v2087_v35 = vmul.f32 %v3710_v59, %v1894_v37  ;;  %v5078_v28 = vmul.f32 %v2417_v25, %v2045_v4  ;;  %vm2093_vm7 = vweird.f32 %v3710_v59  ;;  %v938_v4 = vpop.f32.mrf.mxu1  ;;  %v1099_v37 = vpop.f32.mrf.mxu2  ;;  %3711 = vrsqrt.f32 %v5088_v44 }
 0x2f2   : > { %vm2094_vm9 = vmor %vm2092_vm8, %vm2093_vm7  ;;  %v1260_v25 = vpop.f32.mrf.mxu3  ;;  %vm2202_vm12 = vweird.f32 %v5088_v44 }
 0x2f3   : > { %v2088_v36 = vmul.f32 %v3710_v59, %v2087_v35 }
 0x2f4   : > { %v3035_v57 = vpop.permute.xlu0 %3034 }
 0x2f5   : > { %v3242_v8 = vadd.f32 %v3035_v57, %v2906_v6  ;;  %v3243_v39 = vadd.f32 %v3035_v57, %v2907_v61  ;;  %v2050_v6 = vsub.f32 1.5, %v2049_v31  ;;  %v2089_v61 = vmul.f32 0.5, %v2088_v36 }
 0x2f7   : > { %3338 = vst [vmem:[%s4666_s23 + $0xa0] sm:$0xff] %v3242_v8  ;;  %v2051_v57 = vmul.f32 %v3708_v17, %v2050_v6  ;;  %v5081_v8 = vpop.xlane.xlu2 %1381  ;;  %v2090_v5 = vsub.f32 1.5, %v2089_v61  ;;  %v5099_v6 = vpop.eup %3711 }
 0x2f8   : > { %1627 = vadd.xlane.f32.xlu1 %v1626_v56  ;;  %3339 = vst [vmem:[%s4666_s23 + $0xa8] sm:$0xff] %v3243_v39  ;;  %v2418_v39 = vld [vmem:[%s4519_s11 + $0x60] sm:$0xff]  ;;  %vm2203_vm14 = vweird.f32 %v5099_v6 }
 0x2f9   : > { %5993 = vst [vmem:[#allocation56_spill] sm:$0xff] %v5081_v8  ;;  %v2055_v60 = vsel %vm2054_vm6, %v3708_v17, %v2051_v57  ;;  %v2091_v56 = vmul.f32 %v3710_v59, %v2090_v5  ;;  %v2514_v17 = vld [vmem:[%s4525_s13 + $0x60] sm:$0xff]  ;;  %vm2204_vm15 = vmor %vm2202_vm12, %vm2203_vm14 }
 0x2fa   : > { %1402 = vadd.xlane.f32.xlu0 %v1401_v27  ;;  %v2466_v27 = vmul.f32 %v2418_v39, %v2055_v60  ;;  %v941_v60 = vpop.f32.mrf.mxu1 }
 0x2fb   : > { %v2095_v2 = vsel %vm2094_vm9, %v3710_v59, %v2091_v56 }
 0x2fc   : > { %v2562_v41 = vmul.f32 %v2466_v27, %v5025_v23  ;;  %v2470_v35 = vmul.f32 %v2422_v40, %v2095_v2  ;;  %v2518_v23 = vld [vmem:[%s4525_s13 + $0x80] sm:$0xff]  ;;  %v1102_v2 = vpop.f32.mrf.mxu2  ;;  %v2197_v40 = vmul.f32 %v5099_v6, %v5088_v44  ;;  %v5151_v44 = vmul.f32 0.0051020407, %v4612_v21 }
 0x2fe   : > { %v2610_v59 = vsub.f32 %v2514_v17, %v2562_v41  ;;  %v2566_v30 = vmul.f32 %v2470_v35, %v5041_v55  ;;  %v1263_v55 = vpop.f32.mrf.mxu3 }
 0x2ff   : > { %v2689_v43 = vpop.permute.xlu2 %2688  ;;  %v5111_v17 = vadd.f32 %v1263_v55, %v1102_v2  ;;  %v497_v55 = vld [vmem:[%s4167_s14 + $0x280] sm:$0xff] }
 0x300   : > { %v2614_v57 = vsub.f32 %v2518_v23, %v2566_v30  ;;  %1116 = vmatmul.f32.gmra.mxu2 %v497_v55  ;;  %794 = vmatmul.f32.gmra.mxu0 %v497_v55 }
 0x302   : > { %1642 = vadd.xlane.f32.xlu0 %v1641_v13  ;;  %v777_v13 = vpop.f32.mrf.mxu0 }
 0x303   : > { %v5103_v56 = vadd.f32 %v938_v4, %v777_v13  ;;  %v2198_v13 = vmul.f32 %v5099_v6, %v2197_v40  ;;  %v498_v40 = vld [vmem:[%s4167_s14 + $0x288] sm:$0xff] }
 0x304   : > { %2703 = vperm.xlu2 %3674, %v5078_v28   ;;  %3613 = vmatmul.msk.f32.gmra.mxu3 %vm513_vm0, %v498_v40 }
 0x305   : > { %3565 = vmatmul.msk.f32.gmra.mxu1 %vm513_vm0, %v498_v40  ;;  %v5998_v40 = vld [vmem:[#allocation6_spill] sm:$0xff] }
 0x30a   : > { %v780_v5 = vpop.f32.mrf.mxu0 }
 0x310   : > { %v1379_v15 = vpop.xlane.xlu1 %1378 }
 0x311   : > { %2708 = vperm.xlu1 %3673, %v2466_v27   ;;  %v5092_v18 = vmul.f32 0.0051020407, %v1379_v15  ;;  %v5105_v27 = vadd.f32 %v1260_v25, %v1099_v37  ;;  %v5107_v15 = vadd.f32 %v941_v60, %v780_v5  ;;  %v2902_v37 = vmul.f32 %v2689_v43, %v4383_v16 }
 0x312   : > { %v2903_v25 = vmul.f32 %v2689_v43, %v4389_v20 }
 0x313   : > { %v1807_v63 = vmul.f32 %v5092_v18, %v5092_v18  ;;  %5995 = vst [vmem:[#allocation58_spill] sm:$0xff] %v5107_v15 }
 0x316   : > { %2728 = vperm.xlu0 %3672, %v2470_v35  }
 0x318   : > { %v1619_v31 = vpop.xlane.xlu1 %1618 }
 0x319   : > { %v1759_v52 = vmul.f32 0.0051020407, %v1619_v31  ;;  %3044 = vperm.xlu1 %3673, %v2610_v59  }
 0x31b   : > { %v1855_v36 = vsub.f32 %v1759_v52, %v1807_v63  ;;  %v1504_v63 = vmul.f32 %v4883_v3, %v4883_v3  ;;  %v504_v3 = vld [vmem:[%s4167_s14 + $0x2b8] sm:$0xff] }
 0x31d   : > { %v1903_v61 = vadd.f32 0.001, %v1855_v36  ;;  %v1505_v36 = vmul.f32 %v4885_v1, %v4885_v1 }
 0x31e   : > { %v5101_v39 = vpop.xlane.xlu2 %1621  ;;  %3064 = vperm.xlu0 %3672, %v2614_v57   ;;  %v2199_v57 = vmul.f32 0.5, %v2198_v13 }
 0x31f   : > { %5994 = vst [vmem:[#allocation57_spill] sm:$0xff] %v5101_v39  ;;  %3713 = vrsqrt.f32 %v1903_v61  ;;  %v1394_v41 = vpop.xlane.xlu0 %1393  ;;  %v1629_v60 = vadd.f32 %v1505_v36, %v1504_v63  ;;  %vm2182_vm11 = vweird.f32 %v1903_v61 }
 0x320   : > { %v5113_v35 = vmul.f32 0.0051020407, %v1394_v41  ;;  %v2200_v41 = vsub.f32 1.5, %v2199_v57  ;;  %v2433_v57 = vld [vmem:[%s4519_s11 + $0xd8] sm:$0xff] }
 0x322   : > { %v5122_v23 = vmul.f32 %v5113_v35, %v5113_v35  ;;  %v2201_v63 = vmul.f32 %v5099_v6, %v2200_v41 }
 0x325   : > { %v3714_v4 = vpop.eup %3713 }
 0x326   : > { %v2177_v59 = vmul.f32 %v3714_v4, %v1903_v61  ;;  %v3025_v31 = vpop.permute.xlu2 %3024  ;;  %vm2183_vm10 = vweird.f32 %v3714_v4 }
 0x327   : > { %v3238_v52 = vadd.f32 %v3025_v31, %v2902_v37  ;;  %v3239_v30 = vadd.f32 %v3025_v31, %v2903_v25  ;;  %v1634_v5 = vpop.xlane.xlu0 %1633  ;;  %v2431_v25 = vld [vmem:[%s4519_s11 + $0xc8] sm:$0xff]  ;;  %vm2184_vm13 = vmor %vm2182_vm11, %vm2183_vm10 }
 0x328   : > { %v2178_v16 = vmul.f32 %v3714_v4, %v2177_v59  ;;  %v5127_v20 = vmul.f32 0.0051020407, %v1634_v5  ;;  %v5157_v5 = vmul.f32 0.0051020407, %v4729_v19  ;;  %v1797_v19 = vmul.f32 %v5151_v44, %v5151_v44 }
 0x329   : > { %3334 = vst [vmem:[%s4666_s23 + $0x80] sm:$0xff] %v3238_v52  ;;  %v499_v52 = vld [vmem:[%s4167_s14 + $0x290] sm:$0xff] }
 0x32a   : > { %v2179_v43 = vmul.f32 0.5, %v2178_v16  ;;  %3335 = vst [vmem:[%s4666_s23 + $0x88] sm:$0xff] %v3239_v30  ;;  %v500_v30 = vld [vmem:[%s4167_s14 + $0x298] sm:$0xff]  ;;  %v2205_v16 = vsel %vm2204_vm15, %v5099_v6, %v2201_v63  ;;  %1119 = vmatmul.f32.gmra.mxu2 %v499_v52  ;;  %797 = vmatmul.f32.gmra.mxu0 %v499_v52  ;;  %v5996_v6 = vld [vmem:[#allocation43_spill] sm:$0xff]  ;;  %v502_v63 = vld [vmem:[%s4167_s14 + $0x2a8] sm:$0xff] }
 0x32b   : > { %3614 = vmatmul.msk.f32.gmra.mxu3 %vm513_vm0, %v500_v30  ;;  %3566 = vmatmul.msk.f32.gmra.mxu1 %vm513_vm0, %v500_v30 }
 0x32c   : > { %v2180_v37 = vsub.f32 1.5, %v2179_v43  ;;  %v1753_v43 = vmul.f32 0.0051020407, %v5996_v6  ;;  %v1105_v6 = vpop.f32.mrf.mxu2 }
 0x32d   : > { %1630 = vadd.xlane.f32.xlu2 %v1629_v60  ;;  %v5997_v60 = vld [vmem:[#allocation5_spill] sm:$0xff] }
 0x32e   : > { %v2181_v13 = vmul.f32 %v3714_v4, %v2180_v37 }
 0x330   : > { %v2694_v59 = vpop.permute.xlu1 %2693  ;;  %v2185_v31 = vsel %vm2184_vm13, %v3714_v4, %v2181_v13  ;;  %v5154_v4 = vmul.f32 %v2433_v57, %v2205_v16  ;;  %v783_v57 = vpop.f32.mrf.mxu0 }
 0x331   : > { %v5142_v36 = vmul.f32 %v2431_v25, %v2185_v31  ;;  %v2904_v55 = vmul.f32 %v2694_v59, %v5997_v60  ;;  %v2905_v41 = vmul.f32 %v2694_v59, %v5998_v40  ;;  %v501_v31 = vld [vmem:[%s4167_s14 + $0x2a0] sm:$0xff]  ;;  %v944_v59 = vpop.f32.mrf.mxu1  ;;  %v1266_v60 = vpop.f32.mrf.mxu3  ;;  %v2513_v40 = vld [vmem:[%s4525_s13 + $0x58] sm:$0xff] }
 0x332   : > { %v5163_v21 = vmul.f32 %v5154_v4, %v5002_v58  ;;  %1122 = vmatmul.f32.gmra.mxu2 %v501_v31  ;;  %800 = vmatmul.f32.gmra.mxu0 %v501_v31 }
 0x333   : > { %v5147_v61 = vmul.f32 %v5142_v36, %v5092_v18  ;;  %v1749_v18 = vmul.f32 0.0051020407, %v4625_v11  ;;  %v1801_v11 = vmul.f32 %v5157_v5, %v5157_v5  ;;  %3615 = vmatmul.msk.f32.gmra.mxu3 %vm513_vm0, %v502_v63  ;;  %3567 = vmatmul.msk.f32.gmra.mxu1 %vm513_vm0, %v502_v63 }
 0x335   : > { %v1845_v52 = vsub.f32 %v1749_v18, %v1797_v19  ;;  %v1849_v58 = vsub.f32 %v1753_v43, %v1801_v11  ;;  %v1395_v18 = vadd.f32 %v4991_v54, %v4993_v42  ;;  %v2561_v43 = vmul.f32 %v5078_v28, %v5000_v34 }
 0x336   : > { %v5185_v19 = vadd.f32 %v944_v59, %v783_v57  ;;  %v1509_v34 = vmul.f32 %v4991_v54, %v4991_v54 }
 0x337   : > { %v1893_v16 = vadd.f32 0.001, %v1845_v52  ;;  %v2609_v63 = vsub.f32 %v2513_v40, %v2561_v43  ;;  %v1508_v52 = vmul.f32 %v4993_v42, %v4993_v42 }
 0x338   : > { %v3030_v37 = vpop.permute.xlu1 %3029  ;;  %6000 = vst [vmem:[#allocation5_spill] sm:$0xff] %v5185_v19 }
 0x339   : > { %v3240_v13 = vadd.f32 %v3030_v37, %v2904_v55  ;;  %v3241_v25 = vadd.f32 %v3030_v37, %v2905_v41  ;;  %v1897_v55 = vadd.f32 0.001, %v1849_v58  ;;  %v5183_v41 = vadd.f32 %v1266_v60, %v1105_v6  ;;  %v6001_v37 = vld [vmem:[#allocation11_spill] sm:$0xff] }
 0x33a   : > { %v2714_v30 = vpop.permute.xlu0 %2713  ;;  %3715 = vrsqrt.f32 %v1893_v16  ;;  %v1635_v57 = vadd.f32 %v1509_v34, %v1508_v52  ;;  %v1518_v60 = vmul.f32 %v5185_v19, %v5185_v19  ;;  %vm2082_vm3 = vweird.f32 %v1893_v16 }
 0x33b   : > { %3336 = vst [vmem:[%s4666_s23 + $0x90] sm:$0xff] %v3240_v13  ;;  %v2912_v11 = vmul.f32 %v2714_v30, %v6001_v37  ;;  %v6002_v13 = vld [vmem:[#allocation12_spill] sm:$0xff]  ;;  %3717 = vrsqrt.f32 %v1897_v55  ;;  %v1410_v59 = vadd.f32 %v5183_v41, %v5185_v19  ;;  %vm2122_vm4 = vweird.f32 %v1897_v55  ;;  %3616 = vmatmul.msk.f32.gmra.mxu3 %vm513_vm0, %v504_v3  ;;  %3568 = vmatmul.msk.f32.gmra.mxu1 %vm513_vm0, %v504_v3  ;;  %v506_v3 = vld [vmem:[%s4167_s14 + $0x2c8] sm:$0xff] }
 0x33c   : > { %3337 = vst [vmem:[%s4666_s23 + $0x98] sm:$0xff] %v3241_v25  ;;  %v2913_v25 = vmul.f32 %v2714_v30, %v6002_v13 }
 0x33d   : > { %5999 = vst [vmem:[#allocation43_spill] sm:$0xff] %v5183_v41 }
 0x340   : > { %v3716_v30 = vpop.eup %3715 }
 0x341   : > { %v3718_v6 = vpop.eup %3717  ;;  %v2077_v43 = vmul.f32 %v3716_v30, %v1893_v16  ;;  %vm2083_vm1 = vweird.f32 %v3716_v30  ;;  %v1108_v16 = vpop.f32.mrf.mxu2 }
 0x342   : > { %v3050_v31 = vpop.permute.xlu0 %3049  ;;  %v2117_v40 = vmul.f32 %v3718_v6, %v1897_v55  ;;  %vm2123_vm2 = vweird.f32 %v3718_v6  ;;  %vm2084_vm5 = vmor %vm2082_vm3, %vm2083_vm1  ;;  %v1269_v55 = vpop.f32.mrf.mxu3 }
 0x343   : > { %1396 = vadd.xlane.f32.xlu1 %v1395_v18  ;;  %v3248_v28 = vadd.f32 %v3050_v31, %v2912_v11  ;;  %v3249_v58 = vadd.f32 %v3050_v31, %v2913_v25  ;;  %v1519_v18 = vmul.f32 %v5183_v41, %v5183_v41  ;;  %v2078_v11 = vmul.f32 %v3716_v30, %v2077_v43  ;;  %vm2124_vm6 = vmor %vm2122_vm4, %vm2123_vm2 }
 0x344   : > { %v2118_v13 = vmul.f32 %v3718_v6, %v2117_v40  ;;  %v2421_v40 = vld [vmem:[%s4519_s11 + $0x78] sm:$0xff]  ;;  %3617 = vmatmul.msk.f32.gmra.mxu3 %vm513_vm0, %v506_v3  ;;  %3569 = vmatmul.msk.f32.gmra.mxu1 %vm513_vm0, %v506_v3  ;;  %v507_v3 = vld [vmem:[%s4167_s14 + $0x2d0] sm:$0xff] }
 0x345   : > { %3039 = vperm.xlu2 %3674, %v2609_v63   ;;  %3344 = vst [vmem:[%s4666_s23 + $0xd0] sm:$0xff] %v3248_v28  ;;  %v1650_v37 = vadd.f32 %v1519_v18, %v1518_v60  ;;  %v2079_v25 = vmul.f32 0.5, %v2078_v11  ;;  %v6003_v63 = vld [vmem:[#allocation30_spill] sm:$0xff]  ;;  %v6004_v28 = vld [vmem:[#allocation33_spill] sm:$0xff] }
 0x346   : > { %3345 = vst [vmem:[%s4666_s23 + $0xd8] sm:$0xff] %v3249_v58  ;;  %v2119_v31 = vmul.f32 0.5, %v2118_v13  ;;  %v5202_v52 = vmul.f32 0.0051020407, %v6003_v63  ;;  %v1748_v58 = vmul.f32 0.0051020407, %v6004_v28 }
 0x347   : > { %v2080_v34 = vsub.f32 1.5, %v2079_v25  ;;  %v2425_v13 = vld [vmem:[%s4519_s11 + $0x98] sm:$0xff] }
 0x348   : > { %1411 = vadd.xlane.f32.xlu0 %v1410_v59  ;;  %v2120_v59 = vsub.f32 1.5, %v2119_v31  ;;  %v1796_v2 = vmul.f32 %v5202_v52, %v5202_v52  ;;  %v2517_v28 = vld [vmem:[%s4525_s13 + $0x78] sm:$0xff] }
 0x34a   : > { %v1844_v60 = vsub.f32 %v1748_v58, %v1796_v2  ;;  %v2121_v18 = vmul.f32 %v3718_v6, %v2120_v59  ;;  %v947_v2 = vpop.f32.mrf.mxu1 }
 0x34b   : > { %1636 = vadd.xlane.f32.xlu1 %v1635_v57  ;;  %v2081_v57 = vmul.f32 %v3716_v30, %v2080_v34  ;;  %v786_v34 = vpop.f32.mrf.mxu0 }
 0x34c   : > { %v2125_v11 = vsel %vm2124_vm6, %v3718_v6, %v2121_v18  ;;  %v2521_v6 = vld [vmem:[%s4525_s13 + $0x98] sm:$0xff]  ;;  %v1398_v18 = vadd.f32 %v4997_v53, %v4995_v14  ;;  %v5222_v1 = vadd.f32 %v947_v2, %v786_v34 }
 0x34d   : > { %v2085_v43 = vsel %vm2084_vm5, %v3716_v30, %v2081_v57  ;;  %v2473_v63 = vmul.f32 %v2425_v13, %v2125_v11 }
 0x34e   : > { %v2469_v25 = vmul.f32 %v2421_v40, %v2085_v43  ;;  %6005 = vst [vmem:[#allocation6_spill] sm:$0xff] %v5222_v1 }
 0x34f   : > { %v2569_v58 = vmul.f32 %v2473_v63, %v5157_v5 }
 0x350   : > { %1651 = vadd.xlane.f32.xlu0 %v1650_v37  ;;  %v5208_v37 = vadd.f32 0.001, %v1844_v60  ;;  %v2565_v30 = vmul.f32 %v2469_v25, %v5151_v44  ;;  %v5224_v44 = vadd.f32 %v1269_v55, %v1108_v16 }
 0x351   : > { %v2617_v40 = vsub.f32 %v2521_v6, %v2569_v58 }
 0x352   : > { %3719 = vrsqrt.f32 %v5208_v37  ;;  %v2613_v60 = vsub.f32 %v2517_v28, %v2565_v30  ;;  %6006 = vst [vmem:[#allocation11_spill] sm:$0xff] %v5224_v44  ;;  %vm2072_vm9 = vweird.f32 %v5208_v37 }
 0x353   : > { %v789_v5 = vpop.f32.mrf.mxu0 }
 0x356   : > { %v1111_v30 = vpop.f32.mrf.mxu2 }
 0x358   : > { %v3720_v57 = vpop.eup %3719 }
 0x359   : > { %vm2073_vm7 = vweird.f32 %v3720_v57 }
 0x35a   : > { %vm2074_vm10 = vmor %vm2072_vm9, %vm2073_vm7 }
 0x35e   : > { %v1114_v19 = vpop.f32.mrf.mxu2 }
 0x361   : > { %v1272_v28 = vpop.f32.mrf.mxu3 }
 0x363   : > { %v1388_v31 = vpop.xlane.xlu1 %1387 }
 0x364   : > { %2723 = vperm.xlu1 %3673, %v2469_v25   ;;  %2743 = vperm.xlu0 %3672, %v2473_v63   ;;  %v5215_v59 = vmul.f32 0.0051020407, %v1388_v31  ;;  %v950_v25 = vpop.f32.mrf.mxu1  ;;  %v2067_v31 = vmul.f32 %v3720_v57, %v5208_v37 }
 0x365   : > { %v5227_v63 = vadd.f32 %v950_v25, %v789_v5  ;;  %v503_v25 = vld [vmem:[%s4167_s14 + $0x2b0] sm:$0xff] }
 0x366   : > { %v1810_v11 = vmul.f32 %v5215_v59, %v5215_v59  ;;  %v2068_v2 = vmul.f32 %v3720_v57, %v2067_v31  ;;  %1125 = vmatmul.f32.gmra.mxu2 %v503_v25  ;;  %803 = vmatmul.f32.gmra.mxu0 %v503_v25 }
 0x368   : > { %v2069_v55 = vmul.f32 0.5, %v2068_v2 }
 0x369   : > { %v1275_v24 = vpop.f32.mrf.mxu3 }
 0x36a   : > { %v2070_v31 = vsub.f32 1.5, %v2069_v55  ;;  %v2434_v55 = vld [vmem:[%s4519_s11 + $0xe0] sm:$0xff] }
 0x36b   : > { %v1628_v43 = vpop.xlane.xlu1 %1627 }
 0x36c   : > { %v1762_v13 = vmul.f32 0.0051020407, %v1628_v43  ;;  %3059 = vperm.xlu1 %3673, %v2613_v60   ;;  %3079 = vperm.xlu0 %3672, %v2617_v40   ;;  %v5229_v43 = vadd.f32 %v1272_v28, %v1111_v30 }
 0x36d   : > { %v1403_v6 = vpop.xlane.xlu0 %1402 }
 0x36e   : > { %v1858_v58 = vsub.f32 %v1762_v13, %v1810_v11  ;;  %1399 = vadd.xlane.f32.xlu2 %v1398_v18  ;;  %v5231_v16 = vmul.f32 0.0051020407, %v1403_v6  ;;  %v2420_v13 = vld [vmem:[%s4519_s11 + $0x70] sm:$0xff]  ;;  %1128 = vmatmul.f32.gmra.mxu2 %v505_v10 }
 0x36f   : > { %806 = vmatmul.f32.gmra.mxu0 %v505_v10 }
 0x370   : > { %v1906_v34 = vadd.f32 0.001, %v1858_v58  ;;  %v5235_v60 = vmul.f32 %v5231_v16, %v5231_v16  ;;  %v2071_v58 = vmul.f32 %v3720_v57, %v2070_v31 }
 0x372   : > { %3721 = vrsqrt.f32 %v1906_v34  ;;  %vm2212_vm11 = vweird.f32 %v1906_v34 }
 0x375   : > { %v1643_v40 = vpop.xlane.xlu0 %1642 }
 0x376   : > { %v5237_v5 = vmul.f32 0.0051020407, %v1643_v40  ;;  %v2075_v40 = vsel %vm2074_vm10, %v3720_v57, %v2071_v58  ;;  %v6007_v57 = vld [vmem:[#allocation29_spill] sm:$0xff]  ;;  %1131 = vmatmul.f32.gmra.mxu2 %v507_v3 }
 0x377   : > { %809 = vmatmul.f32.gmra.mxu0 %v507_v3  ;;  %v1404_v3 = vadd.f32 %v5105_v27, %v5103_v56 }
 0x378   : > { %v3722_v11 = vpop.eup %3721 }
 0x379   : > { %v2207_v18 = vmul.f32 %v3722_v11, %v1906_v34  ;;  %vm2213_vm8 = vweird.f32 %v3722_v11  ;;  %v5258_v34 = vmul.f32 0.0051020407, %v6007_v57  ;;  %v508_v57 = vld [vmem:[%s4167_s14 + $0x2d8] sm:$0xff] }
 0x37a   : > { %vm2214_vm12 = vmor %vm2212_vm11, %vm2213_vm8  ;;  %3618 = vmatmul.msk.f32.gmra.mxu3 %vm513_vm0, %v508_v57  ;;  %3570 = vmatmul.msk.f32.gmra.mxu1 %vm513_vm0, %v508_v57  ;;  %v6016_v57 = vsub.f32 %v5127_v20, %v5122_v23 }
 0x37b   : > { %v2208_v30 = vmul.f32 %v3722_v11, %v2207_v18  ;;  %v5250_v18 = vmul.f32 %v2420_v13, %v2075_v40  ;;  %v6008_v13 = vld [vmem:[#allocation41_spill] sm:$0xff] }
 0x37c   : > { %v1752_v31 = vmul.f32 0.0051020407, %v6008_v13 }
 0x37d   : > { %v2209_v28 = vmul.f32 0.5, %v2208_v30 }
 0x37f   : > { %v2210_v6 = vsub.f32 1.5, %v2209_v28  ;;  %v6009_v28 = vld [vmem:[#allocation9_spill] sm:$0xff] }
 0x381   : > { %v2211_v2 = vmul.f32 %v3722_v11, %v2210_v6  ;;  %v6010_v6 = vld [vmem:[#allocation10_spill] sm:$0xff] }
 0x383   : > { %v2709_v25 = vpop.permute.xlu1 %2708  ;;  %v2215_v46 = vsel %vm2214_vm12, %v3722_v11, %v2211_v2  ;;  %v792_v2 = vpop.f32.mrf.mxu0 }
 0x384   : > { %v5254_v37 = vmul.f32 %v2434_v55, %v2215_v46  ;;  %v2910_v58 = vmul.f32 %v2709_v25, %v6009_v28  ;;  %v2911_v10 = vmul.f32 %v2709_v25, %v6010_v6  ;;  %v1800_v46 = vmul.f32 %v5258_v34, %v5258_v34  ;;  %v953_v55 = vpop.f32.mrf.mxu1  ;;  %v5273_v25 = vpop.xlane.xlu2 %1390 }
 0x385   : > { %6011 = vst [vmem:[#allocation12_spill] sm:$0xff] %v5273_v25  ;;  %v5277_v28 = vadd.f32 %v953_v55, %v792_v2  ;;  %v5279_v6 = vadd.f32 %v1275_v24, %v1114_v19  ;;  %v1514_v24 = vmul.f32 %v5103_v56, %v5103_v56 }
 0x386   : > { %2718 = vperm.xlu2 %3674, %v5250_v18   ;;  %v5262_v11 = vmul.f32 %v5254_v37, %v5215_v59  ;;  %v1848_v13 = vsub.f32 %v1752_v31, %v1800_v46 }
 0x387   : > { %6012 = vst [vmem:[#allocation30_spill] sm:$0xff] %v5277_v28  ;;  %v1419_v2 = vadd.f32 %v5279_v6, %v5277_v28  ;;  %v1525_v23 = vmul.f32 %v5279_v6, %v5279_v6 }
 0x388   : > { %v2729_v30 = vpop.permute.xlu0 %2728  ;;  %6013 = vst [vmem:[#allocation33_spill] sm:$0xff] %v5279_v6  ;;  %v1896_v49 = vadd.f32 0.001, %v1848_v13 }
 0x38a   : > { %3723 = vrsqrt.f32 %v1896_v49  ;;  %vm2112_vm1 = vweird.f32 %v1896_v49 }
 0x38b   : > { %v3045_v40 = vpop.permute.xlu1 %3044 }
 0x38c   : > { %v3246_v41 = vadd.f32 %v3045_v40, %v2910_v58  ;;  %v3247_v59 = vadd.f32 %v3045_v40, %v2911_v10  ;;  %v6014_v58 = vld [vmem:[#allocation17_spill] sm:$0xff]  ;;  %v6015_v40 = vld [vmem:[#allocation18_spill] sm:$0xff]  ;;  %v2704_v20 = vpop.permute.xlu2 %2703 }
 0x38d   : > { %v2918_v10 = vmul.f32 %v2729_v30, %v6014_v58  ;;  %v2919_v48 = vmul.f32 %v2729_v30, %v6015_v40 }
 0x38e   : > { %3342 = vst [vmem:[%s4666_s23 + $0xc0] sm:$0xff] %v3246_v41  ;;  %v1908_v41 = vadd.f32 0.001, %v6016_v57 }
 0x38f   : > { %3343 = vst [vmem:[%s4666_s23 + $0xc8] sm:$0xff] %v3247_v59 }
 0x390   : > { %v3065_v47 = vpop.permute.xlu0 %3064  ;;  %3725 = vrsqrt.f32 %v1908_v41  ;;  %v3724_v30 = vpop.eup %3723  ;;  %vm2232_vm14 = vweird.f32 %v1908_v41 }
 0x391   : > { %v3254_v31 = vadd.f32 %v3065_v47, %v2918_v10  ;;  %v3255_v46 = vadd.f32 %v3065_v47, %v2919_v48  ;;  %v1515_v47 = vmul.f32 %v5105_v27, %v5105_v27  ;;  %v1524_v48 = vmul.f32 %v5277_v28, %v5277_v28 }
 0x392   : > { %v2107_v13 = vmul.f32 %v3724_v30, %v1896_v49  ;;  %vm2113_vm13 = vweird.f32 %v3724_v30 }
 0x393   : > { %3350 = vst [vmem:[%s4666_s23 + $0x100] sm:$0xff] %v3254_v31  ;;  %v1644_v19 = vadd.f32 %v1515_v47, %v1514_v24  ;;  %v1659_v55 = vadd.f32 %v1525_v23, %v1524_v48  ;;  %v1510_v23 = vmul.f32 %v4995_v14, %v4995_v14  ;;  %vm2114_vm2 = vmor %vm2112_vm1, %vm2113_vm13  ;;  %v6028_v14 = vld [vmem:[#allocation26_spill] sm:$0xff] }
 0x394   : > { %3351 = vst [vmem:[%s4666_s23 + $0x108] sm:$0xff] %v3255_v46  ;;  %v2108_v40 = vmul.f32 %v3724_v30, %v2107_v13 }
 0x396   : > { %1405 = vadd.xlane.f32.xlu1 %v1404_v3  ;;  %1420 = vadd.xlane.f32.xlu0 %v1419_v2  ;;  %v3726_v59 = vpop.eup %3725  ;;  %v2109_v46 = vmul.f32 0.5, %v2108_v40  ;;  %v6018_v3 = vld [vmem:[#allocation7_spill] sm:$0xff]  ;;  %v6019_v2 = vld [vmem:[#allocation8_spill] sm:$0xff]  ;;  %v795_v40 = vpop.f32.mrf.mxu0 }
 0x397   : > { %v2227_v58 = vmul.f32 %v3726_v59, %v1908_v41  ;;  %v2908_v57 = vmul.f32 %v2704_v20, %v6018_v3  ;;  %v2909_v25 = vmul.f32 %v2704_v20, %v6019_v2  ;;  %vm2233_vm15 = vweird.f32 %v3726_v59  ;;  %v2436_v41 = vld [vmem:[%s4519_s11 + $0xf0] sm:$0xff] }
 0x398   : > { %vm2234_vm3 = vmor %vm2232_vm14, %vm2233_vm15 }
 0x399   : > { %v2228_v31 = vmul.f32 %v3726_v59, %v2227_v58 }
 0x39b   : > { %v2229_v6 = vmul.f32 0.5, %v2228_v31  ;;  %v956_v31 = vpop.f32.mrf.mxu1 }
 0x39d   : > { %v2230_v13 = vsub.f32 1.5, %v2229_v6  ;;  %v1278_v6 = vpop.f32.mrf.mxu3 }
 0x39e   : > { %1645 = vadd.xlane.f32.xlu1 %v1644_v19  ;;  %1660 = vadd.xlane.f32.xlu0 %v1659_v55  ;;  %v1511_v19 = vmul.f32 %v4997_v53, %v4997_v53  ;;  %v2110_v55 = vsub.f32 1.5, %v2109_v46  ;;  %v2424_v46 = vld [vmem:[%s4519_s11 + $0x90] sm:$0xff] }
 0x3a0   : > { %v5300_v10 = vpop.xlane.xlu2 %1630  ;;  %v1638_v58 = vadd.f32 %v1511_v19, %v1510_v23  ;;  %v2111_v20 = vmul.f32 %v3724_v30, %v2110_v55 }
 0x3a1   : > { %6017 = vst [vmem:[#allocation29_spill] sm:$0xff] %v5300_v10  ;;  %v6029_v10 = vld [vmem:[#allocation25_spill] sm:$0xff] }
 0x3a2   : > { %v2115_v3 = vsel %vm2114_vm2, %v3724_v30, %v2111_v20 }
 0x3a8   : > { %v3040_v24 = vpop.permute.xlu2 %3039 }
 0x3a9   : > { %v3244_v47 = vadd.f32 %v3040_v24, %v2908_v57  ;;  %v3245_v48 = vadd.f32 %v3040_v24, %v2909_v25  ;;  %v2231_v25 = vmul.f32 %v3726_v59, %v2230_v13  ;;  %v1117_v57 = vpop.f32.mrf.mxu2  ;;  %v2472_v24 = vmul.f32 %v2424_v46, %v2115_v3  ;;  %v798_v13 = vpop.f32.mrf.mxu0 }
 0x3aa   : > { %v5325_v20 = vadd.f32 %v1278_v6, %v1117_v57  ;;  %v2516_v57 = vld [vmem:[%s4525_s13 + $0x70] sm:$0xff] }
 0x3ab   : > { %3340 = vst [vmem:[%s4666_s23 + $0xb0] sm:$0xff] %v3244_v47  ;;  %v2235_v2 = vsel %vm2234_vm3, %v3726_v59, %v2231_v25  ;;  %v2568_v55 = vmul.f32 %v2472_v24, %v5258_v34  ;;  %v5323_v59 = vadd.f32 %v956_v31, %v795_v40  ;;  %v2564_v31 = vmul.f32 %v5250_v18, %v5202_v52 }
 0x3ac   : > { %3341 = vst [vmem:[%s4666_s23 + $0xb8] sm:$0xff] %v3245_v48  ;;  %v5313_v47 = vmul.f32 %v2436_v41, %v2235_v2  ;;  %v2524_v48 = vld [vmem:[%s4525_s13 + $0xb0] sm:$0xff] }
 0x3ad   : > { %v2620_v30 = vsub.f32 %v2524_v48, %v5029_v50 }
 0x3ae   : > { %6020 = vst [vmem:[#allocation41_spill] sm:$0xff] %v5313_v47  ;;  %v5318_v23 = vmul.f32 %v5313_v47, %v5113_v35  ;;  %v1281_v46 = vpop.f32.mrf.mxu3 }
 0x3af   : > { %1639 = vadd.xlane.f32.xlu2 %v1638_v58  ;;  %v959_v58 = vpop.f32.mrf.mxu1 }
 0x3b0   : > { %6021 = vst [vmem:[#allocation9_spill] sm:$0xff] %v5318_v23  ;;  %v5327_v25 = vadd.f32 %v959_v58, %v798_v13  ;;  %v2612_v13 = vsub.f32 %v2516_v57, %v2564_v31  ;;  %v6022_v31 = vld [vmem:[#allocation34_spill] sm:$0xff] }
 0x3b1   : > { %v1120_v3 = vpop.f32.mrf.mxu2  ;;  %v5348_v57 = vmul.f32 0.0051020407, %v6022_v31 }
 0x3b2   : > { %2758 = vperm.xlu0 %3672, %v5022_v29   ;;  %v2520_v29 = vld [vmem:[%s4525_s13 + $0x90] sm:$0xff]  ;;  %v5329_v35 = vadd.f32 %v1281_v46, %v1120_v3 }
 0x3b3   : > { %v2616_v50 = vsub.f32 %v2520_v29, %v2568_v55 }
 0x3b6   : > { %v1397_v49 = vpop.xlane.xlu1 %1396 }
 0x3b7   : > { %2738 = vperm.xlu1 %3673, %v2472_v24   ;;  %v1717_v19 = vmul.f32 0.0051020407, %v1397_v49 }
 0x3b9   : > { %v1813_v41 = vmul.f32 %v1717_v19, %v1717_v19 }
 0x3ba   : > { %3094 = vperm.xlu0 %3672, %v2620_v30  }
 0x3bb   : > { %v1412_v2 = vpop.xlane.xlu0 %1411 }
 0x3bc   : > { %v5331_v24 = vmul.f32 0.0051020407, %v1412_v2 }
 0x3be   : > { %v1637_v49 = vpop.xlane.xlu1 %1636  ;;  %v5338_v48 = vmul.f32 %v5331_v24, %v5331_v24 }
 0x3bf   : > { %3074 = vperm.xlu1 %3673, %v2616_v50   ;;  %v1765_v34 = vmul.f32 0.0051020407, %v1637_v49 }
 0x3c1   : > { %v1861_v40 = vsub.f32 %v1765_v34, %v1813_v41  ;;  %v2437_v41 = vld [vmem:[%s4519_s11 + $0xf8] sm:$0xff] }
 0x3c3   : > { %v1909_v6 = vadd.f32 0.001, %v1861_v40  ;;  %v1652_v30 = vpop.xlane.xlu0 %1651 }
 0x3c4   : > { %v5340_v55 = vmul.f32 0.0051020407, %v1652_v30  ;;  %v801_v30 = vpop.f32.mrf.mxu0 }
 0x3c5   : > { %3727 = vrsqrt.f32 %v1909_v6  ;;  %vm2242_vm4 = vweird.f32 %v1909_v6 }
 0x3c7   : > { %3054 = vperm.xlu2 %3674, %v2612_v13   ;;  %v962_v13 = vpop.f32.mrf.mxu1 }
 0x3c8   : > { %v5358_v31 = vadd.f32 %v962_v13, %v801_v30 }
 0x3ca   : > { %6026 = vst [vmem:[#allocation10_spill] sm:$0xff] %v5358_v31 }
 0x3cb   : > { %v3728_v29 = vpop.eup %3727 }
 0x3cc   : > { %v2237_v3 = vmul.f32 %v3728_v29, %v1909_v6  ;;  %vm2243_vm5 = vweird.f32 %v3728_v29 }
 0x3cd   : > { %vm2244_vm6 = vmor %vm2242_vm4, %vm2243_vm5 }
 0x3ce   : > { %v2238_v46 = vmul.f32 %v3728_v29, %v2237_v3  ;;  %v6023_v3 = vld [vmem:[#allocation35_spill] sm:$0xff] }
 0x3cf   : > { %v1751_v6 = vmul.f32 0.0051020407, %v6023_v3 }
 0x3d0   : > { %v2239_v52 = vmul.f32 0.5, %v2238_v46  ;;  %v1123_v46 = vpop.f32.mrf.mxu2 }
 0x3d2   : > { %v2240_v18 = vsub.f32 1.5, %v2239_v52  ;;  %v1284_v52 = vpop.f32.mrf.mxu3 }
 0x3d3   : > { %v5360_v53 = vadd.f32 %v1284_v52, %v1123_v46 }
 0x3d4   : > { %v2241_v2 = vmul.f32 %v3728_v29, %v2240_v18  ;;  %v1799_v18 = vmul.f32 %v5348_v57, %v5348_v57 }
 0x3d5   : > { %6027 = vst [vmem:[#allocation17_spill] sm:$0xff] %v5360_v53 }
 0x3d6   : > { %v2724_v50 = vpop.permute.xlu1 %2723  ;;  %v2245_v49 = vsel %vm2244_vm6, %v3728_v29, %v2241_v2  ;;  %v2744_v34 = vpop.permute.xlu0 %2743  ;;  %v6024_v29 = vld [vmem:[#allocation15_spill] sm:$0xff] }
 0x3d7   : > { %v5345_v40 = vmul.f32 %v2437_v41, %v2245_v49  ;;  %v2916_v2 = vmul.f32 %v2724_v50, %v6024_v29  ;;  %v6025_v41 = vld [vmem:[#allocation16_spill] sm:$0xff]  ;;  %v2924_v3 = vmul.f32 %v2744_v34, %v6028_v14  ;;  %v2925_v28 = vmul.f32 %v2744_v34, %v6029_v10 }
 0x3d8   : > { %v2917_v49 = vmul.f32 %v2724_v50, %v6025_v41  ;;  %v1428_v50 = vadd.f32 %v5360_v53, %v5358_v31  ;;  %v1413_v14 = vadd.f32 %v5224_v44, %v5222_v1  ;;  %v1530_v10 = vmul.f32 %v5358_v31, %v5358_v31  ;;  %v2423_v41 = vld [vmem:[%s4519_s11 + $0x88] sm:$0xff] }
 0x3d9   : > { %v5351_v58 = vmul.f32 %v5345_v40, %v1717_v19  ;;  %v1847_v19 = vsub.f32 %v1751_v6, %v1799_v18 }
 0x3db   : > { %v1895_v30 = vadd.f32 0.001, %v1847_v19 }
 0x3dd   : > { %3729 = vrsqrt.f32 %v1895_v30  ;;  %vm2102_vm8 = vweird.f32 %v1895_v30 }
 0x3de   : > { %v3060_v39 = vpop.permute.xlu1 %3059  ;;  %v3080_v7 = vpop.permute.xlu0 %3079 }
 0x3df   : > { %v3252_v8 = vadd.f32 %v3060_v39, %v2916_v2  ;;  %v3253_v0 = vadd.f32 %v3060_v39, %v2917_v49  ;;  %v3260_v23 = vadd.f32 %v3080_v7, %v2924_v3  ;;  %v3261_v29 = vadd.f32 %v3080_v7, %v2925_v28  ;;  %v2527_v49 = vld [vmem:[%s4525_s13 + $0xc8] sm:$0xff] }
 0x3e0   : > { %v1531_v39 = vmul.f32 %v5360_v53, %v5360_v53  ;;  %v6037_v53 = vld [vmem:[#allocation14_spill] sm:$0xff] }
 0x3e1   : > { %3348 = vst [vmem:[%s4666_s23 + $0xf0] sm:$0xff] %v3252_v8  ;;  %v1520_v8 = vmul.f32 %v5222_v1, %v5222_v1 }
 0x3e2   : > { %3349 = vst [vmem:[%s4666_s23 + $0xf8] sm:$0xff] %v3253_v0  ;;  %v1668_v7 = vadd.f32 %v1531_v39, %v1530_v10  ;;  %v1521_v0 = vmul.f32 %v5224_v44, %v5224_v44  ;;  %v1287_v10 = vpop.f32.mrf.mxu3 }
 0x3e3   : > { %3356 = vst [vmem:[%s4666_s23 + $0x130] sm:$0xff] %v3260_v23  ;;  %v3730_v28 = vpop.eup %3729  ;;  %v1407_v23 = vadd.f32 %v5111_v17, %v5107_v15  ;;  %v804_v3 = vpop.f32.mrf.mxu0 }
 0x3e4   : > { %3357 = vst [vmem:[%s4666_s23 + $0x138] sm:$0xff] %v3261_v29  ;;  %1429 = vadd.xlane.f32.xlu0 %v1428_v50  ;;  %v1653_v34 = vadd.f32 %v1521_v0, %v1520_v8  ;;  %v2097_v13 = vmul.f32 %v3730_v28, %v1895_v30  ;;  %vm2103_vm7 = vweird.f32 %v3730_v28  ;;  %v965_v29 = vpop.f32.mrf.mxu1  ;;  %v2623_v50 = vsub.f32 %v2527_v49, %v5147_v61  ;;  %v2523_v30 = vld [vmem:[%s4525_s13 + $0xa8] sm:$0xff]  ;;  %v1400_v0 = vpop.xlane.xlu2 %1399 }
 0x3e5   : > { %vm2104_vm9 = vmor %vm2102_vm8, %vm2103_vm7  ;;  %v5389_v39 = vadd.f32 %v965_v29, %v804_v3 }
 0x3e6   : > { %v2098_v6 = vmul.f32 %v3730_v28, %v2097_v13  ;;  %v6033_v13 = vsub.f32 %v5237_v5, %v5235_v60 }
 0x3e8   : > { %v2099_v46 = vmul.f32 0.5, %v2098_v6  ;;  %v1911_v6 = vadd.f32 0.001, %v6033_v13 }
 0x3e9   : > { %1414 = vadd.xlane.f32.xlu1 %v1413_v14  ;;  %v1126_v14 = vpop.f32.mrf.mxu2 }
 0x3ea   : > { %v2100_v52 = vsub.f32 1.5, %v2099_v46  ;;  %3731 = vrsqrt.f32 %v1911_v6  ;;  %vm2262_vm10 = vweird.f32 %v1911_v6 }
 0x3ec   : > { %1669 = vadd.xlane.f32.xlu0 %v1668_v7  ;;  %v2101_v18 = vmul.f32 %v3730_v28, %v2100_v52  ;;  %v5391_v7 = vadd.f32 %v1287_v10, %v1126_v14  ;;  %v807_v52 = vpop.f32.mrf.mxu0  ;;  %v2719_v3 = vpop.permute.xlu2 %2718 }
 0x3ed   : > { %v2915_v31 = vmul.f32 %v2719_v3, %v6037_v53  ;;  %v6039_v53 = vld [vmem:[#allocation38_spill] sm:$0xff] }
 0x3ee   : > { %v2105_v2 = vsel %vm2104_vm9, %v3730_v28, %v2101_v18  ;;  %v2619_v28 = vsub.f32 %v2523_v30, %v4842_v45  ;;  %v968_v18 = vpop.f32.mrf.mxu1 }
 0x3ef   : > { %v5385_v19 = vmul.f32 %v2423_v41, %v2105_v2  ;;  %v1290_v2 = vpop.f32.mrf.mxu3  ;;  %v5411_v41 = vadd.f32 %v968_v18, %v807_v52 }
 0x3f0   : > { %1408 = vadd.xlane.f32.xlu2 %v1407_v23  ;;  %v5415_v29 = vpop.eup %3731 }
 0x3f1   : > { %1654 = vadd.xlane.f32.xlu1 %v1653_v34  ;;  %v1129_v45 = vpop.f32.mrf.mxu2  ;;  %6034 = vst [vmem:[#allocation34_spill] sm:$0xff] %v5411_v41  ;;  %v2257_v5 = vmul.f32 %v5415_v29, %v1911_v6  ;;  %vm2263_vm11 = vweird.f32 %v5415_v29  ;;  %v510_v6 = vld [vmem:[%s4167_s14 + $0x2e8] sm:$0xff] }
 0x3f2   : > { %v5413_v49 = vadd.f32 %v1290_v2, %v1129_v45  ;;  %v6036_v2 = vld [vmem:[#allocation13_spill] sm:$0xff]  ;;  %vm2264_vm12 = vmor %vm2262_vm10, %vm2263_vm11  ;;  %3619 = vmatmul.msk.f32.gmra.mxu3 %vm513_vm0, %v510_v6  ;;  %3571 = vmatmul.msk.f32.gmra.mxu1 %vm513_vm0, %v510_v6 }
 0x3f3   : > { %v2914_v46 = vmul.f32 %v2719_v3, %v6036_v2  ;;  %v6038_v2 = vld [vmem:[#allocation37_spill] sm:$0xff] }
 0x3f4   : > { %6035 = vst [vmem:[#allocation35_spill] sm:$0xff] %v5413_v49  ;;  %v810_v52 = vpop.f32.mrf.mxu0 }
 0x3f7   : > { %v971_v18 = vpop.f32.mrf.mxu1 }
 0x3f9   : > { %v1132_v45 = vpop.f32.mrf.mxu2 }
 0x400   : > { %2773 = vperm.xlu0 %3672, %v5142_v36  }
 0x408   : > { %2733 = vperm.xlu2 %3674, %v5385_v19   ;;  %3109 = vperm.xlu0 %3672, %v2623_v50   ;;  %v5417_v50 = vmul.f32 0.0051020407, %v1400_v0  ;;  %v1293_v0 = vpop.f32.mrf.mxu3 }
 0x409   : > { %v1421_v36 = vpop.xlane.xlu0 %1420  ;;  %v5433_v47 = vadd.f32 %v1293_v0, %v1132_v45 }
 0x40a   : > { %2753 = vperm.xlu1 %3673, %v4837_v32   ;;  %v5395_v8 = vmul.f32 0.0051020407, %v1421_v36  ;;  %v5407_v32 = vpop.xlane.xlu1 %1405  ;;  %v1814_v10 = vmul.f32 %v5417_v50, %v5417_v50 }
 0x40c   : > { %6030 = vst [vmem:[#allocation18_spill] sm:$0xff] %v5395_v8  ;;  %v5400_v61 = vmul.f32 %v5395_v8, %v5395_v8 }
 0x40e   : > { %6031 = vst [vmem:[#allocation7_spill] sm:$0xff] %v5400_v61 }
 0x411   : > { %v1661_v23 = vpop.xlane.xlu0 %1660 }
 0x412   : > { %3089 = vperm.xlu1 %3673, %v2619_v28   ;;  %v5402_v34 = vmul.f32 0.0051020407, %v1661_v23  ;;  %v5419_v60 = vpop.xlane.xlu1 %1645  ;;  %v2258_v23 = vmul.f32 %v5415_v29, %v2257_v5  ;;  %v1517_v5 = vmul.f32 %v5111_v17, %v5111_v17 }
 0x414   : > { %6032 = vst [vmem:[#allocation8_spill] sm:$0xff] %v5402_v34  ;;  %v2259_v41 = vmul.f32 0.5, %v2258_v23 }
 0x416   : > { %v2260_v1 = vsub.f32 1.5, %v2259_v41 }
 0x422   : > { %v1640_v14 = vpop.xlane.xlu2 %1639 }
 0x423   : > { %v1766_v36 = vmul.f32 0.0051020407, %v1640_v14  ;;  %v1516_v14 = vmul.f32 %v5107_v15, %v5107_v15 }
 0x424   : > { %v2759_v28 = vpop.permute.xlu0 %2758 }
 0x425   : > { %v1862_v30 = vsub.f32 %v1766_v36, %v1814_v10  ;;  %v2930_v44 = vmul.f32 %v2759_v28, %v6038_v2  ;;  %v2931_v3 = vmul.f32 %v2759_v28, %v6039_v53  ;;  %v6041_v28 = vld [vmem:[#allocation22_spill] sm:$0xff]  ;;  %v509_v53 = vld [vmem:[%s4167_s14 + $0x2e0] sm:$0xff] }
 0x426   : > { %1134 = vmatmul.f32.gmra.mxu2 %v509_v53  ;;  %812 = vmatmul.f32.gmra.mxu0 %v509_v53 }
 0x427   : > { %v1910_v13 = vadd.f32 0.001, %v1862_v30  ;;  %v5431_v30 = vadd.f32 %v971_v18, %v810_v52  ;;  %v6040_v52 = vld [vmem:[#allocation21_spill] sm:$0xff] }
 0x429   : > { %3733 = vrsqrt.f32 %v1910_v13  ;;  %v2739_v49 = vpop.permute.xlu1 %2738  ;;  %vm2252_vm14 = vweird.f32 %v1910_v13 }
 0x42a   : > { %v3055_v8 = vpop.permute.xlu2 %3054  ;;  %v2922_v18 = vmul.f32 %v2739_v49, %v6040_v52  ;;  %v2923_v45 = vmul.f32 %v2739_v49, %v6041_v28  ;;  %v1720_v28 = vmul.f32 0.0051020407, %v5407_v32  ;;  %v2530_v32 = vld [vmem:[%s4525_s13 + $0xe0] sm:$0xff] }
 0x42b   : > { %v3250_v10 = vadd.f32 %v3055_v8, %v2914_v46  ;;  %v3251_v36 = vadd.f32 %v3055_v8, %v2915_v31  ;;  %v1647_v46 = vadd.f32 %v1517_v5, %v1516_v14  ;;  %v1437_v31 = vadd.f32 %v5433_v47, %v5431_v30 }
 0x42c   : > { %v3095_v23 = vpop.permute.xlu0 %3094 }
 0x42d   : > { %3346 = vst [vmem:[%s4666_s23 + $0xe0] sm:$0xff] %v3250_v10  ;;  %v3266_v15 = vadd.f32 %v3095_v23, %v2930_v44  ;;  %v3267_v61 = vadd.f32 %v3095_v23, %v2931_v3  ;;  %v2261_v44 = vmul.f32 %v5415_v29, %v2260_v1  ;;  %v1536_v10 = vmul.f32 %v5431_v30, %v5431_v30 }
 0x42e   : > { %3347 = vst [vmem:[%s4666_s23 + $0xe8] sm:$0xff] %v3251_v36  ;;  %v2439_v36 = vld [vmem:[%s4519_s11 + $0x108] sm:$0xff] }
 0x42f   : > { %v3734_v34 = vpop.eup %3733  ;;  %3362 = vst [vmem:[%s4666_s23 + $0x160] sm:$0xff] %v3266_v15  ;;  %v1537_v15 = vmul.f32 %v5433_v47, %v5433_v47  ;;  %v2265_v1 = vsel %vm2264_vm12, %v5415_v29, %v2261_v44  ;;  %v2567_v44 = vmul.f32 %v5385_v19, %v5348_v57 }
 0x430   : > { %v2247_v8 = vmul.f32 %v3734_v34, %v1910_v13  ;;  %3363 = vst [vmem:[%s4666_s23 + $0x168] sm:$0xff] %v3267_v61  ;;  %vm2253_vm13 = vweird.f32 %v3734_v34  ;;  %v5458_v3 = vmul.f32 %v2439_v36, %v2265_v1  ;;  %v1526_v13 = vmul.f32 %v5323_v59, %v5323_v59  ;;  %v6043_v36 = vld [vmem:[#allocation42_spill] sm:$0xff] }
 0x431   : > { %v3075_v41 = vpop.permute.xlu1 %3074  ;;  %1648 = vadd.xlane.f32.xlu2 %v1647_v46  ;;  %v1677_v2 = vadd.f32 %v1537_v15, %v1536_v10  ;;  %v1422_v46 = vadd.f32 %v5325_v20, %v5323_v59  ;;  %vm2254_vm15 = vmor %vm2252_vm14, %vm2253_vm13 }
 0x432   : > { %v2248_v0 = vmul.f32 %v3734_v34, %v2247_v8  ;;  %v3258_v14 = vadd.f32 %v3075_v41, %v2922_v18  ;;  %v3259_v5 = vadd.f32 %v3075_v41, %v2923_v45  ;;  %1438 = vadd.xlane.f32.xlu0 %v1437_v31  ;;  %v2438_v31 = vld [vmem:[%s4519_s11 + $0x100] sm:$0xff]  ;;  %v5467_v29 = vmul.f32 %v5458_v3, %v5231_v16 }
 0x433   : > { %v1527_v18 = vmul.f32 %v5325_v20, %v5325_v20  ;;  %v1816_v41 = vmul.f32 %v1720_v28, %v1720_v28 }
 0x434   : > { %v2249_v61 = vmul.f32 0.5, %v2248_v0  ;;  %3354 = vst [vmem:[%s4666_s23 + $0x120] sm:$0xff] %v3258_v14  ;;  %v2519_v0 = vld [vmem:[%s4525_s13 + $0x88] sm:$0xff] }
 0x435   : > { %3355 = vst [vmem:[%s4666_s23 + $0x128] sm:$0xff] %v3259_v5  ;;  %v1662_v16 = vadd.f32 %v1527_v18, %v1526_v13  ;;  %v2615_v5 = vsub.f32 %v2519_v0, %v2567_v44 }
 0x436   : > { %v2250_v49 = vsub.f32 1.5, %v2249_v61 }
 0x438   : > { %v2251_v23 = vmul.f32 %v3734_v34, %v2250_v49  ;;  %v6042_v49 = vld [vmem:[#allocation36_spill] sm:$0xff] }
 0x439   : > { %v5488_v1 = vmul.f32 0.0051020407, %v6042_v49 }
 0x43a   : > { %v2255_v8 = vsel %vm2254_vm15, %v3734_v34, %v2251_v23  ;;  %1678 = vadd.xlane.f32.xlu0 %v1677_v2  ;;  %v1768_v34 = vmul.f32 0.0051020407, %v5419_v60  ;;  %v1754_v2 = vmul.f32 0.0051020407, %v6043_v36 }
 0x43b   : > { %v5469_v52 = vmul.f32 %v2438_v31, %v2255_v8  ;;  %v2526_v31 = vld [vmem:[%s4525_s13 + $0xc0] sm:$0xff] }
 0x43c   : > { %1423 = vadd.xlane.f32.xlu1 %v1422_v46  ;;  %v1864_v14 = vsub.f32 %v1768_v34, %v1816_v41  ;;  %v2622_v41 = vsub.f32 %v2526_v31, %v4970_v62 }
 0x43d   : > { %v5478_v45 = vmul.f32 %v5469_v52, %v5417_v50  ;;  %v2626_v50 = vsub.f32 %v2530_v32, %v5262_v11 }
 0x43e   : > { %v1912_v10 = vadd.f32 0.001, %v1864_v14 }
 0x440   : > { %3735 = vrsqrt.f32 %v1912_v10  ;;  %vm2272_vm1 = vweird.f32 %v1912_v10 }
 0x444   : > { %1663 = vadd.xlane.f32.xlu1 %v1662_v16  ;;  %v2533_v16 = vld [vmem:[%s4525_s13 + $0xf8] sm:$0xff] }
 0x445   : > { %v2629_v14 = vsub.f32 %v2533_v16, %v5351_v58 }
 0x446   : > { %v3736_v15 = vpop.eup %3735 }
 0x447   : > { %v2267_v61 = vmul.f32 %v3736_v15, %v1912_v10  ;;  %vm2273_vm2 = vweird.f32 %v3736_v15  ;;  %v1416_v10 = vadd.f32 %v5229_v43, %v5227_v63 }
 0x448   : > { %vm2274_vm3 = vmor %vm2272_vm1, %vm2273_vm2 }
 0x449   : > { %3069 = vperm.xlu2 %3674, %v2615_v5   ;;  %v2268_v57 = vmul.f32 %v3736_v15, %v2267_v61  ;;  %v2440_v61 = vld [vmem:[%s4519_s11 + $0x110] sm:$0xff] }
 0x44b   : > { %v2269_v11 = vmul.f32 0.5, %v2268_v57 }
 0x44d   : > { %v2270_v18 = vsub.f32 1.5, %v2269_v11 }
 0x44e   : > { %2788 = vperm.xlu0 %3672, %v5254_v37   ;;  %v1802_v37 = vmul.f32 %v5488_v1, %v5488_v1 }
 0x44f   : > { %v2271_v5 = vmul.f32 %v3736_v15, %v2270_v18 }
 0x450   : > { %v1850_v46 = vsub.f32 %v1754_v2, %v1802_v37 }
 0x451   : > { %v2275_v62 = vsel %vm2274_vm3, %v3736_v15, %v2271_v5 }
 0x452   : > { %v1898_v34 = vadd.f32 0.001, %v1850_v46 }
 0x454   : > { %3737 = vrsqrt.f32 %v1898_v34  ;;  %vm2132_vm8 = vweird.f32 %v1898_v34 }
 0x456   : > { %3124 = vperm.xlu0 %3672, %v2626_v50  }
 0x457   : > { %v1430_v60 = vpop.xlane.xlu0 %1429 }
 0x458   : > { %v5490_v19 = vmul.f32 0.0051020407, %v1430_v60  ;;  %v2488_v60 = vmul.f32 %v2440_v61, %v2275_v62 }
 0x45a   : > { %v5501_v23 = vmul.f32 %v5490_v19, %v5490_v19  ;;  %v3738_v49 = vpop.eup %3737  ;;  %v2584_v2 = vmul.f32 %v2488_v60, %v1720_v28 }
 0x45b   : > { %v2127_v36 = vmul.f32 %v3738_v49, %v1898_v34  ;;  %vm2133_vm7 = vweird.f32 %v3738_v49  ;;  %v1532_v34 = vmul.f32 %v5389_v39, %v5389_v39 }
 0x45c   : > { %v1415_v53 = vpop.xlane.xlu1 %1414  ;;  %vm2134_vm9 = vmor %vm2132_vm8, %vm2133_vm7 }
 0x45d   : > { %2768 = vperm.xlu1 %3673, %v4966_v38   ;;  %v5496_v6 = vmul.f32 0.0051020407, %v1415_v53  ;;  %v2536_v53 = vld [vmem:[%s4525_s13 + $0x110] sm:$0xff]  ;;  %v2128_v46 = vmul.f32 %v3738_v49, %v2127_v36  ;;  %v6045_v36 = vld [vmem:[#allocation28_spill] sm:$0xff] }
 0x45e   : > { %2803 = vperm.xlu0 %3672, %v5345_v40   ;;  %v2632_v31 = vsub.f32 %v2536_v53, %v2584_v2 }
 0x45f   : > { %v1670_v8 = vpop.xlane.xlu0 %1669  ;;  %v1819_v38 = vmul.f32 %v5496_v6, %v5496_v6  ;;  %v2129_v18 = vmul.f32 0.5, %v2128_v46  ;;  %v2426_v46 = vld [vmem:[%s4519_s11 + $0xa0] sm:$0xff] }
 0x460   : > { %v5504_v13 = vmul.f32 0.0051020407, %v1670_v8 }
 0x461   : > { %v2130_v62 = vsub.f32 1.5, %v2129_v18  ;;  %v6046_v18 = vsub.f32 %v5340_v55, %v5338_v48  ;;  %v6048_v55 = vld [vmem:[#allocation20_spill] sm:$0xff] }
 0x462   : > { %v1872_v40 = vsub.f32 %v5504_v13, %v5501_v23  ;;  %v6057_v13 = vld [vmem:[#allocation9_spill] sm:$0xff] }
 0x464   : > { %v1655_v44 = vpop.xlane.xlu1 %1654 }
 0x465   : > { %v1771_v0 = vmul.f32 0.0051020407, %v1655_v44  ;;  %3104 = vperm.xlu1 %3673, %v2622_v41   ;;  %v2443_v41 = vld [vmem:[%s4519_s11 + $0x128] sm:$0xff] }
 0x466   : > { %3139 = vperm.xlu0 %3672, %v2629_v14  }
 0x467   : > { %v1867_v32 = vsub.f32 %v1771_v0, %v1819_v38 }
 0x469   : > { %v1915_v50 = vadd.f32 0.001, %v1867_v32 }
 0x46b   : > { %3739 = vrsqrt.f32 %v1915_v50  ;;  %vm2302_vm4 = vweird.f32 %v1915_v50 }
 0x46e   : > { %2818 = vperm.xlu0 %3672, %v2488_v60   ;;  %v2539_v60 = vld [vmem:[%s4525_s13 + $0x128] sm:$0xff] }
 0x471   : > { %v3740_v57 = vpop.eup %3739 }
 0x472   : > { %v2297_v58 = vmul.f32 %v3740_v57, %v1915_v50  ;;  %1417 = vadd.xlane.f32.xlu2 %v1416_v10  ;;  %v2774_v37 = vpop.permute.xlu0 %2773  ;;  %vm2303_vm5 = vweird.f32 %v3740_v57 }
 0x473   : > { %vm2304_vm6 = vmor %vm2302_vm4, %vm2303_vm5  ;;  %v2936_v28 = vmul.f32 %v2774_v37, %v4759_v51  ;;  %v2937_v38 = vmul.f32 %v2774_v37, %v4761_v22  ;;  %v2131_v51 = vmul.f32 %v3738_v49, %v2130_v62  ;;  %v6044_v22 = vld [vmem:[#allocation27_spill] sm:$0xff] }
 0x474   : > { %v2298_v11 = vmul.f32 %v3740_v57, %v2297_v58 }
 0x476   : > { %v2299_v15 = vmul.f32 0.5, %v2298_v11  ;;  %3154 = vperm.xlu0 %3672, %v2632_v31   ;;  %v2135_v11 = vsel %vm2134_vm9, %v3738_v49, %v2131_v51  ;;  %v1431_v31 = vadd.f32 %v5391_v7, %v5389_v39  ;;  %v6047_v51 = vld [vmem:[#allocation19_spill] sm:$0xff] }
 0x478   : > { %v2300_v8 = vsub.f32 1.5, %v2299_v15  ;;  %v1533_v15 = vmul.f32 %v5391_v7, %v5391_v7 }
 0x47a   : > { %v2301_v16 = vmul.f32 %v3740_v57, %v2300_v8  ;;  %v3110_v44 = vpop.permute.xlu0 %3109  ;;  %v1409_v8 = vpop.xlane.xlu2 %1408  ;;  %v1671_v49 = vadd.f32 %v1533_v15, %v1532_v34 }
 0x47b   : > { %v3272_v0 = vadd.f32 %v3110_v44, %v2936_v28  ;;  %v3273_v14 = vadd.f32 %v3110_v44, %v2937_v38 }
 0x47c   : > { %v2754_v5 = vpop.permute.xlu1 %2753  ;;  %v2305_v32 = vsel %vm2304_vm6, %v3740_v57, %v2301_v16  ;;  %v1914_v16 = vadd.f32 0.001, %v6046_v18 }
 0x47d   : > { %v2491_v50 = vmul.f32 %v2443_v41, %v2305_v32  ;;  %3368 = vst [vmem:[%s4666_s23 + $0x190] sm:$0xff] %v3272_v0  ;;  %v2928_v10 = vmul.f32 %v2754_v5, %v6044_v22  ;;  %v2929_v2 = vmul.f32 %v2754_v5, %v6045_v36  ;;  %v1721_v41 = vmul.f32 0.0051020407, %v1409_v8 }
 0x47e   : > { %3369 = vst [vmem:[%s4666_s23 + $0x198] sm:$0xff] %v3273_v14  ;;  %3741 = vrsqrt.f32 %v1914_v16  ;;  %vm2292_vm10 = vweird.f32 %v1914_v16 }
 0x47f   : > { %2833 = vperm.xlu0 %3672, %v2491_v50   ;;  %v2587_v61 = vmul.f32 %v2491_v50, %v5496_v6  ;;  %v5529_v6 = vmul.f32 %v2426_v46, %v2135_v11  ;;  %v1817_v14 = vmul.f32 %v1721_v41, %v1721_v41 }
 0x481   : > { %v2635_v58 = vsub.f32 %v2539_v60, %v2587_v61 }
 0x482   : > { %v2734_v28 = vpop.permute.xlu2 %2733 }
 0x483   : > { %v2920_v48 = vmul.f32 %v2734_v28, %v6047_v51  ;;  %v2921_v22 = vmul.f32 %v2734_v28, %v6048_v55 }
 0x484   : > { %v3090_v57 = vpop.permute.xlu1 %3089  ;;  %v3742_v38 = vpop.eup %3741 }
 0x485   : > { %v3264_v53 = vadd.f32 %v3090_v57, %v2928_v10  ;;  %v3265_v37 = vadd.f32 %v3090_v57, %v2929_v2  ;;  %v2287_v44 = vmul.f32 %v3742_v38, %v1914_v16  ;;  %v1522_v2 = vmul.f32 %v5227_v63, %v5227_v63 }
 0x486   : > { %vm2293_vm11 = vweird.f32 %v3742_v38 }
 0x487   : > { %3360 = vst [vmem:[%s4666_s23 + $0x150] sm:$0xff] %v3264_v53  ;;  %3169 = vperm.xlu0 %3672, %v2635_v58   ;;  %v2288_v62 = vmul.f32 %v3742_v38, %v2287_v44  ;;  %v2529_v44 = vld [vmem:[%s4525_s13 + $0xd8] sm:$0xff]  ;;  %vm2294_vm12 = vmor %vm2292_vm10, %vm2293_vm11 }
 0x488   : > { %3361 = vst [vmem:[%s4666_s23 + $0x158] sm:$0xff] %v3265_v37  ;;  %v1523_v37 = vmul.f32 %v5229_v43, %v5229_v43 }
 0x489   : > { %v2289_v10 = vmul.f32 0.5, %v2288_v62 }
 0x48a   : > { %2748 = vperm.xlu2 %3674, %v5529_v6   ;;  %v1656_v8 = vadd.f32 %v1523_v37, %v1522_v2 }
 0x48b   : > { %v2290_v34 = vsub.f32 1.5, %v2289_v10 }
 0x48f   : > { %1432 = vadd.xlane.f32.xlu1 %v1431_v31 }
 0x497   : > { %1672 = vadd.xlane.f32.xlu1 %v1671_v49 }
 0x4a4   : > { %v1649_v0 = vpop.xlane.xlu2 %1648 }
 0x4a5   : > { %v1769_v5 = vmul.f32 0.0051020407, %v1649_v0  ;;  %v1439_v32 = vpop.xlane.xlu0 %1438  ;;  %v2291_v0 = vmul.f32 %v3742_v38, %v2290_v34  ;;  %v2522_v34 = vld [vmem:[%s4525_s13 + $0xa0] sm:$0xff] }
 0x4a6   : > { %v5541_v60 = vmul.f32 0.0051020407, %v1439_v32 }
 0x4a7   : > { %v1865_v50 = vsub.f32 %v1769_v5, %v1817_v14  ;;  %v2295_v16 = vsel %vm2294_vm12, %v3742_v38, %v2291_v0 }
 0x4a8   : > { %v5549_v53 = vmul.f32 %v5541_v60, %v5541_v60 }
 0x4a9   : > { %v1913_v61 = vadd.f32 0.001, %v1865_v50 }
 0x4ab   : > { %3743 = vrsqrt.f32 %v1913_v61  ;;  %vm2282_vm14 = vweird.f32 %v1913_v61 }
 0x4ac   : > { %v3070_v36 = vpop.permute.xlu2 %3069 }
 0x4ad   : > { %v3256_v58 = vadd.f32 %v3070_v36, %v2920_v48  ;;  %v3257_v57 = vadd.f32 %v3070_v36, %v2921_v22  ;;  %v1679_v11 = vpop.xlane.xlu0 %1678  ;;  %v2442_v48 = vld [vmem:[%s4519_s11 + $0x120] sm:$0xff]  ;;  %v2441_v36 = vld [vmem:[%s4519_s11 + $0x118] sm:$0xff] }
 0x4ae   : > { %v5554_v31 = vmul.f32 0.0051020407, %v1679_v11  ;;  %v5563_v55 = vmul.f32 %v2442_v48, %v2295_v16  ;;  %v6049_v16 = vld [vmem:[#allocation39_spill] sm:$0xff] }
 0x4af   : > { %3352 = vst [vmem:[%s4666_s23 + $0x110] sm:$0xff] %v3256_v58  ;;  %v1424_v46 = vpop.xlane.xlu1 %1423 }
 0x4b0   : > { %3353 = vst [vmem:[%s4666_s23 + $0x118] sm:$0xff] %v3257_v57  ;;  %2783 = vperm.xlu1 %3673, %v5154_v4   ;;  %v1875_v49 = vsub.f32 %v5554_v31, %v5549_v53  ;;  %v1726_v28 = vmul.f32 0.0051020407, %v1424_v46  ;;  %v2625_v4 = vsub.f32 %v2529_v44, %v5163_v21  ;;  %v5568_v2 = vmul.f32 %v5563_v55, %v5331_v24 }
 0x4b1   : > { %v3744_v15 = vpop.eup %3743 }
 0x4b2   : > { %v2277_v18 = vmul.f32 %v3744_v15, %v1913_v61  ;;  %v1822_v32 = vmul.f32 %v1726_v28, %v1726_v28  ;;  %vm2283_vm13 = vweird.f32 %v3744_v15  ;;  %v2570_v61 = vmul.f32 %v5529_v6, %v5488_v1  ;;  %v2446_v6 = vld [vmem:[%s4519_s11 + $0x140] sm:$0xff] }
 0x4b3   : > { %1657 = vadd.xlane.f32.xlu2 %v1656_v8  ;;  %vm2284_vm15 = vmor %vm2282_vm14, %vm2283_vm13 }
 0x4b4   : > { %v2278_v14 = vmul.f32 %v3744_v15, %v2277_v18  ;;  %v2618_v44 = vsub.f32 %v2522_v34, %v2570_v61 }
 0x4b6   : > { %v2279_v5 = vmul.f32 0.5, %v2278_v14 }
 0x4b7   : > { %v1664_v50 = vpop.xlane.xlu1 %1663 }
 0x4b8   : > { %v2280_v62 = vsub.f32 1.5, %v2279_v5  ;;  %v1774_v51 = vmul.f32 0.0051020407, %v1664_v50  ;;  %3119 = vperm.xlu1 %3673, %v2625_v4  }
 0x4ba   : > { %v2281_v22 = vmul.f32 %v3744_v15, %v2280_v62  ;;  %v1870_v10 = vsub.f32 %v1774_v51, %v1822_v32  ;;  %v2542_v62 = vld [vmem:[%s4525_s13 + $0x140] sm:$0xff]  ;;  %v813_v51 = vpop.f32.mrf.mxu0 }
 0x4bc   : > { %v1918_v21 = vadd.f32 0.001, %v1870_v10  ;;  %v2285_v58 = vsel %vm2284_vm15, %v3744_v15, %v2281_v22  ;;  %v6050_v22 = vld [vmem:[#allocation40_spill] sm:$0xff] }
 0x4bd   : > { %v5570_v57 = vmul.f32 %v2441_v36, %v2285_v58  ;;  %v1135_v58 = vpop.f32.mrf.mxu2 }
 0x4be   : > { %3745 = vrsqrt.f32 %v1918_v21  ;;  %vm2332_vm1 = vweird.f32 %v1918_v21 }
 0x4bf   : > { %v5573_v38 = vmul.f32 %v5570_v57, %v1721_v41 }
 0x4c0   : > { %v2789_v37 = vpop.permute.xlu0 %2788 }
 0x4c1   : > { %v2942_v24 = vmul.f32 %v2789_v37, %v4866_v12  ;;  %v2943_v15 = vmul.f32 %v2789_v37, %v4868_v26 }
 0x4c4   : > { %v3746_v11 = vpop.eup %3745 }
 0x4c5   : > { %v2327_v46 = vmul.f32 %v3746_v11, %v1918_v21  ;;  %vm2333_vm2 = vweird.f32 %v3746_v11  ;;  %v974_v21 = vpop.f32.mrf.mxu1 }
 0x4c6   : > { %vm2334_vm3 = vmor %vm2332_vm1, %vm2333_vm2 }
 0x4c7   : > { %v2328_v8 = vmul.f32 %v3746_v11, %v2327_v46  ;;  %v1296_v46 = vpop.f32.mrf.mxu3 }
 0x4c8   : > { %v3125_v41 = vpop.permute.xlu0 %3124 }
 0x4c9   : > { %v2329_v18 = vmul.f32 0.5, %v2328_v8  ;;  %v3278_v0 = vadd.f32 %v3125_v41, %v2942_v24  ;;  %v3279_v14 = vadd.f32 %v3125_v41, %v2943_v15  ;;  %v5588_v24 = vadd.f32 %v974_v21, %v813_v51  ;;  %v6054_v21 = vld [vmem:[#allocation6_spill] sm:$0xff] }
 0x4ca   : > { %v5591_v41 = vadd.f32 %v1296_v46, %v1135_v58  ;;  %v1425_v51 = vadd.f32 %v5329_v35, %v5327_v25 }
 0x4cb   : > { %v2330_v5 = vsub.f32 1.5, %v2329_v18  ;;  %3084 = vperm.xlu2 %3674, %v2618_v44   ;;  %3374 = vst [vmem:[%s4666_s23 + $0x1c0] sm:$0xff] %v3278_v0  ;;  %v5595_v44 = vmul.f32 0.0051020407, %v4873_v33 }
 0x4cc   : > { %3375 = vst [vmem:[%s4666_s23 + $0x1c8] sm:$0xff] %v3279_v14  ;;  %v1539_v33 = vmul.f32 %v5591_v41, %v5591_v41 }
 0x4cd   : > { %v2331_v1 = vmul.f32 %v3746_v11, %v2330_v5  ;;  %v1805_v0 = vmul.f32 %v5595_v44, %v5595_v44 }
 0x4cf   : > { %v2769_v32 = vpop.permute.xlu1 %2768  ;;  %v2335_v4 = vsel %vm2334_vm3, %v3746_v11, %v2331_v1  ;;  %v1538_v1 = vmul.f32 %v5588_v24, %v5588_v24 }
 0x4d0   : > { %v2494_v12 = vmul.f32 %v2446_v6, %v2335_v4  ;;  %v2804_v50 = vpop.permute.xlu0 %2803  ;;  %v2934_v48 = vmul.f32 %v2769_v32, %v6049_v16  ;;  %v2935_v10 = vmul.f32 %v2769_v32, %v6050_v22  ;;  %v6051_v22 = vld [vmem:[#allocation8_spill] sm:$0xff] }
 0x4d1   : > { %v2948_v11 = vmul.f32 %v2804_v50, %v4993_v42  ;;  %v2949_v61 = vmul.f32 %v2804_v50, %v4991_v54  ;;  %v1757_v42 = vmul.f32 0.0051020407, %v4913_v9  ;;  %v1440_v54 = vadd.f32 %v5591_v41, %v5588_v24 }
 0x4d2   : > { %2848 = vperm.xlu0 %3672, %v2494_v12   ;;  %v2590_v26 = vmul.f32 %v2494_v12, %v1726_v28  ;;  %v1680_v32 = vadd.f32 %v1539_v33, %v1538_v1  ;;  %v2532_v33 = vld [vmem:[%s4525_s13 + $0xf0] sm:$0xff] }
 0x4d3   : > { %v1853_v5 = vsub.f32 %v1757_v42, %v1805_v0  ;;  %v6056_v0 = vld [vmem:[#allocation41_spill] sm:$0xff] }
 0x4d4   : > { %v2638_v36 = vsub.f32 %v2542_v62, %v2590_v26 }
 0x4d5   : > { %v1901_v6 = vadd.f32 0.001, %v1853_v5 }
 0x4d7   : > { %v3105_v37 = vpop.permute.xlu1 %3104  ;;  %3747 = vrsqrt.f32 %v1901_v6  ;;  %vm2162_vm5 = vweird.f32 %v1901_v6 }
 0x4d8   : > { %v3270_v28 = vadd.f32 %v3105_v37, %v2934_v48  ;;  %v3271_v34 = vadd.f32 %v3105_v37, %v2935_v10  ;;  %v3140_v8 = vpop.permute.xlu0 %3139  ;;  %v6052_v10 = vld [vmem:[#allocation7_spill] sm:$0xff] }
 0x4d9   : > { %v3284_v15 = vadd.f32 %v3140_v8, %v2948_v11  ;;  %v3285_v18 = vadd.f32 %v3140_v8, %v2949_v61  ;;  %v6055_v37 = vld [vmem:[#allocation11_spill] sm:$0xff] }
 0x4da   : > { %3366 = vst [vmem:[%s4666_s23 + $0x180] sm:$0xff] %v3270_v28  ;;  %3184 = vperm.xlu0 %3672, %v2638_v36  }
 0x4db   : > { %3367 = vst [vmem:[%s4666_s23 + $0x188] sm:$0xff] %v3271_v34 }
 0x4dc   : > { %3380 = vst [vmem:[%s4666_s23 + $0x1f0] sm:$0xff] %v3284_v15 }
 0x4dd   : > { %3381 = vst [vmem:[%s4666_s23 + $0x1f8] sm:$0xff] %v3285_v18  ;;  %v3748_v62 = vpop.eup %3747  ;;  %v1920_v18 = vadd.f32 0.001, %v1872_v40  ;;  %v2628_v40 = vsub.f32 %v2532_v33, %v6057_v13 }
 0x4de   : > { %v2157_v48 = vmul.f32 %v3748_v62, %v1901_v6  ;;  %vm2163_vm4 = vweird.f32 %v3748_v62 }
 0x4df   : > { %vm2164_vm6 = vmor %vm2162_vm5, %vm2163_vm4  ;;  %vm2352_vm10 = vweird.f32 %v1920_v18 }
 0x4e0   : > { %v2819_v14 = vpop.permute.xlu0 %2818 }
 0x4e1   : > { %v2954_v9 = vmul.f32 %v2819_v14, %v5103_v56  ;;  %v2955_v4 = vmul.f32 %v2819_v14, %v5105_v27  ;;  %v6053_v56 = vsub.f32 %v6051_v22, %v6052_v10  ;;  %v2158_v27 = vmul.f32 %v3748_v62, %v2157_v48 }
 0x4e2   : > { %1441 = vadd.xlane.f32.xlu1 %v1440_v54 }
 0x4e3   : > { %v1917_v36 = vadd.f32 0.001, %v6053_v56  ;;  %v2159_v34 = vmul.f32 0.5, %v2158_v27  ;;  %v5638_v56 = vadd.f32 0.001, %v1875_v49  ;;  %v6058_v49 = vld [vmem:[#allocation18_spill] sm:$0xff] }
 0x4e5   : > { %3749 = vrsqrt.f32 %v1917_v36  ;;  %v2160_v15 = vsub.f32 1.5, %v2159_v34  ;;  %vm2322_vm7 = vweird.f32 %v1917_v36  ;;  %vm2382_vm1 = vweird.f32 %v5638_v56 }
 0x4e6   : > { %3751 = vrsqrt.f32 %v1920_v18 }
 0x4e7   : > { %v2161_v14 = vmul.f32 %v3748_v62, %v2160_v15 }
 0x4e8   : > { %v3155_v12 = vpop.permute.xlu0 %3154 }
 0x4e9   : > { %v3290_v50 = vadd.f32 %v3155_v12, %v2954_v9  ;;  %v3291_v26 = vadd.f32 %v3155_v12, %v2955_v4  ;;  %v2429_v9 = vld [vmem:[%s4519_s11 + $0xb8] sm:$0xff] }
 0x4ea   : > { %1681 = vadd.xlane.f32.xlu1 %v1680_v32  ;;  %v2165_v32 = vsel %vm2164_vm6, %v3748_v62, %v2161_v14 }
 0x4eb   : > { %3386 = vst [vmem:[%s4666_s23 + $0x220] sm:$0xff] %v3290_v50  ;;  %v3750_v8 = vpop.eup %3749 }
 0x4ec   : > { %3387 = vst [vmem:[%s4666_s23 + $0x228] sm:$0xff] %v3291_v26  ;;  %v2317_v42 = vmul.f32 %v3750_v8, %v1917_v36  ;;  %v3752_v4 = vpop.eup %3751  ;;  %v5632_v26 = vmul.f32 %v2429_v9, %v2165_v32  ;;  %vm2323_vm8 = vweird.f32 %v3750_v8  ;;  %v2535_v36 = vld [vmem:[%s4525_s13 + $0x108] sm:$0xff] }
 0x4ed   : > { %v2347_v6 = vmul.f32 %v3752_v4, %v1920_v18  ;;  %vm2324_vm9 = vmor %vm2322_vm7, %vm2323_vm8  ;;  %v2631_v53 = vsub.f32 %v2535_v36, %v5467_v29  ;;  %vm2353_vm11 = vweird.f32 %v3752_v4 }
 0x4ee   : > { %v2318_v5 = vmul.f32 %v3750_v8, %v2317_v42  ;;  %vm2354_vm14 = vmor %vm2352_vm10, %vm2353_vm11 }
 0x4ef   : > { %v2348_v22 = vmul.f32 %v3752_v4, %v2347_v6 }
 0x4f0   : > { %v2319_v12 = vmul.f32 0.5, %v2318_v5  ;;  %v2448_v5 = vld [vmem:[%s4519_s11 + $0x150] sm:$0xff] }
 0x4f1   : > { %v2834_v16 = vpop.permute.xlu0 %2833  ;;  %v2349_v27 = vmul.f32 0.5, %v2348_v22 }
 0x4f2   : > { %v2960_v58 = vmul.f32 %v2834_v16, %v6054_v21  ;;  %v2961_v46 = vmul.f32 %v2834_v16, %v6055_v37  ;;  %v2320_v16 = vsub.f32 1.5, %v2319_v12  ;;  %v1418_v21 = vpop.xlane.xlu2 %1417  ;;  %v2445_v37 = vld [vmem:[%s4519_s11 + $0x138] sm:$0xff] }
 0x4f3   : > { %v5658_v12 = vmul.f32 0.0051020407, %v1418_v21 }
 0x4f4   : > { %1426 = vadd.xlane.f32.xlu2 %v1425_v51  ;;  %v2321_v10 = vmul.f32 %v3750_v8, %v2320_v16  ;;  %v2545_v16 = vld [vmem:[%s4525_s13 + $0x158] sm:$0xff] }
 0x4f9   : > { %v3170_v11 = vpop.permute.xlu0 %3169 }
 0x4fa   : > { %v3296_v61 = vadd.f32 %v3170_v11, %v2960_v58  ;;  %v3297_v28 = vadd.f32 %v3170_v11, %v2961_v46  ;;  %v2325_v58 = vsel %vm2324_vm9, %v3750_v8, %v2321_v10  ;;  %v2350_v11 = vsub.f32 1.5, %v2349_v27  ;;  %v2749_v18 = vpop.permute.xlu2 %2748  ;;  %v6059_v10 = vld [vmem:[#allocation44_spill] sm:$0xff]  ;;  %v6060_v27 = vld [vmem:[#allocation45_spill] sm:$0xff] }
 0x4fc   : > { %3392 = vst [vmem:[%s4666_s23 + $0x250] sm:$0xff] %v3296_v61  ;;  %v2351_v8 = vmul.f32 %v3752_v4, %v2350_v11 }
 0x4fd   : > { %3393 = vst [vmem:[%s4666_s23 + $0x258] sm:$0xff] %v3297_v28  ;;  %v5644_v28 = vmul.f32 %v2445_v37, %v2325_v58 }
 0x4fe   : > { %v2355_v14 = vsel %vm2354_vm14, %v3752_v4, %v2351_v8 }
 0x4ff   : > { %v2496_v13 = vmul.f32 %v2448_v5, %v2355_v14  ;;  %v2451_v14 = vld [vmem:[%s4519_s11 + $0x168] sm:$0xff] }
 0x502   : > { %v1433_v54 = vpop.xlane.xlu1 %1432 }
 0x503   : > { %2798 = vperm.xlu1 %3673, %v6056_v0   ;;  %v5625_v1 = vmul.f32 0.0051020407, %v1433_v54  ;;  %v2449_v0 = vld [vmem:[%s4519_s11 + $0x158] sm:$0xff] }
 0x505   : > { %v1825_v23 = vmul.f32 %v5625_v1, %v5625_v1 }
 0x50a   : > { %v1673_v50 = vpop.xlane.xlu1 %1672 }
 0x50b   : > { %v1777_v51 = vmul.f32 0.0051020407, %v1673_v50  ;;  %3134 = vperm.xlu1 %3673, %v2628_v40   ;;  %v2538_v40 = vld [vmem:[%s4525_s13 + $0x120] sm:$0xff] }
 0x50c   : > { %2763 = vperm.xlu2 %3674, %v5632_v26   ;;  %v2634_v22 = vsub.f32 %v2538_v40, %v5568_v2  ;;  %v6061_v2 = vld [vmem:[#allocation23_spill] sm:$0xff] }
 0x50d   : > { %v1873_v62 = vsub.f32 %v1777_v51, %v1825_v23  ;;  %v5664_v51 = vmul.f32 %v2496_v13, %v5490_v19 }
 0x50f   : > { %v1921_v48 = vadd.f32 0.001, %v1873_v62  ;;  %v1820_v62 = vmul.f32 %v5658_v12, %v5658_v12 }
 0x511   : > { %3753 = vrsqrt.f32 %v1921_v48  ;;  %vm2362_vm12 = vweird.f32 %v1921_v48 }
 0x512   : > { %3755 = vrsqrt.f32 %v5638_v56 }
 0x513   : > { %2813 = vperm.xlu1 %3673, %v5458_v3   ;;  %v5649_v3 = vmul.f32 %v5644_v28, %v6058_v49 }
 0x517   : > { %v3754_v46 = vpop.eup %3753 }
 0x518   : > { %v2357_v61 = vmul.f32 %v3754_v46, %v1921_v48  ;;  %v5651_v34 = vpop.eup %3755  ;;  %vm2363_vm13 = vweird.f32 %v3754_v46 }
 0x519   : > { %v2377_v29 = vmul.f32 %v5651_v34, %v5638_v56  ;;  %vm2364_vm15 = vmor %vm2362_vm12, %vm2363_vm13  ;;  %vm2383_vm2 = vweird.f32 %v5651_v34  ;;  %v1528_v56 = vmul.f32 %v5327_v25, %v5327_v25 }
 0x51a   : > { %v2358_v31 = vmul.f32 %v3754_v46, %v2357_v61  ;;  %v2926_v61 = vmul.f32 %v2749_v18, %v6061_v2  ;;  %vm2384_vm3 = vmor %vm2382_vm1, %vm2383_vm2  ;;  %v6064_v2 = vld [vmem:[#allocation57_spill] sm:$0xff] }
 0x51b   : > { %3149 = vperm.xlu1 %3673, %v2631_v53   ;;  %v2378_v33 = vmul.f32 %v5651_v34, %v2377_v29  ;;  %v6062_v53 = vld [vmem:[#allocation24_spill] sm:$0xff] }
 0x51c   : > { %v2359_v15 = vmul.f32 0.5, %v2358_v31  ;;  %v2927_v31 = vmul.f32 %v2749_v18, %v6062_v53 }
 0x51d   : > { %v2379_v6 = vmul.f32 0.5, %v2378_v33  ;;  %v2541_v33 = vld [vmem:[%s4525_s13 + $0x138] sm:$0xff] }
 0x51e   : > { %v2360_v42 = vsub.f32 1.5, %v2359_v15 }
 0x51f   : > { %v2380_v37 = vsub.f32 1.5, %v2379_v6 }
 0x520   : > { %v2361_v54 = vmul.f32 %v3754_v46, %v2360_v42  ;;  %v1529_v42 = vmul.f32 %v5329_v35, %v5329_v35 }
 0x521   : > { %v2381_v49 = vmul.f32 %v5651_v34, %v2380_v37  ;;  %v512_v37 = vld [vmem:[%s4167_s14 + $0x2f8] sm:$0xff] }
 0x522   : > { %v2784_v32 = vpop.permute.xlu1 %2783  ;;  %v2365_v9 = vsel %vm2364_vm15, %v3754_v46, %v2361_v54  ;;  %v1665_v54 = vadd.f32 %v1529_v42, %v1528_v56  ;;  %3620 = vmatmul.msk.f32.gmra.mxu3 %vm513_vm0, %v512_v37  ;;  %3572 = vmatmul.msk.f32.gmra.mxu1 %vm513_vm0, %v512_v37 }
 0x523   : > { %2828 = vperm.xlu1 %3673, %v5563_v55   ;;  %v2497_v23 = vmul.f32 %v2449_v0, %v2365_v9  ;;  %v2940_v55 = vmul.f32 %v2784_v32, %v6059_v10  ;;  %v2941_v21 = vmul.f32 %v2784_v32, %v6060_v27  ;;  %v2385_v0 = vsel %vm2384_vm3, %v5651_v34, %v2381_v49  ;;  %v2525_v10 = vld [vmem:[%s4525_s13 + $0xb8] sm:$0xff] }
 0x524   : > { %v2499_v9 = vmul.f32 %v2451_v14, %v2385_v0  ;;  %v6065_v14 = vld [vmem:[#allocation34_spill] sm:$0xff] }
 0x525   : > { %2863 = vperm.xlu0 %3672, %v2497_v23   ;;  %v2593_v50 = vmul.f32 %v2497_v23, %v5625_v1  ;;  %v2637_v23 = vsub.f32 %v2541_v33, %v5649_v3  ;;  %v2544_v3 = vld [vmem:[%s4525_s13 + $0x150] sm:$0xff] }
 0x526   : > { %v1658_v4 = vpop.xlane.xlu2 %1657 }
 0x527   : > { %v1772_v48 = vmul.f32 0.0051020407, %v1658_v4  ;;  %v2641_v1 = vsub.f32 %v2545_v16, %v2593_v50  ;;  %v2595_v50 = vmul.f32 %v2499_v9, %v5541_v60  ;;  %v2444_v4 = vld [vmem:[%s4519_s11 + $0x130] sm:$0xff] }
 0x529   : > { %v1868_v58 = vsub.f32 %v1772_v48, %v1820_v62  ;;  %v2640_v48 = vsub.f32 %v2544_v3, %v5664_v51  ;;  %v2547_v51 = vld [vmem:[%s4525_s13 + $0x168] sm:$0xff] }
 0x52a   : > { %v3120_v19 = vpop.permute.xlu1 %3119 }
 0x52b   : > { %v1916_v36 = vadd.f32 0.001, %v1868_v58  ;;  %v3276_v46 = vadd.f32 %v3120_v19, %v2940_v55  ;;  %v3277_v11 = vadd.f32 %v3120_v19, %v2941_v21  ;;  %3164 = vperm.xlu1 %3673, %v2634_v22   ;;  %v2573_v22 = vmul.f32 %v5632_v26, %v5595_v44 }
 0x52d   : > { %3757 = vrsqrt.f32 %v1916_v36  ;;  %3372 = vst [vmem:[%s4666_s23 + $0x1b0] sm:$0xff] %v3276_v46  ;;  %3199 = vperm.xlu0 %3672, %v2641_v1   ;;  %vm2312_vm5 = vweird.f32 %v1916_v36  ;;  %v511_v1 = vld [vmem:[%s4167_s14 + $0x2f0] sm:$0xff]  ;;  %s3628_s14 = smul.u32 768, %s3889_s22  ;;  %s3415_s22 = scalar_lea.sflag [#allocation3], %s250_s15 }
 0x52e   : > { %3373 = vst [vmem:[%s4666_s23 + $0x1b8] sm:$0xff] %v3277_v11  ;;  %v3085_v8 = vpop.permute.xlu2 %3084  ;;  %1137 = vmatmul.f32.gmra.mxu2 %v511_v1  ;;  %815 = vmatmul.f32.gmra.mxu0 %v511_v1 }
 0x52f   : > { %v3262_v15 = vadd.f32 %v3085_v8, %v2926_v61  ;;  %v3263_v29 = vadd.f32 %v3085_v8, %v2927_v31  ;;  %v1760_v61 = vmul.f32 0.0051020407, %v6064_v2  ;;  %s3427_s30 = scalar_lea.hbm %s5881_s5, %s3628_s14 }
 0x530   : > { %s3430_s6 = sshll.u32 %s3427_s30, 4  ;;  %s3431_s6 = int_to_ptr.hbm [resolvable:$true] %s3430_s6 }
 0x531   : > { %3358 = vst [vmem:[%s4666_s23 + $0x140] sm:$0xff] %v3262_v15  ;;  %s3785_s8 = sshra.s32 %s3431_s6, 4  ;;  %s3786_s8 = int_to_ptr.hbm [resolvable:$true] %s3785_s8 }
 0x532   : > { %3359 = vst [vmem:[%s4666_s23 + $0x148] sm:$0xff] %v3263_v29  ;;  %s3787_s9 = scalar_lea.hbm %s3786_s8, 768  ;;  %p3792_p0 = scmp.lt.s32.totalorder %s3786_s8, %s5881_s5 }
 0x533   : > { %v3758_v18 = vpop.eup %3757  ;;  %2843 = vperm.xlu1 %3673, %v5644_v28   ;;  %p3788_p11 = scmp.ne.s32.totalorder %s3786_s8, %s3787_s9  ;;  %p3793_p1 = scmp.lt.s32.totalorder %s3791_s25, %s3787_s9 }
 0x534   : > { %v2307_v5 = vmul.f32 %v3758_v18, %v1916_v36  ;;  %vm2313_vm4 = vweird.f32 %v3758_v18  ;;  %v6063_v36 = vld [vmem:[#allocation56_spill] sm:$0xff] }
 0x535   : > { %1666 = vadd.xlane.f32.xlu2 %v1665_v54  ;;  %vm2314_vm6 = vmor %vm2312_vm5, %vm2313_vm4  ;;  %v5713_v46 = vmul.f32 0.0051020407, %v6063_v36  ;;  %p3789_p12 = pnand %p3788_p11, %p3906_p5  ;;  %p3794_p2 = por %p3793_p1, %p3792_p0 }
 0x536   : > { %v2308_v32 = vmul.f32 %v3758_v18, %v2307_v5  ;;  %v6066_v5 = vld [vmem:[#allocation35_spill] sm:$0xff] }
 0x537   : > { %v1808_v31 = vmul.f32 %v5713_v46, %v5713_v46  ;;  %v1434_v33 = vadd.f32 %v6066_v5, %v6065_v14  ;;  %p3790_p13 = pneg %p3789_p12 }
 0x538   : > { %v2309_v40 = vmul.f32 0.5, %v2308_v32 }
 0x539   : > { %v1856_v8 = vsub.f32 %v1760_v61, %v1808_v31  ;;  %p3795_p3 = pnand %p3794_p2, %p3790_p13 }
 0x53a   : > { %v2310_v6 = vsub.f32 1.5, %v2309_v40 }
 0x53b   : > { %3179 = vperm.xlu1 %3673, %v2637_v23   ;;  %v1904_v15 = vadd.f32 0.001, %v1856_v8 }
 0x53c   : > { %v2311_v28 = vmul.f32 %v3758_v18, %v2310_v6 }
 0x53d   : > { %vm2192_vm10 = vweird.f32 %v1904_v15 }
 0x53e   : > { %v2315_v34 = vsel %vm2314_vm6, %v3758_v18, %v2311_v28 }
 0x53f   : > { %v5692_v16 = vmul.f32 %v2444_v4, %v2315_v34  ;;  %v2548_v34 = vld [vmem:[%s4525_s13 + $0x170] sm:$0xff] }
 0x541   : > { %v5696_v62 = vmul.f32 %v5692_v16, %v5658_v12  ;;  %v2621_v12 = vsub.f32 %v2525_v10, %v2573_v22 }
 0x543   : > { %2858 = vperm.xlu1 %3673, %v2496_v13  }
 0x544   : > { %v2849_v60 = vpop.permute.xlu0 %2848 }
 0x545   : > { %v2966_v55 = vmul.f32 %v2849_v60, %v5323_v59  ;;  %v2967_v27 = vmul.f32 %v2849_v60, %v5325_v20  ;;  %v2643_v59 = vsub.f32 %v2547_v51, %v2595_v50  ;;  %v6067_v60 = vld [vmem:[#allocation50_spill] sm:$0xff]  ;;  %v2432_v51 = vld [vmem:[%s4519_s11 + $0xd0] sm:$0xff] }
 0x54b   : > { %3194 = vperm.xlu1 %3673, %v2640_v48   ;;  %v6068_v48 = vld [vmem:[#allocation51_spill] sm:$0xff] }
 0x54c   : > { %v3185_v21 = vpop.permute.xlu0 %3184 }
 0x54d   : > { %v3302_v58 = vadd.f32 %v3185_v21, %v2966_v55  ;;  %v3303_v13 = vadd.f32 %v3185_v21, %v2967_v27  ;;  %3099 = vperm.xlu2 %3674, %v2621_v12  }
 0x54f   : > { %3398 = vst [vmem:[%s4666_s23 + $0x280] sm:$0xff] %v3302_v58 }
 0x550   : > { %3399 = vst [vmem:[%s4666_s23 + $0x288] sm:$0xff] %v3303_v13 }
 0x553   : > { %2873 = vperm.xlu1 %3673, %v2499_v9   ;;  %v2452_v9 = vld [vmem:[%s4519_s11 + $0x170] sm:$0xff] }
 0x555   : > { %v1442_v44 = vpop.xlane.xlu1 %1441 }
 0x556   : > { %v1732_v20 = vmul.f32 0.0051020407, %v1442_v44  ;;  %v6069_v44 = vld [vmem:[#allocation54_spill] sm:$0xff] }
 0x558   : > { %v1828_v26 = vmul.f32 %v1732_v20, %v1732_v20 }
 0x55b   : > { %3209 = vperm.xlu1 %3673, %v2643_v59  }
 0x55d   : > { %v1682_v19 = vpop.xlane.xlu1 %1681 }
 0x55e   : > { %v1780_v11 = vmul.f32 0.0051020407, %v1682_v19 }
 0x560   : > { %v1876_v53 = vsub.f32 %v1780_v11, %v1828_v26 }
 0x562   : > { %v1924_v49 = vadd.f32 0.001, %v1876_v53 }
 0x564   : > { %3759 = vrsqrt.f32 %v1924_v49  ;;  %vm2392_vm0 = vweird.f32 %v1924_v49 }
 0x565   : > { %3761 = vrsqrt.f32 %v1904_v15 }
 0x567   : > { %v1427_v53 = vpop.xlane.xlu2 %1426 }
 0x56a   : > { %v3760_v29 = vpop.eup %3759 }
 0x56b   : > { %v2387_v56 = vmul.f32 %v3760_v29, %v1924_v49  ;;  %vm2393_vm7 = vweird.f32 %v3760_v29  ;;  %v3762_v0 = vpop.eup %3761  ;;  %v6071_v49 = vld [vmem:[#allocation5_spill] sm:$0xff] }
 0x56c   : > { %vm2394_vm8 = vmor %vm2392_vm0, %vm2393_vm7  ;;  %v2187_v23 = vmul.f32 %v3762_v0, %v1904_v15  ;;  %vm2193_vm9 = vweird.f32 %v3762_v0  ;;  %v6072_v15 = vld [vmem:[#allocation43_spill] sm:$0xff] }
 0x56d   : > { %v2388_v42 = vmul.f32 %v3760_v29, %v2387_v56  ;;  %vm2194_vm11 = vmor %vm2192_vm10, %vm2193_vm9 }
 0x56e   : > { %v2188_v4 = vmul.f32 %v3762_v0, %v2187_v23 }
 0x56f   : > { %v2389_v18 = vmul.f32 0.5, %v2388_v42 }
 0x570   : > { %v2189_v55 = vmul.f32 0.5, %v2188_v4 }
 0x571   : > { %v2390_v54 = vsub.f32 1.5, %v2389_v18 }
 0x572   : > { %v2190_v58 = vsub.f32 1.5, %v2189_v55 }
 0x573   : > { %v2391_v32 = vmul.f32 %v3760_v29, %v2390_v54 }
 0x574   : > { %v2191_v1 = vmul.f32 %v3762_v0, %v2190_v58 }
 0x575   : > { %v2799_v40 = vpop.permute.xlu1 %2798  ;;  %v2395_v50 = vsel %vm2394_vm8, %v3760_v29, %v2391_v32  ;;  %v2764_v32 = vpop.permute.xlu2 %2763 }
 0x576   : > { %1435 = vadd.xlane.f32.xlu2 %v1434_v33  ;;  %v2500_v6 = vmul.f32 %v2452_v9, %v2395_v50  ;;  %v2946_v3 = vmul.f32 %v2799_v40, %v6067_v60  ;;  %v2947_v22 = vmul.f32 %v2799_v40, %v6068_v48  ;;  %v2195_v37 = vsel %vm2194_vm11, %v3762_v0, %v2191_v1  ;;  %v6074_v60 = vld [vmem:[#allocation33_spill] sm:$0xff] }
 0x577   : > { %v5729_v19 = vmul.f32 %v2432_v51, %v2195_v37  ;;  %v1727_v40 = vmul.f32 0.0051020407, %v1427_v53  ;;  %v1534_v51 = vmul.f32 %v6065_v14, %v6065_v14  ;;  %v6077_v53 = vld [vmem:[#allocation10_spill] sm:$0xff] }
 0x578   : > { %2878 = vperm.xlu0 %3672, %v2500_v6   ;;  %v2596_v28 = vmul.f32 %v2500_v6, %v1732_v20  ;;  %v6070_v20 = vld [vmem:[#allocation55_spill] sm:$0xff] }
 0x57a   : > { %v2644_v10 = vsub.f32 %v2548_v34, %v2596_v28  ;;  %v1823_v28 = vmul.f32 %v1727_v40, %v1727_v40  ;;  %v6073_v34 = vld [vmem:[#allocation30_spill] sm:$0xff] }
 0x57d   : > { %v3135_v27 = vpop.permute.xlu1 %3134 }
 0x57e   : > { %v3282_v12 = vadd.f32 %v3135_v27, %v2946_v3  ;;  %v3283_v21 = vadd.f32 %v3135_v27, %v2947_v22  ;;  %v6075_v27 = vld [vmem:[#allocation31_spill] sm:$0xff] }
 0x580   : > { %3378 = vst [vmem:[%s4666_s23 + $0x1e0] sm:$0xff] %v3282_v12  ;;  %3214 = vperm.xlu0 %3672, %v2644_v10   ;;  %v2932_v12 = vmul.f32 %v2764_v32, %v6075_v27 }
 0x581   : > { %3379 = vst [vmem:[%s4666_s23 + $0x1e8] sm:$0xff] %v3283_v21  ;;  %v6076_v21 = vld [vmem:[#allocation32_spill] sm:$0xff] }
 0x582   : > { %v2933_v58 = vmul.f32 %v2764_v32, %v6076_v21 }
 0x585   : > { %v2814_v13 = vpop.permute.xlu1 %2813 }
 0x586   : > { %v2952_v59 = vmul.f32 %v2814_v13, %v6069_v44  ;;  %v2953_v26 = vmul.f32 %v2814_v13, %v6070_v20  ;;  %v1535_v44 = vmul.f32 %v6066_v5, %v6066_v5 }
 0x58d   : > { %v3150_v36 = vpop.permute.xlu1 %3149 }
 0x58e   : > { %v3288_v11 = vadd.f32 %v3150_v36, %v2952_v59  ;;  %v3289_v2 = vadd.f32 %v3150_v36, %v2953_v26  ;;  %2778 = vperm.xlu2 %3674, %v5729_v19   ;;  %v1674_v26 = vadd.f32 %v1535_v44, %v1534_v51 }
 0x590   : > { %3384 = vst [vmem:[%s4666_s23 + $0x210] sm:$0xff] %v3288_v11 }
 0x591   : > { %3385 = vst [vmem:[%s4666_s23 + $0x218] sm:$0xff] %v3289_v2 }
 0x595   : > { %v2829_v61 = vpop.permute.xlu1 %2828 }
 0x596   : > { %v2958_v8 = vmul.f32 %v2829_v61, %v6071_v49  ;;  %v2959_v29 = vmul.f32 %v2829_v61, %v6072_v15  ;;  %v6078_v49 = vld [vmem:[#allocation17_spill] sm:$0xff] }
 0x597   : > { %v2864_v31 = vpop.permute.xlu0 %2863 }
 0x598   : > { %v2972_v42 = vmul.f32 %v2864_v31, %v5389_v39  ;;  %v2973_v18 = vmul.f32 %v2864_v31, %v5391_v7 }
 0x59d   : > { %v3165_v56 = vpop.permute.xlu1 %3164 }
 0x59e   : > { %v3294_v54 = vadd.f32 %v3165_v56, %v2958_v8  ;;  %v3295_v0 = vadd.f32 %v3165_v56, %v2959_v29 }
 0x59f   : > { %v3200_v33 = vpop.permute.xlu0 %3199 }
 0x5a0   : > { %3390 = vst [vmem:[%s4666_s23 + $0x240] sm:$0xff] %v3294_v54  ;;  %v3308_v9 = vadd.f32 %v3200_v33, %v2972_v42  ;;  %v3309_v23 = vadd.f32 %v3200_v33, %v2973_v18  ;;  %v2447_v18 = vld [vmem:[%s4519_s11 + $0x148] sm:$0xff] }
 0x5a1   : > { %3391 = vst [vmem:[%s4666_s23 + $0x248] sm:$0xff] %v3295_v0 }
 0x5a2   : > { %3404 = vst [vmem:[%s4666_s23 + $0x2b0] sm:$0xff] %v3308_v9  ;;  %v2576_v9 = vmul.f32 %v5729_v19, %v5713_v46 }
 0x5a3   : > { %3405 = vst [vmem:[%s4666_s23 + $0x2b8] sm:$0xff] %v3309_v23  ;;  %v2528_v23 = vld [vmem:[%s4525_s13 + $0xd0] sm:$0xff] }
 0x5a5   : > { %v2844_v50 = vpop.permute.xlu1 %2843 }
 0x5a6   : > { %v2964_v7 = vmul.f32 %v2844_v50, %v6073_v34  ;;  %v2965_v3 = vmul.f32 %v2844_v50, %v6074_v60 }
 0x5a8   : > { %v1667_v6 = vpop.xlane.xlu2 %1666 }
 0x5a9   : > { %v1775_v4 = vmul.f32 0.0051020407, %v1667_v6 }
 0x5ab   : > { %v1871_v39 = vsub.f32 %v1775_v4, %v1823_v28  ;;  %v2624_v4 = vsub.f32 %v2528_v23, %v2576_v9 }
 0x5ad   : > { %v1919_v48 = vadd.f32 0.001, %v1871_v39  ;;  %v3180_v22 = vpop.permute.xlu1 %3179 }
 0x5ae   : > { %v3300_v10 = vadd.f32 %v3180_v22, %v2964_v7  ;;  %v3301_v55 = vadd.f32 %v3180_v22, %v2965_v3  ;;  %v6079_v7 = vld [vmem:[#allocation12_spill] sm:$0xff]  ;;  %v977_v22 = vpop.f32.mrf.mxu1 }
 0x5af   : > { %3763 = vrsqrt.f32 %v1919_v48  ;;  %vm2342_vm13 = vweird.f32 %v1919_v48  ;;  %v5772_v60 = vmul.f32 0.0051020407, %v6079_v7 }
 0x5b0   : > { %3396 = vst [vmem:[%s4666_s23 + $0x270] sm:$0xff] %v3300_v10  ;;  %v3100_v13 = vpop.permute.xlu2 %3099 }
 0x5b1   : > { %3397 = vst [vmem:[%s4666_s23 + $0x278] sm:$0xff] %v3301_v55  ;;  %v3268_v1 = vadd.f32 %v3100_v13, %v2932_v12  ;;  %v3269_v37 = vadd.f32 %v3100_v13, %v2933_v58  ;;  %v1811_v46 = vmul.f32 %v5772_v60, %v5772_v60  ;;  %v1138_v10 = vpop.f32.mrf.mxu2  ;;  %v1299_v55 = vpop.f32.mrf.mxu3 }
 0x5b2   : > { %v5779_v12 = vadd.f32 %v1299_v55, %v1138_v10  ;;  %v2531_v10 = vld [vmem:[%s4525_s13 + $0xe8] sm:$0xff] }
 0x5b3   : > { %3364 = vst [vmem:[%s4666_s23 + $0x170] sm:$0xff] %v3268_v1 }
 0x5b4   : > { %3365 = vst [vmem:[%s4666_s23 + $0x178] sm:$0xff] %v3269_v37 }
 0x5b5   : > { %v3764_v59 = vpop.eup %3763  ;;  %v2859_v20 = vpop.permute.xlu1 %2858 }
 0x5b6   : > { %v2337_v36 = vmul.f32 %v3764_v59, %v1919_v48  ;;  %vm2343_vm12 = vweird.f32 %v3764_v59  ;;  %v2970_v31 = vmul.f32 %v2859_v20, %v6077_v53  ;;  %v2971_v8 = vmul.f32 %v2859_v20, %v6078_v49 }
 0x5b7   : > { %1675 = vadd.xlane.f32.xlu2 %v1674_v26  ;;  %vm2344_vm14 = vmor %vm2342_vm13, %vm2343_vm12 }
 0x5b8   : > { %v2338_v11 = vmul.f32 %v3764_v59, %v2337_v36 }
 0x5ba   : > { %v2339_v2 = vmul.f32 0.5, %v2338_v11 }
 0x5bc   : > { %v2340_v61 = vsub.f32 1.5, %v2339_v2 }
 0x5bd   : > { %v3195_v15 = vpop.permute.xlu1 %3194 }
 0x5be   : > { %v2341_v29 = vmul.f32 %v3764_v59, %v2340_v61  ;;  %v3306_v56 = vadd.f32 %v3195_v15, %v2970_v31  ;;  %v3307_v42 = vadd.f32 %v3195_v15, %v2971_v8 }
 0x5c0   : > { %3402 = vst [vmem:[%s4666_s23 + $0x2a0] sm:$0xff] %v3306_v56  ;;  %v2345_v54 = vsel %vm2344_vm14, %v3764_v59, %v2341_v29 }
 0x5c1   : > { %3403 = vst [vmem:[%s4666_s23 + $0x2a8] sm:$0xff] %v3307_v42  ;;  %v5759_v0 = vmul.f32 %v2447_v18, %v2345_v54  ;;  %v6081_v42 = vld [vmem:[#allocation46_spill] sm:$0xff]  ;;  %v6082_v54 = vld [vmem:[#allocation47_spill] sm:$0xff] }
 0x5c3   : > { %v5762_v33 = vmul.f32 %v5759_v0, %v1727_v40  ;;  %v6080_v40 = vld [vmem:[#allocation29_spill] sm:$0xff] }
 0x5c4   : > { %v1763_v3 = vmul.f32 0.0051020407, %v6080_v40 }
 0x5c5   : > { %v2874_v32 = vpop.permute.xlu1 %2873 }
 0x5c6   : > { %v2976_v50 = vmul.f32 %v2874_v32, %v5431_v30  ;;  %v2977_v6 = vmul.f32 %v2874_v32, %v5433_v47  ;;  %v1859_v19 = vsub.f32 %v1763_v3, %v1811_v46  ;;  %v816_v47 = vpop.f32.mrf.mxu0 }
 0x5c7   : > { %v5777_v27 = vadd.f32 %v977_v22, %v816_v47 }
 0x5c8   : > { %v1907_v48 = vadd.f32 0.001, %v1859_v19  ;;  %v2450_v19 = vld [vmem:[%s4519_s11 + $0x160] sm:$0xff] }
 0x5c9   : > { %v1443_v44 = vadd.f32 %v5779_v12, %v5777_v27  ;;  %v1540_v23 = vmul.f32 %v5777_v27, %v5777_v27 }
 0x5ca   : > { %3765 = vrsqrt.f32 %v1907_v48  ;;  %vm2222_vm1 = vweird.f32 %v1907_v48 }
 0x5cd   : > { %v3210_v28 = vpop.permute.xlu1 %3209 }
 0x5ce   : > { %v3312_v39 = vadd.f32 %v3210_v28, %v2976_v50  ;;  %v3313_v34 = vadd.f32 %v3210_v28, %v2977_v6  ;;  %v1541_v50 = vmul.f32 %v5779_v12, %v5779_v12 }
 0x5cf   : > { %3114 = vperm.xlu2 %3674, %v2624_v4  }
 0x5d0   : > { %3408 = vst [vmem:[%s4666_s23 + $0x2d0] sm:$0xff] %v3312_v39  ;;  %v3766_v51 = vpop.eup %3765  ;;  %v1683_v39 = vadd.f32 %v1541_v50, %v1540_v23 }
 0x5d1   : > { %3409 = vst [vmem:[%s4666_s23 + $0x2d8] sm:$0xff] %v3313_v34  ;;  %v2217_v59 = vmul.f32 %v3766_v51, %v1907_v48  ;;  %vm2223_vm15 = vweird.f32 %v3766_v51 }
 0x5d2   : > { %vm2224_vm2 = vmor %vm2222_vm1, %vm2223_vm15 }
 0x5d3   : > { %v2218_v20 = vmul.f32 %v3766_v51, %v2217_v59 }
 0x5d5   : > { %v2219_v26 = vmul.f32 0.5, %v2218_v20 }
 0x5d7   : > { %v2220_v36 = vsub.f32 1.5, %v2219_v26 }
 0x5d9   : > { %v2221_v11 = vmul.f32 %v3766_v51, %v2220_v36 }
 0x5e9   : > { %v1436_v61 = vpop.xlane.xlu2 %1435 }
 0x5ea   : > { %v2879_v30 = vpop.permute.xlu0 %2878  ;;  %v1730_v31 = vmul.f32 0.0051020407, %v1436_v61 }
 0x5eb   : > { %v2978_v21 = vmul.f32 %v2879_v30, %v5588_v24  ;;  %v2979_v58 = vmul.f32 %v2879_v30, %v5591_v41  ;;  %v2225_v24 = vsel %vm2224_vm2, %v3766_v51, %v2221_v11  ;;  %v2435_v41 = vld [vmem:[%s4519_s11 + $0xe8] sm:$0xff]  ;;  %v6083_v11 = vld [vmem:[#allocation48_spill] sm:$0xff] }
 0x5ec   : > { %v2483_v2 = vmul.f32 %v2435_v41, %v2225_v24  ;;  %v1826_v8 = vmul.f32 %v1730_v31, %v1730_v31  ;;  %v6084_v24 = vld [vmem:[#allocation49_spill] sm:$0xff] }
 0x5ee   : > { %v2579_v22 = vmul.f32 %v2483_v2, %v5772_v60  ;;  %v2540_v60 = vld [vmem:[%s4525_s13 + $0x130] sm:$0xff] }
 0x5f0   : > { %v2627_v55 = vsub.f32 %v2531_v10, %v2579_v22 }
 0x5f1   : > { %v2779_v53 = vpop.permute.xlu2 %2778 }
 0x5f2   : > { %v3215_v13 = vpop.permute.xlu0 %3214  ;;  %v2938_v18 = vmul.f32 %v2779_v53, %v6081_v42  ;;  %v2939_v32 = vmul.f32 %v2779_v53, %v6082_v54  ;;  %v2453_v42 = vld [vmem:[%s4519_s11 + $0x178] sm:$0xff] }
 0x5f3   : > { %v3314_v1 = vadd.f32 %v3215_v13, %v2978_v21  ;;  %v3315_v37 = vadd.f32 %v3215_v13, %v2979_v58  ;;  %v2534_v21 = vld [vmem:[%s4525_s13 + $0x100] sm:$0xff]  ;;  %v2537_v13 = vld [vmem:[%s4525_s13 + $0x118] sm:$0xff] }
 0x5f4   : > { %v2630_v58 = vsub.f32 %v2534_v21, %v5478_v45 }
 0x5f5   : > { %3410 = vst [vmem:[%s4666_s23 + $0x2e0] sm:$0xff] %v3314_v1  ;;  %v2633_v1 = vsub.f32 %v2537_v13, %v5573_v38 }
 0x5f6   : > { %3411 = vst [vmem:[%s4666_s23 + $0x2e8] sm:$0xff] %v3315_v37  ;;  %v2636_v37 = vsub.f32 %v2540_v60, %v5696_v62 }
 0x5f8   : > { %1444 = vadd.xlane.f32.xlu2 %v1443_v44  ;;  %v2546_v44 = vld [vmem:[%s4525_s13 + $0x160] sm:$0xff] }
 0x610   : > { %2793 = vperm.xlu2 %3674, %v2483_v2  }
 0x62a   : > { %v1676_v49 = vpop.xlane.xlu2 %1675 }
 0x62b   : > { %v1778_v15 = vmul.f32 0.0051020407, %v1676_v49 }
 0x62d   : > { %v1874_v29 = vsub.f32 %v1778_v15, %v1826_v8 }
 0x62f   : > { %v1922_v56 = vadd.f32 0.001, %v1874_v29 }
 0x631   : > { %3767 = vrsqrt.f32 %v1922_v56  ;;  %vm2372_vm4 = vweird.f32 %v1922_v56 }
 0x632   : > { %v3115_v9 = vpop.permute.xlu2 %3114 }
 0x633   : > { %v3274_v6 = vadd.f32 %v3115_v9, %v2938_v18  ;;  %v3275_v28 = vadd.f32 %v3115_v9, %v2939_v32  ;;  %v6085_v18 = vld [vmem:[#allocation52_spill] sm:$0xff]  ;;  %v6086_v32 = vld [vmem:[#allocation53_spill] sm:$0xff] }
 0x635   : > { %3370 = vst [vmem:[%s4666_s23 + $0x1a0] sm:$0xff] %v3274_v6 }
 0x636   : > { %3371 = vst [vmem:[%s4666_s23 + $0x1a8] sm:$0xff] %v3275_v28 }
 0x637   : > { %v3768_v4 = vpop.eup %3767 }
 0x638   : > { %v2367_v34 = vmul.f32 %v3768_v4, %v1922_v56  ;;  %vm2373_vm3 = vweird.f32 %v3768_v4 }
 0x639   : > { %1684 = vadd.xlane.f32.xlu2 %v1683_v39  ;;  %vm2374_vm5 = vmor %vm2372_vm4, %vm2373_vm3 }
 0x63a   : > { %v2368_v7 = vmul.f32 %v3768_v4, %v2367_v34  ;;  %v2549_v34 = vld [vmem:[%s4525_s13 + $0x178] sm:$0xff] }
 0x63c   : > { %v2369_v40 = vmul.f32 0.5, %v2368_v7 }
 0x63e   : > { %v2370_v3 = vsub.f32 1.5, %v2369_v40 }
 0x640   : > { %v2371_v46 = vmul.f32 %v3768_v4, %v2370_v3  ;;  %v6087_v3 = vld [vmem:[#allocation58_spill] sm:$0xff] }
 0x642   : > { %v2375_v48 = vsel %vm2374_vm5, %v3768_v4, %v2371_v46 }
 0x643   : > { %v2498_v30 = vmul.f32 %v2450_v19, %v2375_v48 }
 0x645   : > { %v2594_v47 = vmul.f32 %v2498_v30, %v1730_v31 }
 0x651   : > { %3129 = vperm.xlu2 %3674, %v2627_v55  }
 0x659   : > { %2808 = vperm.xlu2 %3674, %v5469_v52   ;;  %v2543_v52 = vld [vmem:[%s4525_s13 + $0x148] sm:$0xff] }
 0x65a   : > { %v2639_v51 = vsub.f32 %v2543_v52, %v5762_v33 }
 0x661   : > { %3144 = vperm.xlu2 %3674, %v2630_v58  }
 0x669   : > { %2823 = vperm.xlu2 %3674, %v5570_v57   ;;  %v2642_v57 = vsub.f32 %v2546_v44, %v2594_v47 }
 0x66b   : > { %v1445_v45 = vpop.xlane.xlu2 %1444 }
 0x66c   : > { %v1733_v59 = vmul.f32 0.0051020407, %v1445_v45 }
 0x66e   : > { %v1829_v20 = vmul.f32 %v1733_v59, %v1733_v59 }
 0x671   : > { %3159 = vperm.xlu2 %3674, %v2633_v1  }
 0x673   : > { %v2794_v38 = vpop.permute.xlu2 %2793 }
 0x674   : > { %v2945_v41 = vmul.f32 %v2794_v38, %v6084_v24 }
 0x679   : > { %2838 = vperm.xlu2 %3674, %v5692_v16  }
 0x681   : > { %3174 = vperm.xlu2 %3674, %v2636_v37  }
 0x689   : > { %2853 = vperm.xlu2 %3674, %v5759_v0   ;;  %v2944_v0 = vmul.f32 %v2794_v38, %v6083_v11 }
 0x691   : > { %3189 = vperm.xlu2 %3674, %v2639_v51  }
 0x699   : > { %2868 = vperm.xlu2 %3674, %v2498_v30  }
 0x6a1   : > { %3204 = vperm.xlu2 %3674, %v2642_v57  }
 0x6ac   : > { %v1685_v16 = vpop.xlane.xlu2 %1684 }
 0x6ad   : > { %v1781_v26 = vmul.f32 0.0051020407, %v1685_v16 }
 0x6af   : > { %v1877_v62 = vsub.f32 %v1781_v26, %v1829_v20 }
 0x6b1   : > { %v1925_v36 = vadd.f32 0.001, %v1877_v62 }
 0x6b3   : > { %3769 = vrsqrt.f32 %v1925_v36  ;;  %vm2402_vm0 = vweird.f32 %v1925_v36 }
 0x6b4   : > { %v3130_v33 = vpop.permute.xlu2 %3129 }
 0x6b5   : > { %v3280_v2 = vadd.f32 %v3130_v33, %v2944_v0  ;;  %v3281_v61 = vadd.f32 %v3130_v33, %v2945_v41 }
 0x6b7   : > { %3376 = vst [vmem:[%s4666_s23 + $0x1d0] sm:$0xff] %v3280_v2 }
 0x6b8   : > { %3377 = vst [vmem:[%s4666_s23 + $0x1d8] sm:$0xff] %v3281_v61 }
 0x6b9   : > { %v3770_v53 = vpop.eup %3769 }
 0x6ba   : > { %v2397_v31 = vmul.f32 %v3770_v53, %v1925_v36  ;;  %vm2403_vm6 = vweird.f32 %v3770_v53 }
 0x6bb   : > { %vm2404_vm7 = vmor %vm2402_vm0, %vm2403_vm6 }
 0x6bc   : > { %v2398_v49 = vmul.f32 %v3770_v53, %v2397_v31  ;;  %v2809_v8 = vpop.permute.xlu2 %2808 }
 0x6bd   : > { %v2950_v54 = vmul.f32 %v2809_v8, %v6085_v18  ;;  %v2951_v9 = vmul.f32 %v2809_v8, %v6086_v32 }
 0x6be   : > { %v2399_v15 = vmul.f32 0.5, %v2398_v49 }
 0x6c0   : > { %v2400_v29 = vsub.f32 1.5, %v2399_v15 }
 0x6c2   : > { %v2401_v56 = vmul.f32 %v3770_v53, %v2400_v29 }
 0x6c4   : > { %v3145_v23 = vpop.permute.xlu2 %3144  ;;  %v2405_v50 = vsel %vm2404_vm7, %v3770_v53, %v2401_v56 }
 0x6c5   : > { %v3286_v6 = vadd.f32 %v3145_v23, %v2950_v54  ;;  %v3287_v28 = vadd.f32 %v3145_v23, %v2951_v9  ;;  %v2501_v4 = vmul.f32 %v2453_v42, %v2405_v50 }
 0x6c7   : > { %3382 = vst [vmem:[%s4666_s23 + $0x200] sm:$0xff] %v3286_v6  ;;  %2883 = vperm.xlu2 %3674, %v2501_v4   ;;  %v2597_v39 = vmul.f32 %v2501_v4, %v1733_v59 }
 0x6c8   : > { %3383 = vst [vmem:[%s4666_s23 + $0x208] sm:$0xff] %v3287_v28 }
 0x6c9   : > { %v2645_v40 = vsub.f32 %v2549_v34, %v2597_v39 }
 0x6cc   : > { %v2824_v7 = vpop.permute.xlu2 %2823 }
 0x6cd   : > { %v2956_v46 = vmul.f32 %v2824_v7, %v6087_v3  ;;  %v2957_v19 = vmul.f32 %v2824_v7, %v5111_v17 }
 0x6cf   : > { %3219 = vperm.xlu2 %3674, %v2645_v40  }
 0x6d4   : > { %v3160_v48 = vpop.permute.xlu2 %3159 }
 0x6d5   : > { %v3292_v30 = vadd.f32 %v3160_v48, %v2956_v46  ;;  %v3293_v47 = vadd.f32 %v3160_v48, %v2957_v19 }
 0x6d7   : > { %3388 = vst [vmem:[%s4666_s23 + $0x230] sm:$0xff] %v3292_v30 }
 0x6d8   : > { %3389 = vst [vmem:[%s4666_s23 + $0x238] sm:$0xff] %v3293_v47 }
 0x6dc   : > { %v2839_v22 = vpop.permute.xlu2 %2838 }
 0x6dd   : > { %v2962_v10 = vmul.f32 %v2839_v22, %v5227_v63  ;;  %v2963_v55 = vmul.f32 %v2839_v22, %v5229_v43 }
 0x6e4   : > { %v3175_v21 = vpop.permute.xlu2 %3174 }
 0x6e5   : > { %v3298_v58 = vadd.f32 %v3175_v21, %v2962_v10  ;;  %v3299_v13 = vadd.f32 %v3175_v21, %v2963_v55 }
 0x6e7   : > { %3394 = vst [vmem:[%s4666_s23 + $0x260] sm:$0xff] %v3298_v58 }
 0x6e8   : > { %3395 = vst [vmem:[%s4666_s23 + $0x268] sm:$0xff] %v3299_v13 }
 0x6ec   : > { %v2854_v17 = vpop.permute.xlu2 %2853 }
 0x6ed   : > { %v2968_v1 = vmul.f32 %v2854_v17, %v5327_v25  ;;  %v2969_v60 = vmul.f32 %v2854_v17, %v5329_v35 }
 0x6f4   : > { %v3190_v37 = vpop.permute.xlu2 %3189 }
 0x6f5   : > { %v3304_v52 = vadd.f32 %v3190_v37, %v2968_v1  ;;  %v3305_v51 = vadd.f32 %v3190_v37, %v2969_v60 }
 0x6f7   : > { %3400 = vst [vmem:[%s4666_s23 + $0x290] sm:$0xff] %v3304_v52 }
 0x6f8   : > { %3401 = vst [vmem:[%s4666_s23 + $0x298] sm:$0xff] %v3305_v51 }
 0x6fc   : > { %v2869_v63 = vpop.permute.xlu2 %2868 }
 0x6fd   : > { %v2974_v43 = vmul.f32 %v2869_v63, %v6065_v14  ;;  %v2975_v45 = vmul.f32 %v2869_v63, %v6066_v5 }
 0x704   : > { %v3205_v44 = vpop.permute.xlu2 %3204 }
 0x705   : > { %v3310_v57 = vadd.f32 %v3205_v44, %v2974_v43  ;;  %v3311_v38 = vadd.f32 %v3205_v44, %v2975_v45 }
 0x707   : > { %3406 = vst [vmem:[%s4666_s23 + $0x2c0] sm:$0xff] %v3310_v57 }
 0x708   : > { %3407 = vst [vmem:[%s4666_s23 + $0x2c8] sm:$0xff] %v3311_v38 }
 0x721   : > { %v2884_v25 = vpop.permute.xlu2 %2883 }
 0x722   : > { %v2980_v35 = vmul.f32 %v2884_v25, %v5777_v27  ;;  %v2981_v14 = vmul.f32 %v2884_v25, %v5779_v12 }
 0x729   : > { %v3220_v5 = vpop.permute.xlu2 %3219 }
 0x72a   : > { %v3316_v59 = vadd.f32 %v3220_v5, %v2980_v35  ;;  %v3317_v16 = vadd.f32 %v3220_v5, %v2981_v14 }
 0x72c   : > { %3412 = vst [vmem:[%s4666_s23 + $0x2f0] sm:$0xff] %v3316_v59 }
 0x72d   : > { %3413 = vst [vmem:[%s4666_s23 + $0x2f8] sm:$0xff] %v3317_v16 }
 0x72e   : > { %3798 = shalt.err (!%p3795_p3)
}
 0x72f   : > { %s3836_s15 = smov 256   ;;  %s3837_s16 = smov 16  }
 0x730   : > { %3630 = dma.vmem_to_hbm [thread:$0]  (%p3906_p5), %s3429_s7, 12288, %s3431_s6, %s3415_s22, %s3836_s15, %s3836_s15, %s3837_s16  }
 0x731 PF: > { %p3636_p4 = scmp.ge.s32.totalorder %s3833_s21, 2  ;;  %s3445_s23 = sand.u32 1, %s3821_s18  }
 0x732   : > { %s3446_s14 = scalar_lea.sflag [#allocation3], %s3445_s23 }
 0x733   : > { %p3633_p7 = pnand %p3636_p4, %p3910_p6 }
 0x735   : > { %p3634_p8 = pneg %p3633_p7 }
 0x737   : > { %3816 = dma.done.wait (%p3634_p8), %s3446_s14, 12288  }
 0x738   : > { %3818 = vsyncadd (%p3634_p8), %s3446_s14, 4294955008  ;;  %p15_p9 = scmp.ge.s32.totalorder %s3893_s24, 4   ;;  %s6088_s18 = smov %s3825_s19 }
 0x739   : > { %s6089_s19 = smov %s3829_s20  ;;  %s6090_s20 = smov %s3904_s27 }
 0x73a   : > { %s6091_s21 = smov %s3893_s24  ;;  %17 = sbr.rel (!%p15_p9) target bundleno = 3 (0x3), region = 81 }
 0x73f   :  { %3452 = vsyncpa [#allocation3], 1 }
 0x740   :  { %3454 = vsyncpa [#allocation3 + $0x1], 1 }

</bundles_post_ra>
